<compile_context>
chip_gen: v7x
topology: tpu7x:2x2x1
jax: 0.10.0
libtpu: 0.0.40
codegen_flags: <defaults>
</compile_context>

<pallas_src>
import jax
import jax.numpy as jnp
from jax import lax
from jax.experimental import pallas as pl
from jax.experimental.pallas import tpu as pltpu

# --- small, self-consistent hyper-parameters implied by the module -----------
EMBEDDING_DIM = 32          # BERT hidden size stand-in
HIDDEN_DIM = 32             # BiLSTM output width (2 * 16)
LSTM_H = HIDDEN_DIM // 2    # per-direction LSTM hidden size
NUM_LSTM_LAYERS = 2
LABEL_SIZE = 8
VOCAB_SIZE = 100
MAX_POS = 64


# ----------------------------- fused kernel ----------------------------------
def _msar_ner_kernel(emb_ref, mask_ref, seqend_ref,
                     wih1_ref, whh1_ref, b1_ref,
                     wih2_ref, whh2_ref, b2_ref,
                     wcls_ref, bcls_ref,
                     transT_ref, start_ref, end_ref,
                     tags_ref,
                     hs_sc, outf_sc, outb_sc):
    # emb_ref:   [T*B, E]   flattened time-major embeddings (row = t*B + b)
    # mask_ref:  [T*B, 1]   float mask, same row layout
    # seqend_ref:[B, 1]     int32, sum(mask) - 1 per sequence
    # wih*:      [Din, 8H]  input->hidden, cols = [fwd (i,f,o,g) | bwd (i,f,o,g)]
    # whh*:      [2H, 8H]   block-diagonal hidden->hidden (fwd rows | bwd rows)
    # b*:        [1, 8H]    b_ih + b_hh folded
    # wcls:[2H,L] bcls:[1,L] transT:[L,L]=transitions.T start/end:[1,L]
    # tags_ref:  [B, T]     int32 padded Viterbi decode
    B, T = tags_ref.shape
    H = whh1_ref.shape[0] // 2
    L = transT_ref.shape[0]

    def bilstm_layer(gx, whh_ref):
        """gx: [T*B, 8H] precomputed input projection (+bias) for both
        directions.  Writes fwd/bwd hidden sequences to outf_sc / outb_sc."""
        whh = whh_ref[...]                                  # hoisted [2H, 8H]
        hs_sc[...] = jnp.zeros_like(hs_sc)                  # [h_fwd | h_bwd]
        c_f = jnp.zeros((B, H), jnp.float32)
        c_b = jnp.zeros((B, H), jnp.float32)
        for t in range(T):                                  # static unroll (T small)
            # single MXU push covers both directions (block-diag W_hh)
            gh = jnp.dot(hs_sc[...], whh, preferred_element_type=jnp.float32)
            r_f = t * B
            r_b = (T - 1 - t) * B
            g_f = gx[r_f:r_f + B, :4 * H] + gh[:, :4 * H]   # fwd gates at time t
            g_b = gx[r_b:r_b + B, 4 * H:] + gh[:, 4 * H:]   # bwd gates at time T-1-t
            s_f = jax.nn.sigmoid(g_f[:, :3 * H])            # [i|f|o] in one pass
            s_b = jax.nn.sigmoid(g_b[:, :3 * H])
            z_f = jnp.tanh(g_f[:, 3 * H:])                  # cell candidate g
            z_b = jnp.tanh(g_b[:, 3 * H:])
            c_f = s_f[:, H:2 * H] * c_f + s_f[:, :H] * z_f
            c_b = s_b[:, H:2 * H] * c_b + s_b[:, :H] * z_b
            h_f = s_f[:, 2 * H:] * jnp.tanh(c_f)
            h_b = s_b[:, 2 * H:] * jnp.tanh(c_b)
            hs_sc[:, :H] = h_f
            hs_sc[:, H:] = h_b
            outf_sc[r_f:r_f + B, :] = h_f                   # output at time t
            outb_sc[r_b:r_b + B, :] = h_b                   # output at time T-1-t

    # ----- BiLSTM layer 1 (input projection hoisted to one matmul) -----------
    x = emb_ref[...]                                        # [T*B, E]
    gx1 = jnp.dot(x, wih1_ref[...],
                  preferred_element_type=jnp.float32) + b1_ref[...]
    bilstm_layer(gx1, whh1_ref)

    # ----- BiLSTM layer 2 (split-weight form avoids a fwd/bwd concat) --------
    f1 = outf_sc[...]                                       # [T*B, H]
    r1 = outb_sc[...]
    w2 = wih2_ref[...]
    gx2 = (jnp.dot(f1, w2[:H, :], preferred_element_type=jnp.float32)
           + jnp.dot(r1, w2[H:, :], preferred_element_type=jnp.float32)
           + b2_ref[...])
    bilstm_layer(gx2, whh2_ref)

    # ----- classifier (nn.Dropout = identity at inference) -------------------
    f2 = outf_sc[...]
    r2 = outb_sc[...]
    wc = wcls_ref[...]
    em = (jnp.dot(f2, wc[:H, :], preferred_element_type=jnp.float32)
          + jnp.dot(r2, wc[H:, :], preferred_element_type=jnp.float32)
          + bcls_ref[...])                                  # [T*B, L] emissions

    # ----- CRF Viterbi forward (time-major, masked updates) ------------------
    trb = transT_ref[...][None, :, :]                       # [1, Lcur, Lprev], hoisted
    mask_all = mask_ref[...]                                # [T*B, 1], hoisted
    score = start_ref[...] + em[0:B, :]                     # [B, L]
    hist = []                                               # hist[k] = backptrs at time k+1
    for t in range(1, T):                                   # static unroll
        em_t = em[t * B:(t + 1) * B, :]                     # [B, L]
        m_t = mask_all[t * B:(t + 1) * B, :]                # [B, 1]
        # ns[b, j, i] = score[b, i] + transitions[i, j] + emissions[b, j]
        ns = score[:, None, :] + trb + em_t[:, :, None]     # [B, Lcur, Lprev]
        best = jnp.max(ns, axis=2)
        ii = lax.broadcasted_iota(jnp.int32, ns.shape, 2)
        # tie-break: smallest previous-tag index (torch tie behavior may differ)
        bp = jnp.min(jnp.where(ns == best[:, :, None], ii, L), axis=2).astype(jnp.int32)
        hist.append(bp)
        # backptrs at masked timesteps are never read (mask is a contiguous prefix)
        score = jnp.where(m_t > 0.0, best, score)
    final = score + end_ref[...]                            # [B, L]

    # ----- in-kernel backtracking (vectorized one-hot gather) ----------------
    lane = lax.broadcasted_iota(jnp.int32, (B, L), 1)
    time_iota = lax.broadcasted_iota(jnp.int32, (B, T), 1)
    seq_end = seqend_ref[...]                               # [B, 1] int32
    best_final = jnp.max(final, axis=1, keepdims=True)
    last_tag = jnp.min(jnp.where(final == best_final, lane, L),
                       axis=1, keepdims=True).astype(jnp.int32)   # [B, 1]
    tags = jnp.zeros((B, T), jnp.int32)
    tag_next = last_tag
    for p in range(T - 1, -1, -1):                          # static unroll
        ptr = hist[min(p, T - 2)]                           # backptrs at time min(p+1, T-1)
        prev = jnp.sum(jnp.where(lane == tag_next, ptr, 0),
                       axis=1, keepdims=True)               # ptr[b, tag_next[b]]
        tag_p = jnp.where(p >= seq_end, last_tag, prev).astype(jnp.int32)
        tags = jnp.where(time_iota == p, tag_p, tags)
        tag_next = tag_p
    tags_ref[...] = tags


# ------------------------------ full forward ----------------------------------
def bert_embed_flat(input_ids, params):
    # TODO(synk): the pretrained BERT transformer encoder stack is checkpoint-
    # dependent; replaced by a deterministic token+position embedding +
    # LayerNorm stand-in producing flattened time-major [T*B, EMBEDDING_DIM].
    B, T = input_ids.shape
    ids_flat = input_ids.T.reshape(-1)                      # [T*B], row = t*B + b
    pos_flat = jnp.repeat(jnp.arange(T), B)                 # [T*B]
    x = params["tok_emb"][ids_flat] + params["pos_emb"][pos_flat]
    mu = jnp.mean(x, axis=-1, keepdims=True)
    var = jnp.var(x, axis=-1, keepdims=True)
    x = (x - mu) * lax.rsqrt(var + 1e-12)
    return x * params["ln_gamma"] + params["ln_beta"]       # [T*B, E]


def msar_ner_decode(input_ids, mask, params):
    # mask must be a contiguous prefix with mask[:, 0] == 1 (torchcrf contract).
    # TODO(synk): compute_loss=True path (CRF negative log-likelihood) not implemented.
    B, T = input_ids.shape
    H = LSTM_H
    emb_flat = bert_embed_flat(input_ids, params)           # [T*B, E]
    mask_flat = mask.T.astype(jnp.float32).reshape(T * B, 1)
    seq_end = jnp.sum(mask.astype(jnp.int32), axis=1, keepdims=True) - 1  # [B, 1]

    wih1, whh1, b1 = params["lstm1"]
    wih2, whh2, b2 = params["lstm2"]

    return pl.pallas_call(
        _msar_ner_kernel,
        out_shape=jax.ShapeDtypeStruct((B, T), jnp.int32),
        in_specs=[pl.BlockSpec(memory_space=pltpu.MemorySpace.VMEM)] * 14,
        out_specs=pl.BlockSpec(memory_space=pltpu.MemorySpace.VMEM),
        scratch_shapes=[
            pltpu.VMEM((B, 2 * H), jnp.float32),        # hs_sc [h_fwd | h_bwd]
            pltpu.VMEM((T * B, H), jnp.float32),        # outf_sc
            pltpu.VMEM((T * B, H), jnp.float32),        # outb_sc
        ],
    )(emb_flat, mask_flat, seq_end,
      wih1, whh1, b1, wih2, whh2, b2,
      params["cls_w"], params["cls_b"],
      params["crf_trans_t"], params["crf_start"], params["crf_end"])


# ---------------------------- deterministic params ----------------------------
def init_params(key):
    keys = iter(jax.random.split(key, 64))

    def nrm(shape, scale=0.1):
        return (scale * jax.random.normal(next(keys), shape)).astype(jnp.float32)

    H = LSTM_H
    params = {
        "tok_emb": nrm((VOCAB_SIZE, EMBEDDING_DIM), 0.5),
        "pos_emb": nrm((MAX_POS, EMBEDDING_DIM), 0.1),
        "ln_gamma": jnp.ones((EMBEDDING_DIM,), jnp.float32),
        "ln_beta": jnp.zeros((EMBEDDING_DIM,), jnp.float32),
    }

    def pack_layer(din):
        # per direction: W_ih [din, 4H] (pre-transposed vs PyTorch [4H, din]),
        # W_hh [H, 4H], b [1, 4H] (= b_ih + b_hh).  Gate columns ordered
        # [i, f, o | g] so sigmoid gates are contiguous.
        wih_f, wih_b = nrm((din, 4 * H), 0.2), nrm((din, 4 * H), 0.2)
        whh_f, whh_b = nrm((H, 4 * H), 0.2), nrm((H, 4 * H), 0.2)
        b_f, b_b = nrm((1, 4 * H), 0.1), nrm((1, 4 * H), 0.1)
        wih = jnp.concatenate([wih_f, wih_b], axis=1)            # [din, 8H]
        b = jnp.concatenate([b_f, b_b], axis=1)                  # [1, 8H]
        whh = jnp.zeros((2 * H, 8 * H), jnp.float32)             # block-diagonal pack
        whh = whh.at[:H, :4 * H].set(whh_f)
        whh = whh.at[H:, 4 * H:].set(whh_b)
        return wih, whh, b

    params["lstm1"] = pack_layer(EMBEDDING_DIM)
    params["lstm2"] = pack_layer(HIDDEN_DIM)
    params["cls_w"] = nrm((HIDDEN_DIM, LABEL_SIZE), 0.2)   # pre-transposed linear weight
    params["cls_b"] = nrm((1, LABEL_SIZE), 0.1)
    crf_trans = nrm((LABEL_SIZE, LABEL_SIZE), 0.1)
    params["crf_trans_t"] = crf_trans.T                    # pre-transposed [cur, prev]
    params["crf_start"] = nrm((1, LABEL_SIZE), 0.1)
    params["crf_end"] = nrm((1, LABEL_SIZE), 0.1)
    return params


if __name__ == "__main__":
    key = jax.random.PRNGKey(0)
    k_ids, k_params = jax.random.split(key)
    B, T = 2, 8
    input_ids = jax.random.randint(k_ids, (B, T), 0, VOCAB_SIZE)
    # mask[:, 0] must be 1 and mask must be a contiguous prefix (torchcrf contract);
    # second sequence has length 6.
    mask = jnp.array([[1] * T, [1] * 6 + [0] * (T - 6)], dtype=jnp.int32)
    params = init_params(k_params)

    decode = jax.jit(msar_ner_decode)(input_ids, mask, params)
    decode = jax.block_until_ready(decode)
    assert decode.shape == (B, T)
    assert decode.dtype == jnp.int32
    print("KERNEL_OK")
</pallas_src>

<mosaic_0001>
module attributes {stable_mosaic.version = 11 : i64} {
  func.func @_msar_ner_kernel(%arg0: memref<16x32xf32, #tpu.memory_space<vmem>>, %arg1: memref<16x1xf32, #tpu.memory_space<vmem>>, %arg2: memref<2x1xi32, #tpu.memory_space<vmem>>, %arg3: memref<32x128xf32, #tpu.memory_space<vmem>>, %arg4: memref<32x128xf32, #tpu.memory_space<vmem>>, %arg5: memref<1x128xf32, #tpu.memory_space<vmem>>, %arg6: memref<32x128xf32, #tpu.memory_space<vmem>>, %arg7: memref<32x128xf32, #tpu.memory_space<vmem>>, %arg8: memref<1x128xf32, #tpu.memory_space<vmem>>, %arg9: memref<32x8xf32, #tpu.memory_space<vmem>>, %arg10: memref<1x8xf32, #tpu.memory_space<vmem>>, %arg11: memref<8x8xf32, #tpu.memory_space<vmem>>, %arg12: memref<1x8xf32, #tpu.memory_space<vmem>>, %arg13: memref<1x8xf32, #tpu.memory_space<vmem>>, %arg14: memref<2x8xi32, #tpu.memory_space<vmem>>, %arg15: memref<2x32xf32, #tpu.memory_space<vmem>>, %arg16: memref<16x16xf32, #tpu.memory_space<vmem>>, %arg17: memref<16x16xf32, #tpu.memory_space<vmem>>) attributes {dimension_semantics = [], scalar_prefetch = 0 : i64, scratch_operands = 3 : i64, tpu.core_type = #tpu.core_type<tc>} {
    %c0 = arith.constant 0 : index
    %c0_0 = arith.constant 0 : index
    %0 = vector.load %arg0[%c0, %c0_0] : memref<16x32xf32, #tpu.memory_space<vmem>>, vector<16x32xf32>
    %c0_1 = arith.constant 0 : index
    %c0_2 = arith.constant 0 : index
    %1 = vector.load %arg3[%c0_1, %c0_2] : memref<32x128xf32, #tpu.memory_space<vmem>>, vector<32x128xf32>
    %cst = arith.constant dense<0.000000e+00> : vector<16x128xf32>
    %2 = tpu.matmul %0, %1, %cst {dimension_numbers = #tpu.dot_dimension_numbers<[1], [0], [0], [1], [0, 0, 1, 1], [], []>} : vector<16x32xf32>, vector<32x128xf32>, vector<16x128xf32> -> vector<16x128xf32>
    %c0_3 = arith.constant 0 : index
    %c0_4 = arith.constant 0 : index
    %3 = vector.load %arg5[%c0_3, %c0_4] : memref<1x128xf32, #tpu.memory_space<vmem>>, vector<1x128xf32>
    %4 = vector.broadcast %3 : vector<1x128xf32> to vector<16x128xf32>
    %5 = arith.addf %2, %4 : vector<16x128xf32>
    %c0_5 = arith.constant 0 : index
    %c0_6 = arith.constant 0 : index
    %6 = vector.load %arg4[%c0_5, %c0_6] : memref<32x128xf32, #tpu.memory_space<vmem>>, vector<32x128xf32>
    %cst_7 = arith.constant 0.000000e+00 : f32
    %7 = vector.broadcast %cst_7 : f32 to vector<2x32xf32>
    %c0_8 = arith.constant 0 : index
    %c0_9 = arith.constant 0 : index
    %8 = vector.load %arg15[%c0_8, %c0_9] : memref<2x32xf32, #tpu.memory_space<vmem>>, vector<2x32xf32>
    tpu.vector_store %arg15[%c0_8, %c0_9], %7 {strides = array<i32>} : memref<2x32xf32, #tpu.memory_space<vmem>>, vector<2x32xf32>,
    %cst_10 = arith.constant 0.000000e+00 : f32
    %9 = vector.broadcast %cst_10 : f32 to vector<2x16xf32>
    %cst_11 = arith.constant 0.000000e+00 : f32
    %10 = vector.broadcast %cst_11 : f32 to vector<2x16xf32>
    %c0_12 = arith.constant 0 : index
    %c0_13 = arith.constant 0 : index
    %11 = vector.load %arg15[%c0_12, %c0_13] : memref<2x32xf32, #tpu.memory_space<vmem>>, vector<2x32xf32>
    %cst_14 = arith.constant dense<0.000000e+00> : vector<2x128xf32>
    %12 = tpu.matmul %11, %6, %cst_14 {dimension_numbers = #tpu.dot_dimension_numbers<[1], [0], [0], [1], [0, 0, 1, 1], [], []>} : vector<2x32xf32>, vector<32x128xf32>, vector<2x128xf32> -> vector<2x128xf32>
    %13 = vector.extract_strided_slice %5 {offsets = [0, 0], sizes = [2, 64], strides = [1, 1]} : vector<16x128xf32> to vector<2x64xf32>
    %14 = vector.extract_strided_slice %12 {offsets = [0, 0], sizes = [2, 64], strides = [1, 1]} : vector<2x128xf32> to vector<2x64xf32>
    %15 = arith.addf %13, %14 : vector<2x64xf32>
    %16 = vector.extract_strided_slice %5 {offsets = [14, 64], sizes = [2, 64], strides = [1, 1]} : vector<16x128xf32> to vector<2x64xf32>
    %17 = vector.extract_strided_slice %12 {offsets = [0, 64], sizes = [2, 64], strides = [1, 1]} : vector<2x128xf32> to vector<2x64xf32>
    %18 = arith.addf %16, %17 : vector<2x64xf32>
    %19 = vector.extract_strided_slice %15 {offsets = [0, 0], sizes = [2, 48], strides = [1, 1]} : vector<2x64xf32> to vector<2x48xf32>
    %20 = arith.negf %19 : vector<2x48xf32>
    %21 = math.exp %20 : vector<2x48xf32>
    %cst_15 = arith.constant 1.000000e+00 : f32
    %22 = vector.broadcast %cst_15 : f32 to vector<2x48xf32>
    %23 = arith.addf %22, %21 : vector<2x48xf32>
    %24 = arith.divf %22, %23 : vector<2x48xf32>
    %25 = vector.extract_strided_slice %18 {offsets = [0, 0], sizes = [2, 48], strides = [1, 1]} : vector<2x64xf32> to vector<2x48xf32>
    %26 = arith.negf %25 : vector<2x48xf32>
    %27 = math.exp %26 : vector<2x48xf32>
    %cst_16 = arith.constant 1.000000e+00 : f32
    %28 = vector.broadcast %cst_16 : f32 to vector<2x48xf32>
    %29 = arith.addf %28, %27 : vector<2x48xf32>
    %30 = arith.divf %28, %29 : vector<2x48xf32>
    %31 = vector.extract_strided_slice %15 {offsets = [0, 48], sizes = [2, 16], strides = [1, 1]} : vector<2x64xf32> to vector<2x16xf32>
    %32 = math.tanh %31 : vector<2x16xf32>
    %33 = vector.extract_strided_slice %18 {offsets = [0, 48], sizes = [2, 16], strides = [1, 1]} : vector<2x64xf32> to vector<2x16xf32>
    %34 = math.tanh %33 : vector<2x16xf32>
    %35 = vector.extract_strided_slice %24 {offsets = [0, 16], sizes = [2, 16], strides = [1, 1]} : vector<2x48xf32> to vector<2x16xf32>
    %36 = arith.mulf %35, %9 : vector<2x16xf32>
    %37 = vector.extract_strided_slice %24 {offsets = [0, 0], sizes = [2, 16], strides = [1, 1]} : vector<2x48xf32> to vector<2x16xf32>
    %38 = arith.mulf %37, %32 : vector<2x16xf32>
    %39 = arith.addf %36, %38 : vector<2x16xf32>
    %40 = vector.extract_strided_slice %30 {offsets = [0, 16], sizes = [2, 16], strides = [1, 1]} : vector<2x48xf32> to vector<2x16xf32>
    %41 = arith.mulf %40, %10 : vector<2x16xf32>
    %42 = vector.extract_strided_slice %30 {offsets = [0, 0], sizes = [2, 16], strides = [1, 1]} : vector<2x48xf32> to vector<2x16xf32>
    %43 = arith.mulf %42, %34 : vector<2x16xf32>
    %44 = arith.addf %41, %43 : vector<2x16xf32>
    %45 = vector.extract_strided_slice %24 {offsets = [0, 32], sizes = [2, 16], strides = [1, 1]} : vector<2x48xf32> to vector<2x16xf32>
    %46 = math.tanh %39 : vector<2x16xf32>
    %47 = arith.mulf %45, %46 : vector<2x16xf32>
    %48 = vector.extract_strided_slice %30 {offsets = [0, 32], sizes = [2, 16], strides = [1, 1]} : vector<2x48xf32> to vector<2x16xf32>
    %49 = math.tanh %44 : vector<2x16xf32>
    %50 = arith.mulf %48, %49 : vector<2x16xf32>
    %c0_17 = arith.constant 0 : index
    %c0_18 = arith.constant 0 : index
    %51 = vector.load %arg15[%c0_17, %c0_18] : memref<2x32xf32, #tpu.memory_space<vmem>>, vector<2x16xf32>
    tpu.vector_store %arg15[%c0_17, %c0_18], %47 {strides = array<i32>} : memref<2x32xf32, #tpu.memory_space<vmem>>, vector<2x16xf32>,
    %c0_19 = arith.constant 0 : index
    %c16 = arith.constant 16 : index
    %52 = vector.load %arg15[%c0_19, %c16] : memref<2x32xf32, #tpu.memory_space<vmem>>, vector<2x16xf32>
    tpu.vector_store %arg15[%c0_19, %c16], %50 {strides = array<i32>} : memref<2x32xf32, #tpu.memory_space<vmem>>, vector<2x16xf32>,
    %c0_20 = arith.constant 0 : index
    %c0_21 = arith.constant 0 : index
    %53 = vector.load %arg16[%c0_20, %c0_21] : memref<16x16xf32, #tpu.memory_space<vmem>>, vector<2x16xf32>
    tpu.vector_store %arg16[%c0_20, %c0_21], %47 {strides = array<i32>} : memref<16x16xf32, #tpu.memory_space<vmem>>, vector<2x16xf32>,
    %c14 = arith.constant 14 : index
    %c0_22 = arith.constant 0 : index
    %54 = vector.load %arg17[%c14, %c0_22] : memref<16x16xf32, #tpu.memory_space<vmem>>, vector<2x16xf32>
    tpu.vector_store %arg17[%c14, %c0_22], %50 {strides = array<i32>} : memref<16x16xf32, #tpu.memory_space<vmem>>, vector<2x16xf32>,
    %c0_23 = arith.constant 0 : index
    %c0_24 = arith.constant 0 : index
    %55 = vector.load %arg15[%c0_23, %c0_24] : memref<2x32xf32, #tpu.memory_space<vmem>>, vector<2x32xf32>
    %cst_25 = arith.constant dense<0.000000e+00> : vector<2x128xf32>
    %56 = tpu.matmul %55, %6, %cst_25 {dimension_numbers = #tpu.dot_dimension_numbers<[1], [0], [0], [1], [0, 0, 1, 1], [], []>} : vector<2x32xf32>, vector<32x128xf32>, vector<2x128xf32> -> vector<2x128xf32>
    %57 = vector.extract_strided_slice %5 {offsets = [2, 0], sizes = [2, 64], strides = [1, 1]} : vector<16x128xf32> to vector<2x64xf32>
    %58 = vector.extract_strided_slice %56 {offsets = [0, 0], sizes = [2, 64], strides = [1, 1]} : vector<2x128xf32> to vector<2x64xf32>
    %59 = arith.addf %57, %58 : vector<2x64xf32>
    %60 = vector.extract_strided_slice %5 {offsets = [12, 64], sizes = [2, 64], strides = [1, 1]} : vector<16x128xf32> to vector<2x64xf32>
    %61 = vector.extract_strided_slice %56 {offsets = [0, 64], sizes = [2, 64], strides = [1, 1]} : vector<2x128xf32> to vector<2x64xf32>
    %62 = arith.addf %60, %61 : vector<2x64xf32>
    %63 = vector.extract_strided_slice %59 {offsets = [0, 0], sizes = [2, 48], strides = [1, 1]} : vector<2x64xf32> to vector<2x48xf32>
    %64 = arith.negf %63 : vector<2x48xf32>
    %65 = math.exp %64 : vector<2x48xf32>
    %cst_26 = arith.constant 1.000000e+00 : f32
    %66 = vector.broadcast %cst_26 : f32 to vector<2x48xf32>
    %67 = arith.addf %66, %65 : vector<2x48xf32>
    %68 = arith.divf %66, %67 : vector<2x48xf32>
    %69 = vector.extract_strided_slice %62 {offsets = [0, 0], sizes = [2, 48], strides = [1, 1]} : vector<2x64xf32> to vector<2x48xf32>
    %70 = arith.negf %69 : vector<2x48xf32>
    %71 = math.exp %70 : vector<2x48xf32>
    %cst_27 = arith.constant 1.000000e+00 : f32
    %72 = vector.broadcast %cst_27 : f32 to vector<2x48xf32>
    %73 = arith.addf %72, %71 : vector<2x48xf32>
    %74 = arith.divf %72, %73 : vector<2x48xf32>
    %75 = vector.extract_strided_slice %59 {offsets = [0, 48], sizes = [2, 16], strides = [1, 1]} : vector<2x64xf32> to vector<2x16xf32>
    %76 = math.tanh %75 : vector<2x16xf32>
    %77 = vector.extract_strided_slice %62 {offsets = [0, 48], sizes = [2, 16], strides = [1, 1]} : vector<2x64xf32> to vector<2x16xf32>
    %78 = math.tanh %77 : vector<2x16xf32>
    %79 = vector.extract_strided_slice %68 {offsets = [0, 16], sizes = [2, 16], strides = [1, 1]} : vector<2x48xf32> to vector<2x16xf32>
    %80 = arith.mulf %79, %39 : vector<2x16xf32>
    %81 = vector.extract_strided_slice %68 {offsets = [0, 0], sizes = [2, 16], strides = [1, 1]} : vector<2x48xf32> to vector<2x16xf32>
    %82 = arith.mulf %81, %76 : vector<2x16xf32>
    %83 = arith.addf %80, %82 : vector<2x16xf32>
    %84 = vector.extract_strided_slice %74 {offsets = [0, 16], sizes = [2, 16], strides = [1, 1]} : vector<2x48xf32> to vector<2x16xf32>
    %85 = arith.mulf %84, %44 : vector<2x16xf32>
    %86 = vector.extract_strided_slice %74 {offsets = [0, 0], sizes = [2, 16], strides = [1, 1]} : vector<2x48xf32> to vector<2x16xf32>
    %87 = arith.mulf %86, %78 : vector<2x16xf32>
    %88 = arith.addf %85, %87 : vector<2x16xf32>
    %89 = vector.extract_strided_slice %68 {offsets = [0, 32], sizes = [2, 16], strides = [1, 1]} : vector<2x48xf32> to vector<2x16xf32>
    %90 = math.tanh %83 : vector<2x16xf32>
    %91 = arith.mulf %89, %90 : vector<2x16xf32>
    %92 = vector.extract_strided_slice %74 {offsets = [0, 32], sizes = [2, 16], strides = [1, 1]} : vector<2x48xf32> to vector<2x16xf32>
    %93 = math.tanh %88 : vector<2x16xf32>
    %94 = arith.mulf %92, %93 : vector<2x16xf32>
    %c0_28 = arith.constant 0 : index
    %c0_29 = arith.constant 0 : index
    %95 = vector.load %arg15[%c0_28, %c0_29] : memref<2x32xf32, #tpu.memory_space<vmem>>, vector<2x16xf32>
    tpu.vector_store %arg15[%c0_28, %c0_29], %91 {strides = array<i32>} : memref<2x32xf32, #tpu.memory_space<vmem>>, vector<2x16xf32>,
    %c0_30 = arith.constant 0 : index
    %c16_31 = arith.constant 16 : index
    %96 = vector.load %arg15[%c0_30, %c16_31] : memref<2x32xf32, #tpu.memory_space<vmem>>, vector<2x16xf32>
    tpu.vector_store %arg15[%c0_30, %c16_31], %94 {strides = array<i32>} : memref<2x32xf32, #tpu.memory_space<vmem>>, vector<2x16xf32>,
    %c2 = arith.constant 2 : index
    %c0_32 = arith.constant 0 : index
    %97 = vector.load %arg16[%c2, %c0_32] : memref<16x16xf32, #tpu.memory_space<vmem>>, vector<2x16xf32>
    tpu.vector_store %arg16[%c2, %c0_32], %91 {strides = array<i32>} : memref<16x16xf32, #tpu.memory_space<vmem>>, vector<2x16xf32>,
    %c12 = arith.constant 12 : index
    %c0_33 = arith.constant 0 : index
    %98 = vector.load %arg17[%c12, %c0_33] : memref<16x16xf32, #tpu.memory_space<vmem>>, vector<2x16xf32>
    tpu.vector_store %arg17[%c12, %c0_33], %94 {strides = array<i32>} : memref<16x16xf32, #tpu.memory_space<vmem>>, vector<2x16xf32>,
    %c0_34 = arith.constant 0 : index
    %c0_35 = arith.constant 0 : index
    %99 = vector.load %arg15[%c0_34, %c0_35] : memref<2x32xf32, #tpu.memory_space<vmem>>, vector<2x32xf32>
    %cst_36 = arith.constant dense<0.000000e+00> : vector<2x128xf32>
    %100 = tpu.matmul %99, %6, %cst_36 {dimension_numbers = #tpu.dot_dimension_numbers<[1], [0], [0], [1], [0, 0, 1, 1], [], []>} : vector<2x32xf32>, vector<32x128xf32>, vector<2x128xf32> -> vector<2x128xf32>
    %101 = vector.extract_strided_slice %5 {offsets = [4, 0], sizes = [2, 64], strides = [1, 1]} : vector<16x128xf32> to vector<2x64xf32>
    %102 = vector.extract_strided_slice %100 {offsets = [0, 0], sizes = [2, 64], strides = [1, 1]} : vector<2x128xf32> to vector<2x64xf32>
    %103 = arith.addf %101, %102 : vector<2x64xf32>
    %104 = vector.extract_strided_slice %5 {offsets = [10, 64], sizes = [2, 64], strides = [1, 1]} : vector<16x128xf32> to vector<2x64xf32>
    %105 = vector.extract_strided_slice %100 {offsets = [0, 64], sizes = [2, 64], strides = [1, 1]} : vector<2x128xf32> to vector<2x64xf32>
    %106 = arith.addf %104, %105 : vector<2x64xf32>
    %107 = vector.extract_strided_slice %103 {offsets = [0, 0], sizes = [2, 48], strides = [1, 1]} : vector<2x64xf32> to vector<2x48xf32>
    %108 = arith.negf %107 : vector<2x48xf32>
    %109 = math.exp %108 : vector<2x48xf32>
    %cst_37 = arith.constant 1.000000e+00 : f32
    %110 = vector.broadcast %cst_37 : f32 to vector<2x48xf32>
    %111 = arith.addf %110, %109 : vector<2x48xf32>
    %112 = arith.divf %110, %111 : vector<2x48xf32>
    %113 = vector.extract_strided_slice %106 {offsets = [0, 0], sizes = [2, 48], strides = [1, 1]} : vector<2x64xf32> to vector<2x48xf32>
    %114 = arith.negf %113 : vector<2x48xf32>
    %115 = math.exp %114 : vector<2x48xf32>
    %cst_38 = arith.constant 1.000000e+00 : f32
    %116 = vector.broadcast %cst_38 : f32 to vector<2x48xf32>
    %117 = arith.addf %116, %115 : vector<2x48xf32>
    %118 = arith.divf %116, %117 : vector<2x48xf32>
    %119 = vector.extract_strided_slice %103 {offsets = [0, 48], sizes = [2, 16], strides = [1, 1]} : vector<2x64xf32> to vector<2x16xf32>
    %120 = math.tanh %119 : vector<2x16xf32>
    %121 = vector.extract_strided_slice %106 {offsets = [0, 48], sizes = [2, 16], strides = [1, 1]} : vector<2x64xf32> to vector<2x16xf32>
    %122 = math.tanh %121 : vector<2x16xf32>
    %123 = vector.extract_strided_slice %112 {offsets = [0, 16], sizes = [2, 16], strides = [1, 1]} : vector<2x48xf32> to vector<2x16xf32>
    %124 = arith.mulf %123, %83 : vector<2x16xf32>
    %125 = vector.extract_strided_slice %112 {offsets = [0, 0], sizes = [2, 16], strides = [1, 1]} : vector<2x48xf32> to vector<2x16xf32>
    %126 = arith.mulf %125, %120 : vector<2x16xf32>
    %127 = arith.addf %124, %126 : vector<2x16xf32>
    %128 = vector.extract_strided_slice %118 {offsets = [0, 16], sizes = [2, 16], strides = [1, 1]} : vector<2x48xf32> to vector<2x16xf32>
    %129 = arith.mulf %128, %88 : vector<2x16xf32>
    %130 = vector.extract_strided_slice %118 {offsets = [0, 0], sizes = [2, 16], strides = [1, 1]} : vector<2x48xf32> to vector<2x16xf32>
    %131 = arith.mulf %130, %122 : vector<2x16xf32>
    %132 = arith.addf %129, %131 : vector<2x16xf32>
    %133 = vector.extract_strided_slice %112 {offsets = [0, 32], sizes = [2, 16], strides = [1, 1]} : vector<2x48xf32> to vector<2x16xf32>
    %134 = math.tanh %127 : vector<2x16xf32>
    %135 = arith.mulf %133, %134 : vector<2x16xf32>
    %136 = vector.extract_strided_slice %118 {offsets = [0, 32], sizes = [2, 16], strides = [1, 1]} : vector<2x48xf32> to vector<2x16xf32>
    %137 = math.tanh %132 : vector<2x16xf32>
    %138 = arith.mulf %136, %137 : vector<2x16xf32>
    %c0_39 = arith.constant 0 : index
    %c0_40 = arith.constant 0 : index
    %139 = vector.load %arg15[%c0_39, %c0_40] : memref<2x32xf32, #tpu.memory_space<vmem>>, vector<2x16xf32>
    tpu.vector_store %arg15[%c0_39, %c0_40], %135 {strides = array<i32>} : memref<2x32xf32, #tpu.memory_space<vmem>>, vector<2x16xf32>,
    %c0_41 = arith.constant 0 : index
    %c16_42 = arith.constant 16 : index
    %140 = vector.load %arg15[%c0_41, %c16_42] : memref<2x32xf32, #tpu.memory_space<vmem>>, vector<2x16xf32>
    tpu.vector_store %arg15[%c0_41, %c16_42], %138 {strides = array<i32>} : memref<2x32xf32, #tpu.memory_space<vmem>>, vector<2x16xf32>,
    %c4 = arith.constant 4 : index
    %c0_43 = arith.constant 0 : index
    %141 = vector.load %arg16[%c4, %c0_43] : memref<16x16xf32, #tpu.memory_space<vmem>>, vector<2x16xf32>
    tpu.vector_store %arg16[%c4, %c0_43], %135 {strides = array<i32>} : memref<16x16xf32, #tpu.memory_space<vmem>>, vector<2x16xf32>,
    %c10 = arith.constant 10 : index
    %c0_44 = arith.constant 0 : index
    %142 = vector.load %arg17[%c10, %c0_44] : memref<16x16xf32, #tpu.memory_space<vmem>>, vector<2x16xf32>
    tpu.vector_store %arg17[%c10, %c0_44], %138 {strides = array<i32>} : memref<16x16xf32, #tpu.memory_space<vmem>>, vector<2x16xf32>,
    %c0_45 = arith.constant 0 : index
    %c0_46 = arith.constant 0 : index
    %143 = vector.load %arg15[%c0_45, %c0_46] : memref<2x32xf32, #tpu.memory_space<vmem>>, vector<2x32xf32>
    %cst_47 = arith.constant dense<0.000000e+00> : vector<2x128xf32>
    %144 = tpu.matmul %143, %6, %cst_47 {dimension_numbers = #tpu.dot_dimension_numbers<[1], [0], [0], [1], [0, 0, 1, 1], [], []>} : vector<2x32xf32>, vector<32x128xf32>, vector<2x128xf32> -> vector<2x128xf32>
    %145 = vector.extract_strided_slice %5 {offsets = [6, 0], sizes = [2, 64], strides = [1, 1]} : vector<16x128xf32> to vector<2x64xf32>
    %146 = vector.extract_strided_slice %144 {offsets = [0, 0], sizes = [2, 64], strides = [1, 1]} : vector<2x128xf32> to vector<2x64xf32>
    %147 = arith.addf %145, %146 : vector<2x64xf32>
    %148 = vector.extract_strided_slice %5 {offsets = [8, 64], sizes = [2, 64], strides = [1, 1]} : vector<16x128xf32> to vector<2x64xf32>
    %149 = vector.extract_strided_slice %144 {offsets = [0, 64], sizes = [2, 64], strides = [1, 1]} : vector<2x128xf32> to vector<2x64xf32>
    %150 = arith.addf %148, %149 : vector<2x64xf32>
    %151 = vector.extract_strided_slice %147 {offsets = [0, 0], sizes = [2, 48], strides = [1, 1]} : vector<2x64xf32> to vector<2x48xf32>
    %152 = arith.negf %151 : vector<2x48xf32>
    %153 = math.exp %152 : vector<2x48xf32>
    %cst_48 = arith.constant 1.000000e+00 : f32
    %154 = vector.broadcast %cst_48 : f32 to vector<2x48xf32>
    %155 = arith.addf %154, %153 : vector<2x48xf32>
    %156 = arith.divf %154, %155 : vector<2x48xf32>
    %157 = vector.extract_strided_slice %150 {offsets = [0, 0], sizes = [2, 48], strides = [1, 1]} : vector<2x64xf32> to vector<2x48xf32>
    %158 = arith.negf %157 : vector<2x48xf32>
    %159 = math.exp %158 : vector<2x48xf32>
    %cst_49 = arith.constant 1.000000e+00 : f32
    %160 = vector.broadcast %cst_49 : f32 to vector<2x48xf32>
    %161 = arith.addf %160, %159 : vector<2x48xf32>
    %162 = arith.divf %160, %161 : vector<2x48xf32>
    %163 = vector.extract_strided_slice %147 {offsets = [0, 48], sizes = [2, 16], strides = [1, 1]} : vector<2x64xf32> to vector<2x16xf32>
    %164 = math.tanh %163 : vector<2x16xf32>
    %165 = vector.extract_strided_slice %150 {offsets = [0, 48], sizes = [2, 16], strides = [1, 1]} : vector<2x64xf32> to vector<2x16xf32>
    %166 = math.tanh %165 : vector<2x16xf32>
    %167 = vector.extract_strided_slice %156 {offsets = [0, 16], sizes = [2, 16], strides = [1, 1]} : vector<2x48xf32> to vector<2x16xf32>
    %168 = arith.mulf %167, %127 : vector<2x16xf32>
    %169 = vector.extract_strided_slice %156 {offsets = [0, 0], sizes = [2, 16], strides = [1, 1]} : vector<2x48xf32> to vector<2x16xf32>
    %170 = arith.mulf %169, %164 : vector<2x16xf32>
    %171 = arith.addf %168, %170 : vector<2x16xf32>
    %172 = vector.extract_strided_slice %162 {offsets = [0, 16], sizes = [2, 16], strides = [1, 1]} : vector<2x48xf32> to vector<2x16xf32>
    %173 = arith.mulf %172, %132 : vector<2x16xf32>
    %174 = vector.extract_strided_slice %162 {offsets = [0, 0], sizes = [2, 16], strides = [1, 1]} : vector<2x48xf32> to vector<2x16xf32>
    %175 = arith.mulf %174, %166 : vector<2x16xf32>
    %176 = arith.addf %173, %175 : vector<2x16xf32>
    %177 = vector.extract_strided_slice %156 {offsets = [0, 32], sizes = [2, 16], strides = [1, 1]} : vector<2x48xf32> to vector<2x16xf32>
    %178 = math.tanh %171 : vector<2x16xf32>
    %179 = arith.mulf %177, %178 : vector<2x16xf32>
    %180 = vector.extract_strided_slice %162 {offsets = [0, 32], sizes = [2, 16], strides = [1, 1]} : vector<2x48xf32> to vector<2x16xf32>
    %181 = math.tanh %176 : vector<2x16xf32>
    %182 = arith.mulf %180, %181 : vector<2x16xf32>
    %c0_50 = arith.constant 0 : index
    %c0_51 = arith.constant 0 : index
    %183 = vector.load %arg15[%c0_50, %c0_51] : memref<2x32xf32, #tpu.memory_space<vmem>>, vector<2x16xf32>
    tpu.vector_store %arg15[%c0_50, %c0_51], %179 {strides = array<i32>} : memref<2x32xf32, #tpu.memory_space<vmem>>, vector<2x16xf32>,
    %c0_52 = arith.constant 0 : index
    %c16_53 = arith.constant 16 : index
    %184 = vector.load %arg15[%c0_52, %c16_53] : memref<2x32xf32, #tpu.memory_space<vmem>>, vector<2x16xf32>
    tpu.vector_store %arg15[%c0_52, %c16_53], %182 {strides = array<i32>} : memref<2x32xf32, #tpu.memory_space<vmem>>, vector<2x16xf32>,
    %c6 = arith.constant 6 : index
    %c0_54 = arith.constant 0 : index
    %185 = vector.load %arg16[%c6, %c0_54] : memref<16x16xf32, #tpu.memory_space<vmem>>, vector<2x16xf32>
    tpu.vector_store %arg16[%c6, %c0_54], %179 {strides = array<i32>} : memref<16x16xf32, #tpu.memory_space<vmem>>, vector<2x16xf32>,
    %c8 = arith.constant 8 : index
    %c0_55 = arith.constant 0 : index
    %186 = vector.load %arg17[%c8, %c0_55] : memref<16x16xf32, #tpu.memory_space<vmem>>, vector<2x16xf32>
    tpu.vector_store %arg17[%c8, %c0_55], %182 {strides = array<i32>} : memref<16x16xf32, #tpu.memory_space<vmem>>, vector<2x16xf32>,
    %c0_56 = arith.constant 0 : index
    %c0_57 = arith.constant 0 : index
    %187 = vector.load %arg15[%c0_56, %c0_57] : memref<2x32xf32, #tpu.memory_space<vmem>>, vector<2x32xf32>
    %cst_58 = arith.constant dense<0.000000e+00> : vector<2x128xf32>
    %188 = tpu.matmul %187, %6, %cst_58 {dimension_numbers = #tpu.dot_dimension_numbers<[1], [0], [0], [1], [0, 0, 1, 1], [], []>} : vector<2x32xf32>, vector<32x128xf32>, vector<2x128xf32> -> vector<2x128xf32>
    %189 = vector.extract_strided_slice %5 {offsets = [8, 0], sizes = [2, 64], strides = [1, 1]} : vector<16x128xf32> to vector<2x64xf32>
    %190 = vector.extract_strided_slice %188 {offsets = [0, 0], sizes = [2, 64], strides = [1, 1]} : vector<2x128xf32> to vector<2x64xf32>
    %191 = arith.addf %189, %190 : vector<2x64xf32>
    %192 = vector.extract_strided_slice %5 {offsets = [6, 64], sizes = [2, 64], strides = [1, 1]} : vector<16x128xf32> to vector<2x64xf32>
    %193 = vector.extract_strided_slice %188 {offsets = [0, 64], sizes = [2, 64], strides = [1, 1]} : vector<2x128xf32> to vector<2x64xf32>
    %194 = arith.addf %192, %193 : vector<2x64xf32>
    %195 = vector.extract_strided_slice %191 {offsets = [0, 0], sizes = [2, 48], strides = [1, 1]} : vector<2x64xf32> to vector<2x48xf32>
    %196 = arith.negf %195 : vector<2x48xf32>
    %197 = math.exp %196 : vector<2x48xf32>
    %cst_59 = arith.constant 1.000000e+00 : f32
    %198 = vector.broadcast %cst_59 : f32 to vector<2x48xf32>
    %199 = arith.addf %198, %197 : vector<2x48xf32>
    %200 = arith.divf %198, %199 : vector<2x48xf32>
    %201 = vector.extract_strided_slice %194 {offsets = [0, 0], sizes = [2, 48], strides = [1, 1]} : vector<2x64xf32> to vector<2x48xf32>
    %202 = arith.negf %201 : vector<2x48xf32>
    %203 = math.exp %202 : vector<2x48xf32>
    %cst_60 = arith.constant 1.000000e+00 : f32
    %204 = vector.broadcast %cst_60 : f32 to vector<2x48xf32>
    %205 = arith.addf %204, %203 : vector<2x48xf32>
    %206 = arith.divf %204, %205 : vector<2x48xf32>
    %207 = vector.extract_strided_slice %191 {offsets = [0, 48], sizes = [2, 16], strides = [1, 1]} : vector<2x64xf32> to vector<2x16xf32>
    %208 = math.tanh %207 : vector<2x16xf32>
    %209 = vector.extract_strided_slice %194 {offsets = [0, 48], sizes = [2, 16], strides = [1, 1]} : vector<2x64xf32> to vector<2x16xf32>
    %210 = math.tanh %209 : vector<2x16xf32>
    %211 = vector.extract_strided_slice %200 {offsets = [0, 16], sizes = [2, 16], strides = [1, 1]} : vector<2x48xf32> to vector<2x16xf32>
    %212 = arith.mulf %211, %171 : vector<2x16xf32>
    %213 = vector.extract_strided_slice %200 {offsets = [0, 0], sizes = [2, 16], strides = [1, 1]} : vector<2x48xf32> to vector<2x16xf32>
    %214 = arith.mulf %213, %208 : vector<2x16xf32>
    %215 = arith.addf %212, %214 : vector<2x16xf32>
    %216 = vector.extract_strided_slice %206 {offsets = [0, 16], sizes = [2, 16], strides = [1, 1]} : vector<2x48xf32> to vector<2x16xf32>
    %217 = arith.mulf %216, %176 : vector<2x16xf32>
    %218 = vector.extract_strided_slice %206 {offsets = [0, 0], sizes = [2, 16], strides = [1, 1]} : vector<2x48xf32> to vector<2x16xf32>
    %219 = arith.mulf %218, %210 : vector<2x16xf32>
    %220 = arith.addf %217, %219 : vector<2x16xf32>
    %221 = vector.extract_strided_slice %200 {offsets = [0, 32], sizes = [2, 16], strides = [1, 1]} : vector<2x48xf32> to vector<2x16xf32>
    %222 = math.tanh %215 : vector<2x16xf32>
    %223 = arith.mulf %221, %222 : vector<2x16xf32>
    %224 = vector.extract_strided_slice %206 {offsets = [0, 32], sizes = [2, 16], strides = [1, 1]} : vector<2x48xf32> to vector<2x16xf32>
    %225 = math.tanh %220 : vector<2x16xf32>
    %226 = arith.mulf %224, %225 : vector<2x16xf32>
    %c0_61 = arith.constant 0 : index
    %c0_62 = arith.constant 0 : index
    %227 = vector.load %arg15[%c0_61, %c0_62] : memref<2x32xf32, #tpu.memory_space<vmem>>, vector<2x16xf32>
    tpu.vector_store %arg15[%c0_61, %c0_62], %223 {strides = array<i32>} : memref<2x32xf32, #tpu.memory_space<vmem>>, vector<2x16xf32>,
    %c0_63 = arith.constant 0 : index
    %c16_64 = arith.constant 16 : index
    %228 = vector.load %arg15[%c0_63, %c16_64] : memref<2x32xf32, #tpu.memory_space<vmem>>, vector<2x16xf32>
    tpu.vector_store %arg15[%c0_63, %c16_64], %226 {strides = array<i32>} : memref<2x32xf32, #tpu.memory_space<vmem>>, vector<2x16xf32>,
    %c8_65 = arith.constant 8 : index
    %c0_66 = arith.constant 0 : index
    %229 = vector.load %arg16[%c8_65, %c0_66] : memref<16x16xf32, #tpu.memory_space<vmem>>, vector<2x16xf32>
    tpu.vector_store %arg16[%c8_65, %c0_66], %223 {strides = array<i32>} : memref<16x16xf32, #tpu.memory_space<vmem>>, vector<2x16xf32>,
    %c6_67 = arith.constant 6 : index
    %c0_68 = arith.constant 0 : index
    %230 = vector.load %arg17[%c6_67, %c0_68] : memref<16x16xf32, #tpu.memory_space<vmem>>, vector<2x16xf32>
    tpu.vector_store %arg17[%c6_67, %c0_68], %226 {strides = array<i32>} : memref<16x16xf32, #tpu.memory_space<vmem>>, vector<2x16xf32>,
    %c0_69 = arith.constant 0 : index
    %c0_70 = arith.constant 0 : index
    %231 = vector.load %arg15[%c0_69, %c0_70] : memref<2x32xf32, #tpu.memory_space<vmem>>, vector<2x32xf32>
    %cst_71 = arith.constant dense<0.000000e+00> : vector<2x128xf32>
    %232 = tpu.matmul %231, %6, %cst_71 {dimension_numbers = #tpu.dot_dimension_numbers<[1], [0], [0], [1], [0, 0, 1, 1], [], []>} : vector<2x32xf32>, vector<32x128xf32>, vector<2x128xf32> -> vector<2x128xf32>
    %233 = vector.extract_strided_slice %5 {offsets = [10, 0], sizes = [2, 64], strides = [1, 1]} : vector<16x128xf32> to vector<2x64xf32>
    %234 = vector.extract_strided_slice %232 {offsets = [0, 0], sizes = [2, 64], strides = [1, 1]} : vector<2x128xf32> to vector<2x64xf32>
    %235 = arith.addf %233, %234 : vector<2x64xf32>
    %236 = vector.extract_strided_slice %5 {offsets = [4, 64], sizes = [2, 64], strides = [1, 1]} : vector<16x128xf32> to vector<2x64xf32>
    %237 = vector.extract_strided_slice %232 {offsets = [0, 64], sizes = [2, 64], strides = [1, 1]} : vector<2x128xf32> to vector<2x64xf32>
    %238 = arith.addf %236, %237 : vector<2x64xf32>
    %239 = vector.extract_strided_slice %235 {offsets = [0, 0], sizes = [2, 48], strides = [1, 1]} : vector<2x64xf32> to vector<2x48xf32>
    %240 = arith.negf %239 : vector<2x48xf32>
    %241 = math.exp %240 : vector<2x48xf32>
    %cst_72 = arith.constant 1.000000e+00 : f32
    %242 = vector.broadcast %cst_72 : f32 to vector<2x48xf32>
    %243 = arith.addf %242, %241 : vector<2x48xf32>
    %244 = arith.divf %242, %243 : vector<2x48xf32>
    %245 = vector.extract_strided_slice %238 {offsets = [0, 0], sizes = [2, 48], strides = [1, 1]} : vector<2x64xf32> to vector<2x48xf32>
    %246 = arith.negf %245 : vector<2x48xf32>
    %247 = math.exp %246 : vector<2x48xf32>
    %cst_73 = arith.constant 1.000000e+00 : f32
    %248 = vector.broadcast %cst_73 : f32 to vector<2x48xf32>
    %249 = arith.addf %248, %247 : vector<2x48xf32>
    %250 = arith.divf %248, %249 : vector<2x48xf32>
    %251 = vector.extract_strided_slice %235 {offsets = [0, 48], sizes = [2, 16], strides = [1, 1]} : vector<2x64xf32> to vector<2x16xf32>
    %252 = math.tanh %251 : vector<2x16xf32>
    %253 = vector.extract_strided_slice %238 {offsets = [0, 48], sizes = [2, 16], strides = [1, 1]} : vector<2x64xf32> to vector<2x16xf32>
    %254 = math.tanh %253 : vector<2x16xf32>
    %255 = vector.extract_strided_slice %244 {offsets = [0, 16], sizes = [2, 16], strides = [1, 1]} : vector<2x48xf32> to vector<2x16xf32>
    %256 = arith.mulf %255, %215 : vector<2x16xf32>
    %257 = vector.extract_strided_slice %244 {offsets = [0, 0], sizes = [2, 16], strides = [1, 1]} : vector<2x48xf32> to vector<2x16xf32>
    %258 = arith.mulf %257, %252 : vector<2x16xf32>
    %259 = arith.addf %256, %258 : vector<2x16xf32>
    %260 = vector.extract_strided_slice %250 {offsets = [0, 16], sizes = [2, 16], strides = [1, 1]} : vector<2x48xf32> to vector<2x16xf32>
    %261 = arith.mulf %260, %220 : vector<2x16xf32>
    %262 = vector.extract_strided_slice %250 {offsets = [0, 0], sizes = [2, 16], strides = [1, 1]} : vector<2x48xf32> to vector<2x16xf32>
    %263 = arith.mulf %262, %254 : vector<2x16xf32>
    %264 = arith.addf %261, %263 : vector<2x16xf32>
    %265 = vector.extract_strided_slice %244 {offsets = [0, 32], sizes = [2, 16], strides = [1, 1]} : vector<2x48xf32> to vector<2x16xf32>
    %266 = math.tanh %259 : vector<2x16xf32>
    %267 = arith.mulf %265, %266 : vector<2x16xf32>
    %268 = vector.extract_strided_slice %250 {offsets = [0, 32], sizes = [2, 16], strides = [1, 1]} : vector<2x48xf32> to vector<2x16xf32>
    %269 = math.tanh %264 : vector<2x16xf32>
    %270 = arith.mulf %268, %269 : vector<2x16xf32>
    %c0_74 = arith.constant 0 : index
    %c0_75 = arith.constant 0 : index
    %271 = vector.load %arg15[%c0_74, %c0_75] : memref<2x32xf32, #tpu.memory_space<vmem>>, vector<2x16xf32>
    tpu.vector_store %arg15[%c0_74, %c0_75], %267 {strides = array<i32>} : memref<2x32xf32, #tpu.memory_space<vmem>>, vector<2x16xf32>,
    %c0_76 = arith.constant 0 : index
    %c16_77 = arith.constant 16 : index
    %272 = vector.load %arg15[%c0_76, %c16_77] : memref<2x32xf32, #tpu.memory_space<vmem>>, vector<2x16xf32>
    tpu.vector_store %arg15[%c0_76, %c16_77], %270 {strides = array<i32>} : memref<2x32xf32, #tpu.memory_space<vmem>>, vector<2x16xf32>,
    %c10_78 = arith.constant 10 : index
    %c0_79 = arith.constant 0 : index
    %273 = vector.load %arg16[%c10_78, %c0_79] : memref<16x16xf32, #tpu.memory_space<vmem>>, vector<2x16xf32>
    tpu.vector_store %arg16[%c10_78, %c0_79], %267 {strides = array<i32>} : memref<16x16xf32, #tpu.memory_space<vmem>>, vector<2x16xf32>,
    %c4_80 = arith.constant 4 : index
    %c0_81 = arith.constant 0 : index
    %274 = vector.load %arg17[%c4_80, %c0_81] : memref<16x16xf32, #tpu.memory_space<vmem>>, vector<2x16xf32>
    tpu.vector_store %arg17[%c4_80, %c0_81], %270 {strides = array<i32>} : memref<16x16xf32, #tpu.memory_space<vmem>>, vector<2x16xf32>,
    %c0_82 = arith.constant 0 : index
    %c0_83 = arith.constant 0 : index
    %275 = vector.load %arg15[%c0_82, %c0_83] : memref<2x32xf32, #tpu.memory_space<vmem>>, vector<2x32xf32>
    %cst_84 = arith.constant dense<0.000000e+00> : vector<2x128xf32>
    %276 = tpu.matmul %275, %6, %cst_84 {dimension_numbers = #tpu.dot_dimension_numbers<[1], [0], [0], [1], [0, 0, 1, 1], [], []>} : vector<2x32xf32>, vector<32x128xf32>, vector<2x128xf32> -> vector<2x128xf32>
    %277 = vector.extract_strided_slice %5 {offsets = [12, 0], sizes = [2, 64], strides = [1, 1]} : vector<16x128xf32> to vector<2x64xf32>
    %278 = vector.extract_strided_slice %276 {offsets = [0, 0], sizes = [2, 64], strides = [1, 1]} : vector<2x128xf32> to vector<2x64xf32>
    %279 = arith.addf %277, %278 : vector<2x64xf32>
    %280 = vector.extract_strided_slice %5 {offsets = [2, 64], sizes = [2, 64], strides = [1, 1]} : vector<16x128xf32> to vector<2x64xf32>
    %281 = vector.extract_strided_slice %276 {offsets = [0, 64], sizes = [2, 64], strides = [1, 1]} : vector<2x128xf32> to vector<2x64xf32>
    %282 = arith.addf %280, %281 : vector<2x64xf32>
    %283 = vector.extract_strided_slice %279 {offsets = [0, 0], sizes = [2, 48], strides = [1, 1]} : vector<2x64xf32> to vector<2x48xf32>
    %284 = arith.negf %283 : vector<2x48xf32>
    %285 = math.exp %284 : vector<2x48xf32>
    %cst_85 = arith.constant 1.000000e+00 : f32
    %286 = vector.broadcast %cst_85 : f32 to vector<2x48xf32>
    %287 = arith.addf %286, %285 : vector<2x48xf32>
    %288 = arith.divf %286, %287 : vector<2x48xf32>
    %289 = vector.extract_strided_slice %282 {offsets = [0, 0], sizes = [2, 48], strides = [1, 1]} : vector<2x64xf32> to vector<2x48xf32>
    %290 = arith.negf %289 : vector<2x48xf32>
    %291 = math.exp %290 : vector<2x48xf32>
    %cst_86 = arith.constant 1.000000e+00 : f32
    %292 = vector.broadcast %cst_86 : f32 to vector<2x48xf32>
    %293 = arith.addf %292, %291 : vector<2x48xf32>
    %294 = arith.divf %292, %293 : vector<2x48xf32>
    %295 = vector.extract_strided_slice %279 {offsets = [0, 48], sizes = [2, 16], strides = [1, 1]} : vector<2x64xf32> to vector<2x16xf32>
    %296 = math.tanh %295 : vector<2x16xf32>
    %297 = vector.extract_strided_slice %282 {offsets = [0, 48], sizes = [2, 16], strides = [1, 1]} : vector<2x64xf32> to vector<2x16xf32>
    %298 = math.tanh %297 : vector<2x16xf32>
    %299 = vector.extract_strided_slice %288 {offsets = [0, 16], sizes = [2, 16], strides = [1, 1]} : vector<2x48xf32> to vector<2x16xf32>
    %300 = arith.mulf %299, %259 : vector<2x16xf32>
    %301 = vector.extract_strided_slice %288 {offsets = [0, 0], sizes = [2, 16], strides = [1, 1]} : vector<2x48xf32> to vector<2x16xf32>
    %302 = arith.mulf %301, %296 : vector<2x16xf32>
    %303 = arith.addf %300, %302 : vector<2x16xf32>
    %304 = vector.extract_strided_slice %294 {offsets = [0, 16], sizes = [2, 16], strides = [1, 1]} : vector<2x48xf32> to vector<2x16xf32>
    %305 = arith.mulf %304, %264 : vector<2x16xf32>
    %306 = vector.extract_strided_slice %294 {offsets = [0, 0], sizes = [2, 16], strides = [1, 1]} : vector<2x48xf32> to vector<2x16xf32>
    %307 = arith.mulf %306, %298 : vector<2x16xf32>
    %308 = arith.addf %305, %307 : vector<2x16xf32>
    %309 = vector.extract_strided_slice %288 {offsets = [0, 32], sizes = [2, 16], strides = [1, 1]} : vector<2x48xf32> to vector<2x16xf32>
    %310 = math.tanh %303 : vector<2x16xf32>
    %311 = arith.mulf %309, %310 : vector<2x16xf32>
    %312 = vector.extract_strided_slice %294 {offsets = [0, 32], sizes = [2, 16], strides = [1, 1]} : vector<2x48xf32> to vector<2x16xf32>
    %313 = math.tanh %308 : vector<2x16xf32>
    %314 = arith.mulf %312, %313 : vector<2x16xf32>
    %c0_87 = arith.constant 0 : index
    %c0_88 = arith.constant 0 : index
    %315 = vector.load %arg15[%c0_87, %c0_88] : memref<2x32xf32, #tpu.memory_space<vmem>>, vector<2x16xf32>
    tpu.vector_store %arg15[%c0_87, %c0_88], %311 {strides = array<i32>} : memref<2x32xf32, #tpu.memory_space<vmem>>, vector<2x16xf32>,
    %c0_89 = arith.constant 0 : index
    %c16_90 = arith.constant 16 : index
    %316 = vector.load %arg15[%c0_89, %c16_90] : memref<2x32xf32, #tpu.memory_space<vmem>>, vector<2x16xf32>
    tpu.vector_store %arg15[%c0_89, %c16_90], %314 {strides = array<i32>} : memref<2x32xf32, #tpu.memory_space<vmem>>, vector<2x16xf32>,
    %c12_91 = arith.constant 12 : index
    %c0_92 = arith.constant 0 : index
    %317 = vector.load %arg16[%c12_91, %c0_92] : memref<16x16xf32, #tpu.memory_space<vmem>>, vector<2x16xf32>
    tpu.vector_store %arg16[%c12_91, %c0_92], %311 {strides = array<i32>} : memref<16x16xf32, #tpu.memory_space<vmem>>, vector<2x16xf32>,
    %c2_93 = arith.constant 2 : index
    %c0_94 = arith.constant 0 : index
    %318 = vector.load %arg17[%c2_93, %c0_94] : memref<16x16xf32, #tpu.memory_space<vmem>>, vector<2x16xf32>
    tpu.vector_store %arg17[%c2_93, %c0_94], %314 {strides = array<i32>} : memref<16x16xf32, #tpu.memory_space<vmem>>, vector<2x16xf32>,
    %c0_95 = arith.constant 0 : index
    %c0_96 = arith.constant 0 : index
    %319 = vector.load %arg15[%c0_95, %c0_96] : memref<2x32xf32, #tpu.memory_space<vmem>>, vector<2x32xf32>
    %cst_97 = arith.constant dense<0.000000e+00> : vector<2x128xf32>
    %320 = tpu.matmul %319, %6, %cst_97 {dimension_numbers = #tpu.dot_dimension_numbers<[1], [0], [0], [1], [0, 0, 1, 1], [], []>} : vector<2x32xf32>, vector<32x128xf32>, vector<2x128xf32> -> vector<2x128xf32>
    %321 = vector.extract_strided_slice %5 {offsets = [14, 0], sizes = [2, 64], strides = [1, 1]} : vector<16x128xf32> to vector<2x64xf32>
    %322 = vector.extract_strided_slice %320 {offsets = [0, 0], sizes = [2, 64], strides = [1, 1]} : vector<2x128xf32> to vector<2x64xf32>
    %323 = arith.addf %321, %322 : vector<2x64xf32>
    %324 = vector.extract_strided_slice %5 {offsets = [0, 64], sizes = [2, 64], strides = [1, 1]} : vector<16x128xf32> to vector<2x64xf32>
    %325 = vector.extract_strided_slice %320 {offsets = [0, 64], sizes = [2, 64], strides = [1, 1]} : vector<2x128xf32> to vector<2x64xf32>
    %326 = arith.addf %324, %325 : vector<2x64xf32>
    %327 = vector.extract_strided_slice %323 {offsets = [0, 0], sizes = [2, 48], strides = [1, 1]} : vector<2x64xf32> to vector<2x48xf32>
    %328 = arith.negf %327 : vector<2x48xf32>
    %329 = math.exp %328 : vector<2x48xf32>
    %cst_98 = arith.constant 1.000000e+00 : f32
    %330 = vector.broadcast %cst_98 : f32 to vector<2x48xf32>
    %331 = arith.addf %330, %329 : vector<2x48xf32>
    %332 = arith.divf %330, %331 : vector<2x48xf32>
    %333 = vector.extract_strided_slice %326 {offsets = [0, 0], sizes = [2, 48], strides = [1, 1]} : vector<2x64xf32> to vector<2x48xf32>
    %334 = arith.negf %333 : vector<2x48xf32>
    %335 = math.exp %334 : vector<2x48xf32>
    %cst_99 = arith.constant 1.000000e+00 : f32
    %336 = vector.broadcast %cst_99 : f32 to vector<2x48xf32>
    %337 = arith.addf %336, %335 : vector<2x48xf32>
    %338 = arith.divf %336, %337 : vector<2x48xf32>
    %339 = vector.extract_strided_slice %323 {offsets = [0, 48], sizes = [2, 16], strides = [1, 1]} : vector<2x64xf32> to vector<2x16xf32>
    %340 = math.tanh %339 : vector<2x16xf32>
    %341 = vector.extract_strided_slice %326 {offsets = [0, 48], sizes = [2, 16], strides = [1, 1]} : vector<2x64xf32> to vector<2x16xf32>
    %342 = math.tanh %341 : vector<2x16xf32>
    %343 = vector.extract_strided_slice %332 {offsets = [0, 16], sizes = [2, 16], strides = [1, 1]} : vector<2x48xf32> to vector<2x16xf32>
    %344 = arith.mulf %343, %303 : vector<2x16xf32>
    %345 = vector.extract_strided_slice %332 {offsets = [0, 0], sizes = [2, 16], strides = [1, 1]} : vector<2x48xf32> to vector<2x16xf32>
    %346 = arith.mulf %345, %340 : vector<2x16xf32>
    %347 = arith.addf %344, %346 : vector<2x16xf32>
    %348 = vector.extract_strided_slice %338 {offsets = [0, 16], sizes = [2, 16], strides = [1, 1]} : vector<2x48xf32> to vector<2x16xf32>
    %349 = arith.mulf %348, %308 : vector<2x16xf32>
    %350 = vector.extract_strided_slice %338 {offsets = [0, 0], sizes = [2, 16], strides = [1, 1]} : vector<2x48xf32> to vector<2x16xf32>
    %351 = arith.mulf %350, %342 : vector<2x16xf32>
    %352 = arith.addf %349, %351 : vector<2x16xf32>
    %353 = vector.extract_strided_slice %332 {offsets = [0, 32], sizes = [2, 16], strides = [1, 1]} : vector<2x48xf32> to vector<2x16xf32>
    %354 = math.tanh %347 : vector<2x16xf32>
    %355 = arith.mulf %353, %354 : vector<2x16xf32>
    %356 = vector.extract_strided_slice %338 {offsets = [0, 32], sizes = [2, 16], strides = [1, 1]} : vector<2x48xf32> to vector<2x16xf32>
    %357 = math.tanh %352 : vector<2x16xf32>
    %358 = arith.mulf %356, %357 : vector<2x16xf32>
    %c0_100 = arith.constant 0 : index
    %c0_101 = arith.constant 0 : index
    %359 = vector.load %arg15[%c0_100, %c0_101] : memref<2x32xf32, #tpu.memory_space<vmem>>, vector<2x16xf32>
    tpu.vector_store %arg15[%c0_100, %c0_101], %355 {strides = array<i32>} : memref<2x32xf32, #tpu.memory_space<vmem>>, vector<2x16xf32>,
    %c0_102 = arith.constant 0 : index
    %c16_103 = arith.constant 16 : index
    %360 = vector.load %arg15[%c0_102, %c16_103] : memref<2x32xf32, #tpu.memory_space<vmem>>, vector<2x16xf32>
    tpu.vector_store %arg15[%c0_102, %c16_103], %358 {strides = array<i32>} : memref<2x32xf32, #tpu.memory_space<vmem>>, vector<2x16xf32>,
    %c14_104 = arith.constant 14 : index
    %c0_105 = arith.constant 0 : index
    %361 = vector.load %arg16[%c14_104, %c0_105] : memref<16x16xf32, #tpu.memory_space<vmem>>, vector<2x16xf32>
    tpu.vector_store %arg16[%c14_104, %c0_105], %355 {strides = array<i32>} : memref<16x16xf32, #tpu.memory_space<vmem>>, vector<2x16xf32>,
    %c0_106 = arith.constant 0 : index
    %c0_107 = arith.constant 0 : index
    %362 = vector.load %arg17[%c0_106, %c0_107] : memref<16x16xf32, #tpu.memory_space<vmem>>, vector<2x16xf32>
    tpu.vector_store %arg17[%c0_106, %c0_107], %358 {strides = array<i32>} : memref<16x16xf32, #tpu.memory_space<vmem>>, vector<2x16xf32>,
    %c0_108 = arith.constant 0 : index
    %c0_109 = arith.constant 0 : index
    %363 = vector.load %arg16[%c0_108, %c0_109] : memref<16x16xf32, #tpu.memory_space<vmem>>, vector<16x16xf32>
    %c0_110 = arith.constant 0 : index
    %c0_111 = arith.constant 0 : index
    %364 = vector.load %arg17[%c0_110, %c0_111] : memref<16x16xf32, #tpu.memory_space<vmem>>, vector<16x16xf32>
    %c0_112 = arith.constant 0 : index
    %c0_113 = arith.constant 0 : index
    %365 = vector.load %arg6[%c0_112, %c0_113] : memref<32x128xf32, #tpu.memory_space<vmem>>, vector<32x128xf32>
    %366 = vector.extract_strided_slice %365 {offsets = [0, 0], sizes = [16, 128], strides = [1, 1]} : vector<32x128xf32> to vector<16x128xf32>
    %cst_114 = arith.constant dense<0.000000e+00> : vector<16x128xf32>
    %367 = tpu.matmul %363, %366, %cst_114 {dimension_numbers = #tpu.dot_dimension_numbers<[1], [0], [0], [1], [0, 0, 1, 1], [], []>} : vector<16x16xf32>, vector<16x128xf32>, vector<16x128xf32> -> vector<16x128xf32>
    %368 = vector.extract_strided_slice %365 {offsets = [16, 0], sizes = [16, 128], strides = [1, 1]} : vector<32x128xf32> to vector<16x128xf32>
    %cst_115 = arith.constant dense<0.000000e+00> : vector<16x128xf32>
    %369 = tpu.matmul %364, %368, %cst_115 {dimension_numbers = #tpu.dot_dimension_numbers<[1], [0], [0], [1], [0, 0, 1, 1], [], []>} : vector<16x16xf32>, vector<16x128xf32>, vector<16x128xf32> -> vector<16x128xf32>
    %370 = arith.addf %367, %369 : vector<16x128xf32>
    %c0_116 = arith.constant 0 : index
    %c0_117 = arith.constant 0 : index
    %371 = vector.load %arg8[%c0_116, %c0_117] : memref<1x128xf32, #tpu.memory_space<vmem>>, vector<1x128xf32>
    %372 = vector.broadcast %371 : vector<1x128xf32> to vector<16x128xf32>
    %373 = arith.addf %370, %372 : vector<16x128xf32>
    %c0_118 = arith.constant 0 : index
    %c0_119 = arith.constant 0 : index
    %374 = vector.load %arg7[%c0_118, %c0_119] : memref<32x128xf32, #tpu.memory_space<vmem>>, vector<32x128xf32>
    %cst_120 = arith.constant 0.000000e+00 : f32
    %375 = vector.broadcast %cst_120 : f32 to vector<2x32xf32>
    %c0_121 = arith.constant 0 : index
    %c0_122 = arith.constant 0 : index
    %376 = vector.load %arg15[%c0_121, %c0_122] : memref<2x32xf32, #tpu.memory_space<vmem>>, vector<2x32xf32>
    tpu.vector_store %arg15[%c0_121, %c0_122], %375 {strides = array<i32>} : memref<2x32xf32, #tpu.memory_space<vmem>>, vector<2x32xf32>,
    %cst_123 = arith.constant 0.000000e+00 : f32
    %377 = vector.broadcast %cst_123 : f32 to vector<2x16xf32>
    %cst_124 = arith.constant 0.000000e+00 : f32
    %378 = vector.broadcast %cst_124 : f32 to vector<2x16xf32>
    %c0_125 = arith.constant 0 : index
    %c0_126 = arith.constant 0 : index
    %379 = vector.load %arg15[%c0_125, %c0_126] : memref<2x32xf32, #tpu.memory_space<vmem>>, vector<2x32xf32>
    %cst_127 = arith.constant dense<0.000000e+00> : vector<2x128xf32>
    %380 = tpu.matmul %379, %374, %cst_127 {dimension_numbers = #tpu.dot_dimension_numbers<[1], [0], [0], [1], [0, 0, 1, 1], [], []>} : vector<2x32xf32>, vector<32x128xf32>, vector<2x128xf32> -> vector<2x128xf32>
    %381 = vector.extract_strided_slice %373 {offsets = [0, 0], sizes = [2, 64], strides = [1, 1]} : vector<16x128xf32> to vector<2x64xf32>
    %382 = vector.extract_strided_slice %380 {offsets = [0, 0], sizes = [2, 64], strides = [1, 1]} : vector<2x128xf32> to vector<2x64xf32>
    %383 = arith.addf %381, %382 : vector<2x64xf32>
    %384 = vector.extract_strided_slice %373 {offsets = [14, 64], sizes = [2, 64], strides = [1, 1]} : vector<16x128xf32> to vector<2x64xf32>
    %385 = vector.extract_strided_slice %380 {offsets = [0, 64], sizes = [2, 64], strides = [1, 1]} : vector<2x128xf32> to vector<2x64xf32>
    %386 = arith.addf %384, %385 : vector<2x64xf32>
    %387 = vector.extract_strided_slice %383 {offsets = [0, 0], sizes = [2, 48], strides = [1, 1]} : vector<2x64xf32> to vector<2x48xf32>
    %388 = arith.negf %387 : vector<2x48xf32>
    %389 = math.exp %388 : vector<2x48xf32>
    %cst_128 = arith.constant 1.000000e+00 : f32
    %390 = vector.broadcast %cst_128 : f32 to vector<2x48xf32>
    %391 = arith.addf %390, %389 : vector<2x48xf32>
    %392 = arith.divf %390, %391 : vector<2x48xf32>
    %393 = vector.extract_strided_slice %386 {offsets = [0, 0], sizes = [2, 48], strides = [1, 1]} : vector<2x64xf32> to vector<2x48xf32>
    %394 = arith.negf %393 : vector<2x48xf32>
    %395 = math.exp %394 : vector<2x48xf32>
    %cst_129 = arith.constant 1.000000e+00 : f32
    %396 = vector.broadcast %cst_129 : f32 to vector<2x48xf32>
    %397 = arith.addf %396, %395 : vector<2x48xf32>
    %398 = arith.divf %396, %397 : vector<2x48xf32>
    %399 = vector.extract_strided_slice %383 {offsets = [0, 48], sizes = [2, 16], strides = [1, 1]} : vector<2x64xf32> to vector<2x16xf32>
    %400 = math.tanh %399 : vector<2x16xf32>
    %401 = vector.extract_strided_slice %386 {offsets = [0, 48], sizes = [2, 16], strides = [1, 1]} : vector<2x64xf32> to vector<2x16xf32>
    %402 = math.tanh %401 : vector<2x16xf32>
    %403 = vector.extract_strided_slice %392 {offsets = [0, 16], sizes = [2, 16], strides = [1, 1]} : vector<2x48xf32> to vector<2x16xf32>
    %404 = arith.mulf %403, %377 : vector<2x16xf32>
    %405 = vector.extract_strided_slice %392 {offsets = [0, 0], sizes = [2, 16], strides = [1, 1]} : vector<2x48xf32> to vector<2x16xf32>
    %406 = arith.mulf %405, %400 : vector<2x16xf32>
    %407 = arith.addf %404, %406 : vector<2x16xf32>
    %408 = vector.extract_strided_slice %398 {offsets = [0, 16], sizes = [2, 16], strides = [1, 1]} : vector<2x48xf32> to vector<2x16xf32>
    %409 = arith.mulf %408, %378 : vector<2x16xf32>
    %410 = vector.extract_strided_slice %398 {offsets = [0, 0], sizes = [2, 16], strides = [1, 1]} : vector<2x48xf32> to vector<2x16xf32>
    %411 = arith.mulf %410, %402 : vector<2x16xf32>
    %412 = arith.addf %409, %411 : vector<2x16xf32>
    %413 = vector.extract_strided_slice %392 {offsets = [0, 32], sizes = [2, 16], strides = [1, 1]} : vector<2x48xf32> to vector<2x16xf32>
    %414 = math.tanh %407 : vector<2x16xf32>
    %415 = arith.mulf %413, %414 : vector<2x16xf32>
    %416 = vector.extract_strided_slice %398 {offsets = [0, 32], sizes = [2, 16], strides = [1, 1]} : vector<2x48xf32> to vector<2x16xf32>
    %417 = math.tanh %412 : vector<2x16xf32>
    %418 = arith.mulf %416, %417 : vector<2x16xf32>
    %c0_130 = arith.constant 0 : index
    %c0_131 = arith.constant 0 : index
    %419 = vector.load %arg15[%c0_130, %c0_131] : memref<2x32xf32, #tpu.memory_space<vmem>>, vector<2x16xf32>
    tpu.vector_store %arg15[%c0_130, %c0_131], %415 {strides = array<i32>} : memref<2x32xf32, #tpu.memory_space<vmem>>, vector<2x16xf32>,
    %c0_132 = arith.constant 0 : index
    %c16_133 = arith.constant 16 : index
    %420 = vector.load %arg15[%c0_132, %c16_133] : memref<2x32xf32, #tpu.memory_space<vmem>>, vector<2x16xf32>
    tpu.vector_store %arg15[%c0_132, %c16_133], %418 {strides = array<i32>} : memref<2x32xf32, #tpu.memory_space<vmem>>, vector<2x16xf32>,
    %c0_134 = arith.constant 0 : index
    %c0_135 = arith.constant 0 : index
    %421 = vector.load %arg16[%c0_134, %c0_135] : memref<16x16xf32, #tpu.memory_space<vmem>>, vector<2x16xf32>
    tpu.vector_store %arg16[%c0_134, %c0_135], %415 {strides = array<i32>} : memref<16x16xf32, #tpu.memory_space<vmem>>, vector<2x16xf32>,
    %c14_136 = arith.constant 14 : index
    %c0_137 = arith.constant 0 : index
    %422 = vector.load %arg17[%c14_136, %c0_137] : memref<16x16xf32, #tpu.memory_space<vmem>>, vector<2x16xf32>
    tpu.vector_store %arg17[%c14_136, %c0_137], %418 {strides = array<i32>} : memref<16x16xf32, #tpu.memory_space<vmem>>, vector<2x16xf32>,
    %c0_138 = arith.constant 0 : index
    %c0_139 = arith.constant 0 : index
    %423 = vector.load %arg15[%c0_138, %c0_139] : memref<2x32xf32, #tpu.memory_space<vmem>>, vector<2x32xf32>
    %cst_140 = arith.constant dense<0.000000e+00> : vector<2x128xf32>
    %424 = tpu.matmul %423, %374, %cst_140 {dimension_numbers = #tpu.dot_dimension_numbers<[1], [0], [0], [1], [0, 0, 1, 1], [], []>} : vector<2x32xf32>, vector<32x128xf32>, vector<2x128xf32> -> vector<2x128xf32>
    %425 = vector.extract_strided_slice %373 {offsets = [2, 0], sizes = [2, 64], strides = [1, 1]} : vector<16x128xf32> to vector<2x64xf32>
    %426 = vector.extract_strided_slice %424 {offsets = [0, 0], sizes = [2, 64], strides = [1, 1]} : vector<2x128xf32> to vector<2x64xf32>
    %427 = arith.addf %425, %426 : vector<2x64xf32>
    %428 = vector.extract_strided_slice %373 {offsets = [12, 64], sizes = [2, 64], strides = [1, 1]} : vector<16x128xf32> to vector<2x64xf32>
    %429 = vector.extract_strided_slice %424 {offsets = [0, 64], sizes = [2, 64], strides = [1, 1]} : vector<2x128xf32> to vector<2x64xf32>
    %430 = arith.addf %428, %429 : vector<2x64xf32>
    %431 = vector.extract_strided_slice %427 {offsets = [0, 0], sizes = [2, 48], strides = [1, 1]} : vector<2x64xf32> to vector<2x48xf32>
    %432 = arith.negf %431 : vector<2x48xf32>
    %433 = math.exp %432 : vector<2x48xf32>
    %cst_141 = arith.constant 1.000000e+00 : f32
    %434 = vector.broadcast %cst_141 : f32 to vector<2x48xf32>
    %435 = arith.addf %434, %433 : vector<2x48xf32>
    %436 = arith.divf %434, %435 : vector<2x48xf32>
    %437 = vector.extract_strided_slice %430 {offsets = [0, 0], sizes = [2, 48], strides = [1, 1]} : vector<2x64xf32> to vector<2x48xf32>
    %438 = arith.negf %437 : vector<2x48xf32>
    %439 = math.exp %438 : vector<2x48xf32>
    %cst_142 = arith.constant 1.000000e+00 : f32
    %440 = vector.broadcast %cst_142 : f32 to vector<2x48xf32>
    %441 = arith.addf %440, %439 : vector<2x48xf32>
    %442 = arith.divf %440, %441 : vector<2x48xf32>
    %443 = vector.extract_strided_slice %427 {offsets = [0, 48], sizes = [2, 16], strides = [1, 1]} : vector<2x64xf32> to vector<2x16xf32>
    %444 = math.tanh %443 : vector<2x16xf32>
    %445 = vector.extract_strided_slice %430 {offsets = [0, 48], sizes = [2, 16], strides = [1, 1]} : vector<2x64xf32> to vector<2x16xf32>
    %446 = math.tanh %445 : vector<2x16xf32>
    %447 = vector.extract_strided_slice %436 {offsets = [0, 16], sizes = [2, 16], strides = [1, 1]} : vector<2x48xf32> to vector<2x16xf32>
    %448 = arith.mulf %447, %407 : vector<2x16xf32>
    %449 = vector.extract_strided_slice %436 {offsets = [0, 0], sizes = [2, 16], strides = [1, 1]} : vector<2x48xf32> to vector<2x16xf32>
    %450 = arith.mulf %449, %444 : vector<2x16xf32>
    %451 = arith.addf %448, %450 : vector<2x16xf32>
    %452 = vector.extract_strided_slice %442 {offsets = [0, 16], sizes = [2, 16], strides = [1, 1]} : vector<2x48xf32> to vector<2x16xf32>
    %453 = arith.mulf %452, %412 : vector<2x16xf32>
    %454 = vector.extract_strided_slice %442 {offsets = [0, 0], sizes = [2, 16], strides = [1, 1]} : vector<2x48xf32> to vector<2x16xf32>
    %455 = arith.mulf %454, %446 : vector<2x16xf32>
    %456 = arith.addf %453, %455 : vector<2x16xf32>
    %457 = vector.extract_strided_slice %436 {offsets = [0, 32], sizes = [2, 16], strides = [1, 1]} : vector<2x48xf32> to vector<2x16xf32>
    %458 = math.tanh %451 : vector<2x16xf32>
    %459 = arith.mulf %457, %458 : vector<2x16xf32>
    %460 = vector.extract_strided_slice %442 {offsets = [0, 32], sizes = [2, 16], strides = [1, 1]} : vector<2x48xf32> to vector<2x16xf32>
    %461 = math.tanh %456 : vector<2x16xf32>
    %462 = arith.mulf %460, %461 : vector<2x16xf32>
    %c0_143 = arith.constant 0 : index
    %c0_144 = arith.constant 0 : index
    %463 = vector.load %arg15[%c0_143, %c0_144] : memref<2x32xf32, #tpu.memory_space<vmem>>, vector<2x16xf32>
    tpu.vector_store %arg15[%c0_143, %c0_144], %459 {strides = array<i32>} : memref<2x32xf32, #tpu.memory_space<vmem>>, vector<2x16xf32>,
    %c0_145 = arith.constant 0 : index
    %c16_146 = arith.constant 16 : index
    %464 = vector.load %arg15[%c0_145, %c16_146] : memref<2x32xf32, #tpu.memory_space<vmem>>, vector<2x16xf32>
    tpu.vector_store %arg15[%c0_145, %c16_146], %462 {strides = array<i32>} : memref<2x32xf32, #tpu.memory_space<vmem>>, vector<2x16xf32>,
    %c2_147 = arith.constant 2 : index
    %c0_148 = arith.constant 0 : index
    %465 = vector.load %arg16[%c2_147, %c0_148] : memref<16x16xf32, #tpu.memory_space<vmem>>, vector<2x16xf32>
    tpu.vector_store %arg16[%c2_147, %c0_148], %459 {strides = array<i32>} : memref<16x16xf32, #tpu.memory_space<vmem>>, vector<2x16xf32>,
    %c12_149 = arith.constant 12 : index
    %c0_150 = arith.constant 0 : index
    %466 = vector.load %arg17[%c12_149, %c0_150] : memref<16x16xf32, #tpu.memory_space<vmem>>, vector<2x16xf32>
    tpu.vector_store %arg17[%c12_149, %c0_150], %462 {strides = array<i32>} : memref<16x16xf32, #tpu.memory_space<vmem>>, vector<2x16xf32>,
    %c0_151 = arith.constant 0 : index
    %c0_152 = arith.constant 0 : index
    %467 = vector.load %arg15[%c0_151, %c0_152] : memref<2x32xf32, #tpu.memory_space<vmem>>, vector<2x32xf32>
    %cst_153 = arith.constant dense<0.000000e+00> : vector<2x128xf32>
    %468 = tpu.matmul %467, %374, %cst_153 {dimension_numbers = #tpu.dot_dimension_numbers<[1], [0], [0], [1], [0, 0, 1, 1], [], []>} : vector<2x32xf32>, vector<32x128xf32>, vector<2x128xf32> -> vector<2x128xf32>
    %469 = vector.extract_strided_slice %373 {offsets = [4, 0], sizes = [2, 64], strides = [1, 1]} : vector<16x128xf32> to vector<2x64xf32>
    %470 = vector.extract_strided_slice %468 {offsets = [0, 0], sizes = [2, 64], strides = [1, 1]} : vector<2x128xf32> to vector<2x64xf32>
    %471 = arith.addf %469, %470 : vector<2x64xf32>
    %472 = vector.extract_strided_slice %373 {offsets = [10, 64], sizes = [2, 64], strides = [1, 1]} : vector<16x128xf32> to vector<2x64xf32>
    %473 = vector.extract_strided_slice %468 {offsets = [0, 64], sizes = [2, 64], strides = [1, 1]} : vector<2x128xf32> to vector<2x64xf32>
    %474 = arith.addf %472, %473 : vector<2x64xf32>
    %475 = vector.extract_strided_slice %471 {offsets = [0, 0], sizes = [2, 48], strides = [1, 1]} : vector<2x64xf32> to vector<2x48xf32>
    %476 = arith.negf %475 : vector<2x48xf32>
    %477 = math.exp %476 : vector<2x48xf32>
    %cst_154 = arith.constant 1.000000e+00 : f32
    %478 = vector.broadcast %cst_154 : f32 to vector<2x48xf32>
    %479 = arith.addf %478, %477 : vector<2x48xf32>
    %480 = arith.divf %478, %479 : vector<2x48xf32>
    %481 = vector.extract_strided_slice %474 {offsets = [0, 0], sizes = [2, 48], strides = [1, 1]} : vector<2x64xf32> to vector<2x48xf32>
    %482 = arith.negf %481 : vector<2x48xf32>
    %483 = math.exp %482 : vector<2x48xf32>
    %cst_155 = arith.constant 1.000000e+00 : f32
    %484 = vector.broadcast %cst_155 : f32 to vector<2x48xf32>
    %485 = arith.addf %484, %483 : vector<2x48xf32>
    %486 = arith.divf %484, %485 : vector<2x48xf32>
    %487 = vector.extract_strided_slice %471 {offsets = [0, 48], sizes = [2, 16], strides = [1, 1]} : vector<2x64xf32> to vector<2x16xf32>
    %488 = math.tanh %487 : vector<2x16xf32>
    %489 = vector.extract_strided_slice %474 {offsets = [0, 48], sizes = [2, 16], strides = [1, 1]} : vector<2x64xf32> to vector<2x16xf32>
    %490 = math.tanh %489 : vector<2x16xf32>
    %491 = vector.extract_strided_slice %480 {offsets = [0, 16], sizes = [2, 16], strides = [1, 1]} : vector<2x48xf32> to vector<2x16xf32>
    %492 = arith.mulf %491, %451 : vector<2x16xf32>
    %493 = vector.extract_strided_slice %480 {offsets = [0, 0], sizes = [2, 16], strides = [1, 1]} : vector<2x48xf32> to vector<2x16xf32>
    %494 = arith.mulf %493, %488 : vector<2x16xf32>
    %495 = arith.addf %492, %494 : vector<2x16xf32>
    %496 = vector.extract_strided_slice %486 {offsets = [0, 16], sizes = [2, 16], strides = [1, 1]} : vector<2x48xf32> to vector<2x16xf32>
    %497 = arith.mulf %496, %456 : vector<2x16xf32>
    %498 = vector.extract_strided_slice %486 {offsets = [0, 0], sizes = [2, 16], strides = [1, 1]} : vector<2x48xf32> to vector<2x16xf32>
    %499 = arith.mulf %498, %490 : vector<2x16xf32>
    %500 = arith.addf %497, %499 : vector<2x16xf32>
    %501 = vector.extract_strided_slice %480 {offsets = [0, 32], sizes = [2, 16], strides = [1, 1]} : vector<2x48xf32> to vector<2x16xf32>
    %502 = math.tanh %495 : vector<2x16xf32>
    %503 = arith.mulf %501, %502 : vector<2x16xf32>
    %504 = vector.extract_strided_slice %486 {offsets = [0, 32], sizes = [2, 16], strides = [1, 1]} : vector<2x48xf32> to vector<2x16xf32>
    %505 = math.tanh %500 : vector<2x16xf32>
    %506 = arith.mulf %504, %505 : vector<2x16xf32>
    %c0_156 = arith.constant 0 : index
    %c0_157 = arith.constant 0 : index
    %507 = vector.load %arg15[%c0_156, %c0_157] : memref<2x32xf32, #tpu.memory_space<vmem>>, vector<2x16xf32>
    tpu.vector_store %arg15[%c0_156, %c0_157], %503 {strides = array<i32>} : memref<2x32xf32, #tpu.memory_space<vmem>>, vector<2x16xf32>,
    %c0_158 = arith.constant 0 : index
    %c16_159 = arith.constant 16 : index
    %508 = vector.load %arg15[%c0_158, %c16_159] : memref<2x32xf32, #tpu.memory_space<vmem>>, vector<2x16xf32>
    tpu.vector_store %arg15[%c0_158, %c16_159], %506 {strides = array<i32>} : memref<2x32xf32, #tpu.memory_space<vmem>>, vector<2x16xf32>,
    %c4_160 = arith.constant 4 : index
    %c0_161 = arith.constant 0 : index
    %509 = vector.load %arg16[%c4_160, %c0_161] : memref<16x16xf32, #tpu.memory_space<vmem>>, vector<2x16xf32>
    tpu.vector_store %arg16[%c4_160, %c0_161], %503 {strides = array<i32>} : memref<16x16xf32, #tpu.memory_space<vmem>>, vector<2x16xf32>,
    %c10_162 = arith.constant 10 : index
    %c0_163 = arith.constant 0 : index
    %510 = vector.load %arg17[%c10_162, %c0_163] : memref<16x16xf32, #tpu.memory_space<vmem>>, vector<2x16xf32>
    tpu.vector_store %arg17[%c10_162, %c0_163], %506 {strides = array<i32>} : memref<16x16xf32, #tpu.memory_space<vmem>>, vector<2x16xf32>,
    %c0_164 = arith.constant 0 : index
    %c0_165 = arith.constant 0 : index
    %511 = vector.load %arg15[%c0_164, %c0_165] : memref<2x32xf32, #tpu.memory_space<vmem>>, vector<2x32xf32>
    %cst_166 = arith.constant dense<0.000000e+00> : vector<2x128xf32>
    %512 = tpu.matmul %511, %374, %cst_166 {dimension_numbers = #tpu.dot_dimension_numbers<[1], [0], [0], [1], [0, 0, 1, 1], [], []>} : vector<2x32xf32>, vector<32x128xf32>, vector<2x128xf32> -> vector<2x128xf32>
    %513 = vector.extract_strided_slice %373 {offsets = [6, 0], sizes = [2, 64], strides = [1, 1]} : vector<16x128xf32> to vector<2x64xf32>
    %514 = vector.extract_strided_slice %512 {offsets = [0, 0], sizes = [2, 64], strides = [1, 1]} : vector<2x128xf32> to vector<2x64xf32>
    %515 = arith.addf %513, %514 : vector<2x64xf32>
    %516 = vector.extract_strided_slice %373 {offsets = [8, 64], sizes = [2, 64], strides = [1, 1]} : vector<16x128xf32> to vector<2x64xf32>
    %517 = vector.extract_strided_slice %512 {offsets = [0, 64], sizes = [2, 64], strides = [1, 1]} : vector<2x128xf32> to vector<2x64xf32>
    %518 = arith.addf %516, %517 : vector<2x64xf32>
    %519 = vector.extract_strided_slice %515 {offsets = [0, 0], sizes = [2, 48], strides = [1, 1]} : vector<2x64xf32> to vector<2x48xf32>
    %520 = arith.negf %519 : vector<2x48xf32>
    %521 = math.exp %520 : vector<2x48xf32>
    %cst_167 = arith.constant 1.000000e+00 : f32
    %522 = vector.broadcast %cst_167 : f32 to vector<2x48xf32>
    %523 = arith.addf %522, %521 : vector<2x48xf32>
    %524 = arith.divf %522, %523 : vector<2x48xf32>
    %525 = vector.extract_strided_slice %518 {offsets = [0, 0], sizes = [2, 48], strides = [1, 1]} : vector<2x64xf32> to vector<2x48xf32>
    %526 = arith.negf %525 : vector<2x48xf32>
    %527 = math.exp %526 : vector<2x48xf32>
    %cst_168 = arith.constant 1.000000e+00 : f32
    %528 = vector.broadcast %cst_168 : f32 to vector<2x48xf32>
    %529 = arith.addf %528, %527 : vector<2x48xf32>
    %530 = arith.divf %528, %529 : vector<2x48xf32>
    %531 = vector.extract_strided_slice %515 {offsets = [0, 48], sizes = [2, 16], strides = [1, 1]} : vector<2x64xf32> to vector<2x16xf32>
    %532 = math.tanh %531 : vector<2x16xf32>
    %533 = vector.extract_strided_slice %518 {offsets = [0, 48], sizes = [2, 16], strides = [1, 1]} : vector<2x64xf32> to vector<2x16xf32>
    %534 = math.tanh %533 : vector<2x16xf32>
    %535 = vector.extract_strided_slice %524 {offsets = [0, 16], sizes = [2, 16], strides = [1, 1]} : vector<2x48xf32> to vector<2x16xf32>
    %536 = arith.mulf %535, %495 : vector<2x16xf32>
    %537 = vector.extract_strided_slice %524 {offsets = [0, 0], sizes = [2, 16], strides = [1, 1]} : vector<2x48xf32> to vector<2x16xf32>
    %538 = arith.mulf %537, %532 : vector<2x16xf32>
    %539 = arith.addf %536, %538 : vector<2x16xf32>
    %540 = vector.extract_strided_slice %530 {offsets = [0, 16], sizes = [2, 16], strides = [1, 1]} : vector<2x48xf32> to vector<2x16xf32>
    %541 = arith.mulf %540, %500 : vector<2x16xf32>
    %542 = vector.extract_strided_slice %530 {offsets = [0, 0], sizes = [2, 16], strides = [1, 1]} : vector<2x48xf32> to vector<2x16xf32>
    %543 = arith.mulf %542, %534 : vector<2x16xf32>
    %544 = arith.addf %541, %543 : vector<2x16xf32>
    %545 = vector.extract_strided_slice %524 {offsets = [0, 32], sizes = [2, 16], strides = [1, 1]} : vector<2x48xf32> to vector<2x16xf32>
    %546 = math.tanh %539 : vector<2x16xf32>
    %547 = arith.mulf %545, %546 : vector<2x16xf32>
    %548 = vector.extract_strided_slice %530 {offsets = [0, 32], sizes = [2, 16], strides = [1, 1]} : vector<2x48xf32> to vector<2x16xf32>
    %549 = math.tanh %544 : vector<2x16xf32>
    %550 = arith.mulf %548, %549 : vector<2x16xf32>
    %c0_169 = arith.constant 0 : index
    %c0_170 = arith.constant 0 : index
    %551 = vector.load %arg15[%c0_169, %c0_170] : memref<2x32xf32, #tpu.memory_space<vmem>>, vector<2x16xf32>
    tpu.vector_store %arg15[%c0_169, %c0_170], %547 {strides = array<i32>} : memref<2x32xf32, #tpu.memory_space<vmem>>, vector<2x16xf32>,
    %c0_171 = arith.constant 0 : index
    %c16_172 = arith.constant 16 : index
    %552 = vector.load %arg15[%c0_171, %c16_172] : memref<2x32xf32, #tpu.memory_space<vmem>>, vector<2x16xf32>
    tpu.vector_store %arg15[%c0_171, %c16_172], %550 {strides = array<i32>} : memref<2x32xf32, #tpu.memory_space<vmem>>, vector<2x16xf32>,
    %c6_173 = arith.constant 6 : index
    %c0_174 = arith.constant 0 : index
    %553 = vector.load %arg16[%c6_173, %c0_174] : memref<16x16xf32, #tpu.memory_space<vmem>>, vector<2x16xf32>
    tpu.vector_store %arg16[%c6_173, %c0_174], %547 {strides = array<i32>} : memref<16x16xf32, #tpu.memory_space<vmem>>, vector<2x16xf32>,
    %c8_175 = arith.constant 8 : index
    %c0_176 = arith.constant 0 : index
    %554 = vector.load %arg17[%c8_175, %c0_176] : memref<16x16xf32, #tpu.memory_space<vmem>>, vector<2x16xf32>
    tpu.vector_store %arg17[%c8_175, %c0_176], %550 {strides = array<i32>} : memref<16x16xf32, #tpu.memory_space<vmem>>, vector<2x16xf32>,
    %c0_177 = arith.constant 0 : index
    %c0_178 = arith.constant 0 : index
    %555 = vector.load %arg15[%c0_177, %c0_178] : memref<2x32xf32, #tpu.memory_space<vmem>>, vector<2x32xf32>
    %cst_179 = arith.constant dense<0.000000e+00> : vector<2x128xf32>
    %556 = tpu.matmul %555, %374, %cst_179 {dimension_numbers = #tpu.dot_dimension_numbers<[1], [0], [0], [1], [0, 0, 1, 1], [], []>} : vector<2x32xf32>, vector<32x128xf32>, vector<2x128xf32> -> vector<2x128xf32>
    %557 = vector.extract_strided_slice %373 {offsets = [8, 0], sizes = [2, 64], strides = [1, 1]} : vector<16x128xf32> to vector<2x64xf32>
    %558 = vector.extract_strided_slice %556 {offsets = [0, 0], sizes = [2, 64], strides = [1, 1]} : vector<2x128xf32> to vector<2x64xf32>
    %559 = arith.addf %557, %558 : vector<2x64xf32>
    %560 = vector.extract_strided_slice %373 {offsets = [6, 64], sizes = [2, 64], strides = [1, 1]} : vector<16x128xf32> to vector<2x64xf32>
    %561 = vector.extract_strided_slice %556 {offsets = [0, 64], sizes = [2, 64], strides = [1, 1]} : vector<2x128xf32> to vector<2x64xf32>
    %562 = arith.addf %560, %561 : vector<2x64xf32>
    %563 = vector.extract_strided_slice %559 {offsets = [0, 0], sizes = [2, 48], strides = [1, 1]} : vector<2x64xf32> to vector<2x48xf32>
    %564 = arith.negf %563 : vector<2x48xf32>
    %565 = math.exp %564 : vector<2x48xf32>
    %cst_180 = arith.constant 1.000000e+00 : f32
    %566 = vector.broadcast %cst_180 : f32 to vector<2x48xf32>
    %567 = arith.addf %566, %565 : vector<2x48xf32>
    %568 = arith.divf %566, %567 : vector<2x48xf32>
    %569 = vector.extract_strided_slice %562 {offsets = [0, 0], sizes = [2, 48], strides = [1, 1]} : vector<2x64xf32> to vector<2x48xf32>
    %570 = arith.negf %569 : vector<2x48xf32>
    %571 = math.exp %570 : vector<2x48xf32>
    %cst_181 = arith.constant 1.000000e+00 : f32
    %572 = vector.broadcast %cst_181 : f32 to vector<2x48xf32>
    %573 = arith.addf %572, %571 : vector<2x48xf32>
    %574 = arith.divf %572, %573 : vector<2x48xf32>
    %575 = vector.extract_strided_slice %559 {offsets = [0, 48], sizes = [2, 16], strides = [1, 1]} : vector<2x64xf32> to vector<2x16xf32>
    %576 = math.tanh %575 : vector<2x16xf32>
    %577 = vector.extract_strided_slice %562 {offsets = [0, 48], sizes = [2, 16], strides = [1, 1]} : vector<2x64xf32> to vector<2x16xf32>
    %578 = math.tanh %577 : vector<2x16xf32>
    %579 = vector.extract_strided_slice %568 {offsets = [0, 16], sizes = [2, 16], strides = [1, 1]} : vector<2x48xf32> to vector<2x16xf32>
    %580 = arith.mulf %579, %539 : vector<2x16xf32>
    %581 = vector.extract_strided_slice %568 {offsets = [0, 0], sizes = [2, 16], strides = [1, 1]} : vector<2x48xf32> to vector<2x16xf32>
    %582 = arith.mulf %581, %576 : vector<2x16xf32>
    %583 = arith.addf %580, %582 : vector<2x16xf32>
    %584 = vector.extract_strided_slice %574 {offsets = [0, 16], sizes = [2, 16], strides = [1, 1]} : vector<2x48xf32> to vector<2x16xf32>
    %585 = arith.mulf %584, %544 : vector<2x16xf32>
    %586 = vector.extract_strided_slice %574 {offsets = [0, 0], sizes = [2, 16], strides = [1, 1]} : vector<2x48xf32> to vector<2x16xf32>
    %587 = arith.mulf %586, %578 : vector<2x16xf32>
    %588 = arith.addf %585, %587 : vector<2x16xf32>
    %589 = vector.extract_strided_slice %568 {offsets = [0, 32], sizes = [2, 16], strides = [1, 1]} : vector<2x48xf32> to vector<2x16xf32>
    %590 = math.tanh %583 : vector<2x16xf32>
    %591 = arith.mulf %589, %590 : vector<2x16xf32>
    %592 = vector.extract_strided_slice %574 {offsets = [0, 32], sizes = [2, 16], strides = [1, 1]} : vector<2x48xf32> to vector<2x16xf32>
    %593 = math.tanh %588 : vector<2x16xf32>
    %594 = arith.mulf %592, %593 : vector<2x16xf32>
    %c0_182 = arith.constant 0 : index
    %c0_183 = arith.constant 0 : index
    %595 = vector.load %arg15[%c0_182, %c0_183] : memref<2x32xf32, #tpu.memory_space<vmem>>, vector<2x16xf32>
    tpu.vector_store %arg15[%c0_182, %c0_183], %591 {strides = array<i32>} : memref<2x32xf32, #tpu.memory_space<vmem>>, vector<2x16xf32>,
    %c0_184 = arith.constant 0 : index
    %c16_185 = arith.constant 16 : index
    %596 = vector.load %arg15[%c0_184, %c16_185] : memref<2x32xf32, #tpu.memory_space<vmem>>, vector<2x16xf32>
    tpu.vector_store %arg15[%c0_184, %c16_185], %594 {strides = array<i32>} : memref<2x32xf32, #tpu.memory_space<vmem>>, vector<2x16xf32>,
    %c8_186 = arith.constant 8 : index
    %c0_187 = arith.constant 0 : index
    %597 = vector.load %arg16[%c8_186, %c0_187] : memref<16x16xf32, #tpu.memory_space<vmem>>, vector<2x16xf32>
    tpu.vector_store %arg16[%c8_186, %c0_187], %591 {strides = array<i32>} : memref<16x16xf32, #tpu.memory_space<vmem>>, vector<2x16xf32>,
    %c6_188 = arith.constant 6 : index
    %c0_189 = arith.constant 0 : index
    %598 = vector.load %arg17[%c6_188, %c0_189] : memref<16x16xf32, #tpu.memory_space<vmem>>, vector<2x16xf32>
    tpu.vector_store %arg17[%c6_188, %c0_189], %594 {strides = array<i32>} : memref<16x16xf32, #tpu.memory_space<vmem>>, vector<2x16xf32>,
    %c0_190 = arith.constant 0 : index
    %c0_191 = arith.constant 0 : index
    %599 = vector.load %arg15[%c0_190, %c0_191] : memref<2x32xf32, #tpu.memory_space<vmem>>, vector<2x32xf32>
    %cst_192 = arith.constant dense<0.000000e+00> : vector<2x128xf32>
    %600 = tpu.matmul %599, %374, %cst_192 {dimension_numbers = #tpu.dot_dimension_numbers<[1], [0], [0], [1], [0, 0, 1, 1], [], []>} : vector<2x32xf32>, vector<32x128xf32>, vector<2x128xf32> -> vector<2x128xf32>
    %601 = vector.extract_strided_slice %373 {offsets = [10, 0], sizes = [2, 64], strides = [1, 1]} : vector<16x128xf32> to vector<2x64xf32>
    %602 = vector.extract_strided_slice %600 {offsets = [0, 0], sizes = [2, 64], strides = [1, 1]} : vector<2x128xf32> to vector<2x64xf32>
    %603 = arith.addf %601, %602 : vector<2x64xf32>
    %604 = vector.extract_strided_slice %373 {offsets = [4, 64], sizes = [2, 64], strides = [1, 1]} : vector<16x128xf32> to vector<2x64xf32>
    %605 = vector.extract_strided_slice %600 {offsets = [0, 64], sizes = [2, 64], strides = [1, 1]} : vector<2x128xf32> to vector<2x64xf32>
    %606 = arith.addf %604, %605 : vector<2x64xf32>
    %607 = vector.extract_strided_slice %603 {offsets = [0, 0], sizes = [2, 48], strides = [1, 1]} : vector<2x64xf32> to vector<2x48xf32>
    %608 = arith.negf %607 : vector<2x48xf32>
    %609 = math.exp %608 : vector<2x48xf32>
    %cst_193 = arith.constant 1.000000e+00 : f32
    %610 = vector.broadcast %cst_193 : f32 to vector<2x48xf32>
    %611 = arith.addf %610, %609 : vector<2x48xf32>
    %612 = arith.divf %610, %611 : vector<2x48xf32>
    %613 = vector.extract_strided_slice %606 {offsets = [0, 0], sizes = [2, 48], strides = [1, 1]} : vector<2x64xf32> to vector<2x48xf32>
    %614 = arith.negf %613 : vector<2x48xf32>
    %615 = math.exp %614 : vector<2x48xf32>
    %cst_194 = arith.constant 1.000000e+00 : f32
    %616 = vector.broadcast %cst_194 : f32 to vector<2x48xf32>
    %617 = arith.addf %616, %615 : vector<2x48xf32>
    %618 = arith.divf %616, %617 : vector<2x48xf32>
    %619 = vector.extract_strided_slice %603 {offsets = [0, 48], sizes = [2, 16], strides = [1, 1]} : vector<2x64xf32> to vector<2x16xf32>
    %620 = math.tanh %619 : vector<2x16xf32>
    %621 = vector.extract_strided_slice %606 {offsets = [0, 48], sizes = [2, 16], strides = [1, 1]} : vector<2x64xf32> to vector<2x16xf32>
    %622 = math.tanh %621 : vector<2x16xf32>
    %623 = vector.extract_strided_slice %612 {offsets = [0, 16], sizes = [2, 16], strides = [1, 1]} : vector<2x48xf32> to vector<2x16xf32>
    %624 = arith.mulf %623, %583 : vector<2x16xf32>
    %625 = vector.extract_strided_slice %612 {offsets = [0, 0], sizes = [2, 16], strides = [1, 1]} : vector<2x48xf32> to vector<2x16xf32>
    %626 = arith.mulf %625, %620 : vector<2x16xf32>
    %627 = arith.addf %624, %626 : vector<2x16xf32>
    %628 = vector.extract_strided_slice %618 {offsets = [0, 16], sizes = [2, 16], strides = [1, 1]} : vector<2x48xf32> to vector<2x16xf32>
    %629 = arith.mulf %628, %588 : vector<2x16xf32>
    %630 = vector.extract_strided_slice %618 {offsets = [0, 0], sizes = [2, 16], strides = [1, 1]} : vector<2x48xf32> to vector<2x16xf32>
    %631 = arith.mulf %630, %622 : vector<2x16xf32>
    %632 = arith.addf %629, %631 : vector<2x16xf32>
    %633 = vector.extract_strided_slice %612 {offsets = [0, 32], sizes = [2, 16], strides = [1, 1]} : vector<2x48xf32> to vector<2x16xf32>
    %634 = math.tanh %627 : vector<2x16xf32>
    %635 = arith.mulf %633, %634 : vector<2x16xf32>
    %636 = vector.extract_strided_slice %618 {offsets = [0, 32], sizes = [2, 16], strides = [1, 1]} : vector<2x48xf32> to vector<2x16xf32>
    %637 = math.tanh %632 : vector<2x16xf32>
    %638 = arith.mulf %636, %637 : vector<2x16xf32>
    %c0_195 = arith.constant 0 : index
    %c0_196 = arith.constant 0 : index
    %639 = vector.load %arg15[%c0_195, %c0_196] : memref<2x32xf32, #tpu.memory_space<vmem>>, vector<2x16xf32>
    tpu.vector_store %arg15[%c0_195, %c0_196], %635 {strides = array<i32>} : memref<2x32xf32, #tpu.memory_space<vmem>>, vector<2x16xf32>,
    %c0_197 = arith.constant 0 : index
    %c16_198 = arith.constant 16 : index
    %640 = vector.load %arg15[%c0_197, %c16_198] : memref<2x32xf32, #tpu.memory_space<vmem>>, vector<2x16xf32>
    tpu.vector_store %arg15[%c0_197, %c16_198], %638 {strides = array<i32>} : memref<2x32xf32, #tpu.memory_space<vmem>>, vector<2x16xf32>,
    %c10_199 = arith.constant 10 : index
    %c0_200 = arith.constant 0 : index
    %641 = vector.load %arg16[%c10_199, %c0_200] : memref<16x16xf32, #tpu.memory_space<vmem>>, vector<2x16xf32>
    tpu.vector_store %arg16[%c10_199, %c0_200], %635 {strides = array<i32>} : memref<16x16xf32, #tpu.memory_space<vmem>>, vector<2x16xf32>,
    %c4_201 = arith.constant 4 : index
    %c0_202 = arith.constant 0 : index
    %642 = vector.load %arg17[%c4_201, %c0_202] : memref<16x16xf32, #tpu.memory_space<vmem>>, vector<2x16xf32>
    tpu.vector_store %arg17[%c4_201, %c0_202], %638 {strides = array<i32>} : memref<16x16xf32, #tpu.memory_space<vmem>>, vector<2x16xf32>,
    %c0_203 = arith.constant 0 : index
    %c0_204 = arith.constant 0 : index
    %643 = vector.load %arg15[%c0_203, %c0_204] : memref<2x32xf32, #tpu.memory_space<vmem>>, vector<2x32xf32>
    %cst_205 = arith.constant dense<0.000000e+00> : vector<2x128xf32>
    %644 = tpu.matmul %643, %374, %cst_205 {dimension_numbers = #tpu.dot_dimension_numbers<[1], [0], [0], [1], [0, 0, 1, 1], [], []>} : vector<2x32xf32>, vector<32x128xf32>, vector<2x128xf32> -> vector<2x128xf32>
    %645 = vector.extract_strided_slice %373 {offsets = [12, 0], sizes = [2, 64], strides = [1, 1]} : vector<16x128xf32> to vector<2x64xf32>
    %646 = vector.extract_strided_slice %644 {offsets = [0, 0], sizes = [2, 64], strides = [1, 1]} : vector<2x128xf32> to vector<2x64xf32>
    %647 = arith.addf %645, %646 : vector<2x64xf32>
    %648 = vector.extract_strided_slice %373 {offsets = [2, 64], sizes = [2, 64], strides = [1, 1]} : vector<16x128xf32> to vector<2x64xf32>
    %649 = vector.extract_strided_slice %644 {offsets = [0, 64], sizes = [2, 64], strides = [1, 1]} : vector<2x128xf32> to vector<2x64xf32>
    %650 = arith.addf %648, %649 : vector<2x64xf32>
    %651 = vector.extract_strided_slice %647 {offsets = [0, 0], sizes = [2, 48], strides = [1, 1]} : vector<2x64xf32> to vector<2x48xf32>
    %652 = arith.negf %651 : vector<2x48xf32>
    %653 = math.exp %652 : vector<2x48xf32>
    %cst_206 = arith.constant 1.000000e+00 : f32
    %654 = vector.broadcast %cst_206 : f32 to vector<2x48xf32>
    %655 = arith.addf %654, %653 : vector<2x48xf32>
    %656 = arith.divf %654, %655 : vector<2x48xf32>
    %657 = vector.extract_strided_slice %650 {offsets = [0, 0], sizes = [2, 48], strides = [1, 1]} : vector<2x64xf32> to vector<2x48xf32>
    %658 = arith.negf %657 : vector<2x48xf32>
    %659 = math.exp %658 : vector<2x48xf32>
    %cst_207 = arith.constant 1.000000e+00 : f32
    %660 = vector.broadcast %cst_207 : f32 to vector<2x48xf32>
    %661 = arith.addf %660, %659 : vector<2x48xf32>
    %662 = arith.divf %660, %661 : vector<2x48xf32>
    %663 = vector.extract_strided_slice %647 {offsets = [0, 48], sizes = [2, 16], strides = [1, 1]} : vector<2x64xf32> to vector<2x16xf32>
    %664 = math.tanh %663 : vector<2x16xf32>
    %665 = vector.extract_strided_slice %650 {offsets = [0, 48], sizes = [2, 16], strides = [1, 1]} : vector<2x64xf32> to vector<2x16xf32>
    %666 = math.tanh %665 : vector<2x16xf32>
    %667 = vector.extract_strided_slice %656 {offsets = [0, 16], sizes = [2, 16], strides = [1, 1]} : vector<2x48xf32> to vector<2x16xf32>
    %668 = arith.mulf %667, %627 : vector<2x16xf32>
    %669 = vector.extract_strided_slice %656 {offsets = [0, 0], sizes = [2, 16], strides = [1, 1]} : vector<2x48xf32> to vector<2x16xf32>
    %670 = arith.mulf %669, %664 : vector<2x16xf32>
    %671 = arith.addf %668, %670 : vector<2x16xf32>
    %672 = vector.extract_strided_slice %662 {offsets = [0, 16], sizes = [2, 16], strides = [1, 1]} : vector<2x48xf32> to vector<2x16xf32>
    %673 = arith.mulf %672, %632 : vector<2x16xf32>
    %674 = vector.extract_strided_slice %662 {offsets = [0, 0], sizes = [2, 16], strides = [1, 1]} : vector<2x48xf32> to vector<2x16xf32>
    %675 = arith.mulf %674, %666 : vector<2x16xf32>
    %676 = arith.addf %673, %675 : vector<2x16xf32>
    %677 = vector.extract_strided_slice %656 {offsets = [0, 32], sizes = [2, 16], strides = [1, 1]} : vector<2x48xf32> to vector<2x16xf32>
    %678 = math.tanh %671 : vector<2x16xf32>
    %679 = arith.mulf %677, %678 : vector<2x16xf32>
    %680 = vector.extract_strided_slice %662 {offsets = [0, 32], sizes = [2, 16], strides = [1, 1]} : vector<2x48xf32> to vector<2x16xf32>
    %681 = math.tanh %676 : vector<2x16xf32>
    %682 = arith.mulf %680, %681 : vector<2x16xf32>
    %c0_208 = arith.constant 0 : index
    %c0_209 = arith.constant 0 : index
    %683 = vector.load %arg15[%c0_208, %c0_209] : memref<2x32xf32, #tpu.memory_space<vmem>>, vector<2x16xf32>
    tpu.vector_store %arg15[%c0_208, %c0_209], %679 {strides = array<i32>} : memref<2x32xf32, #tpu.memory_space<vmem>>, vector<2x16xf32>,
    %c0_210 = arith.constant 0 : index
    %c16_211 = arith.constant 16 : index
    %684 = vector.load %arg15[%c0_210, %c16_211] : memref<2x32xf32, #tpu.memory_space<vmem>>, vector<2x16xf32>
    tpu.vector_store %arg15[%c0_210, %c16_211], %682 {strides = array<i32>} : memref<2x32xf32, #tpu.memory_space<vmem>>, vector<2x16xf32>,
    %c12_212 = arith.constant 12 : index
    %c0_213 = arith.constant 0 : index
    %685 = vector.load %arg16[%c12_212, %c0_213] : memref<16x16xf32, #tpu.memory_space<vmem>>, vector<2x16xf32>
    tpu.vector_store %arg16[%c12_212, %c0_213], %679 {strides = array<i32>} : memref<16x16xf32, #tpu.memory_space<vmem>>, vector<2x16xf32>,
    %c2_214 = arith.constant 2 : index
    %c0_215 = arith.constant 0 : index
    %686 = vector.load %arg17[%c2_214, %c0_215] : memref<16x16xf32, #tpu.memory_space<vmem>>, vector<2x16xf32>
    tpu.vector_store %arg17[%c2_214, %c0_215], %682 {strides = array<i32>} : memref<16x16xf32, #tpu.memory_space<vmem>>, vector<2x16xf32>,
    %c0_216 = arith.constant 0 : index
    %c0_217 = arith.constant 0 : index
    %687 = vector.load %arg15[%c0_216, %c0_217] : memref<2x32xf32, #tpu.memory_space<vmem>>, vector<2x32xf32>
    %cst_218 = arith.constant dense<0.000000e+00> : vector<2x128xf32>
    %688 = tpu.matmul %687, %374, %cst_218 {dimension_numbers = #tpu.dot_dimension_numbers<[1], [0], [0], [1], [0, 0, 1, 1], [], []>} : vector<2x32xf32>, vector<32x128xf32>, vector<2x128xf32> -> vector<2x128xf32>
    %689 = vector.extract_strided_slice %373 {offsets = [14, 0], sizes = [2, 64], strides = [1, 1]} : vector<16x128xf32> to vector<2x64xf32>
    %690 = vector.extract_strided_slice %688 {offsets = [0, 0], sizes = [2, 64], strides = [1, 1]} : vector<2x128xf32> to vector<2x64xf32>
    %691 = arith.addf %689, %690 : vector<2x64xf32>
    %692 = vector.extract_strided_slice %373 {offsets = [0, 64], sizes = [2, 64], strides = [1, 1]} : vector<16x128xf32> to vector<2x64xf32>
    %693 = vector.extract_strided_slice %688 {offsets = [0, 64], sizes = [2, 64], strides = [1, 1]} : vector<2x128xf32> to vector<2x64xf32>
    %694 = arith.addf %692, %693 : vector<2x64xf32>
    %695 = vector.extract_strided_slice %691 {offsets = [0, 0], sizes = [2, 48], strides = [1, 1]} : vector<2x64xf32> to vector<2x48xf32>
    %696 = arith.negf %695 : vector<2x48xf32>
    %697 = math.exp %696 : vector<2x48xf32>
    %cst_219 = arith.constant 1.000000e+00 : f32
    %698 = vector.broadcast %cst_219 : f32 to vector<2x48xf32>
    %699 = arith.addf %698, %697 : vector<2x48xf32>
    %700 = arith.divf %698, %699 : vector<2x48xf32>
    %701 = vector.extract_strided_slice %694 {offsets = [0, 0], sizes = [2, 48], strides = [1, 1]} : vector<2x64xf32> to vector<2x48xf32>
    %702 = arith.negf %701 : vector<2x48xf32>
    %703 = math.exp %702 : vector<2x48xf32>
    %cst_220 = arith.constant 1.000000e+00 : f32
    %704 = vector.broadcast %cst_220 : f32 to vector<2x48xf32>
    %705 = arith.addf %704, %703 : vector<2x48xf32>
    %706 = arith.divf %704, %705 : vector<2x48xf32>
    %707 = vector.extract_strided_slice %691 {offsets = [0, 48], sizes = [2, 16], strides = [1, 1]} : vector<2x64xf32> to vector<2x16xf32>
    %708 = math.tanh %707 : vector<2x16xf32>
    %709 = vector.extract_strided_slice %694 {offsets = [0, 48], sizes = [2, 16], strides = [1, 1]} : vector<2x64xf32> to vector<2x16xf32>
    %710 = math.tanh %709 : vector<2x16xf32>
    %711 = vector.extract_strided_slice %700 {offsets = [0, 16], sizes = [2, 16], strides = [1, 1]} : vector<2x48xf32> to vector<2x16xf32>
    %712 = arith.mulf %711, %671 : vector<2x16xf32>
    %713 = vector.extract_strided_slice %700 {offsets = [0, 0], sizes = [2, 16], strides = [1, 1]} : vector<2x48xf32> to vector<2x16xf32>
    %714 = arith.mulf %713, %708 : vector<2x16xf32>
    %715 = arith.addf %712, %714 : vector<2x16xf32>
    %716 = vector.extract_strided_slice %706 {offsets = [0, 16], sizes = [2, 16], strides = [1, 1]} : vector<2x48xf32> to vector<2x16xf32>
    %717 = arith.mulf %716, %676 : vector<2x16xf32>
    %718 = vector.extract_strided_slice %706 {offsets = [0, 0], sizes = [2, 16], strides = [1, 1]} : vector<2x48xf32> to vector<2x16xf32>
    %719 = arith.mulf %718, %710 : vector<2x16xf32>
    %720 = arith.addf %717, %719 : vector<2x16xf32>
    %721 = vector.extract_strided_slice %700 {offsets = [0, 32], sizes = [2, 16], strides = [1, 1]} : vector<2x48xf32> to vector<2x16xf32>
    %722 = math.tanh %715 : vector<2x16xf32>
    %723 = arith.mulf %721, %722 : vector<2x16xf32>
    %724 = vector.extract_strided_slice %706 {offsets = [0, 32], sizes = [2, 16], strides = [1, 1]} : vector<2x48xf32> to vector<2x16xf32>
    %725 = math.tanh %720 : vector<2x16xf32>
    %726 = arith.mulf %724, %725 : vector<2x16xf32>
    %c0_221 = arith.constant 0 : index
    %c0_222 = arith.constant 0 : index
    %727 = vector.load %arg15[%c0_221, %c0_222] : memref<2x32xf32, #tpu.memory_space<vmem>>, vector<2x16xf32>
    tpu.vector_store %arg15[%c0_221, %c0_222], %723 {strides = array<i32>} : memref<2x32xf32, #tpu.memory_space<vmem>>, vector<2x16xf32>,
    %c0_223 = arith.constant 0 : index
    %c16_224 = arith.constant 16 : index
    %728 = vector.load %arg15[%c0_223, %c16_224] : memref<2x32xf32, #tpu.memory_space<vmem>>, vector<2x16xf32>
    tpu.vector_store %arg15[%c0_223, %c16_224], %726 {strides = array<i32>} : memref<2x32xf32, #tpu.memory_space<vmem>>, vector<2x16xf32>,
    %c14_225 = arith.constant 14 : index
    %c0_226 = arith.constant 0 : index
    %729 = vector.load %arg16[%c14_225, %c0_226] : memref<16x16xf32, #tpu.memory_space<vmem>>, vector<2x16xf32>
    tpu.vector_store %arg16[%c14_225, %c0_226], %723 {strides = array<i32>} : memref<16x16xf32, #tpu.memory_space<vmem>>, vector<2x16xf32>,
    %c0_227 = arith.constant 0 : index
    %c0_228 = arith.constant 0 : index
    %730 = vector.load %arg17[%c0_227, %c0_228] : memref<16x16xf32, #tpu.memory_space<vmem>>, vector<2x16xf32>
    tpu.vector_store %arg17[%c0_227, %c0_228], %726 {strides = array<i32>} : memref<16x16xf32, #tpu.memory_space<vmem>>, vector<2x16xf32>,
    %c0_229 = arith.constant 0 : index
    %c0_230 = arith.constant 0 : index
    %731 = vector.load %arg16[%c0_229, %c0_230] : memref<16x16xf32, #tpu.memory_space<vmem>>, vector<16x16xf32>
    %c0_231 = arith.constant 0 : index
    %c0_232 = arith.constant 0 : index
    %732 = vector.load %arg17[%c0_231, %c0_232] : memref<16x16xf32, #tpu.memory_space<vmem>>, vector<16x16xf32>
    %c0_233 = arith.constant 0 : index
    %c0_234 = arith.constant 0 : index
    %733 = vector.load %arg9[%c0_233, %c0_234] : memref<32x8xf32, #tpu.memory_space<vmem>>, vector<32x8xf32>
    %734 = vector.extract_strided_slice %733 {offsets = [0, 0], sizes = [16, 8], strides = [1, 1]} : vector<32x8xf32> to vector<16x8xf32>
    %cst_235 = arith.constant dense<0.000000e+00> : vector<16x8xf32>
    %735 = tpu.matmul %731, %734, %cst_235 {dimension_numbers = #tpu.dot_dimension_numbers<[1], [0], [0], [1], [0, 0, 1, 1], [], []>} : vector<16x16xf32>, vector<16x8xf32>, vector<16x8xf32> -> vector<16x8xf32>
    %736 = vector.extract_strided_slice %733 {offsets = [16, 0], sizes = [16, 8], strides = [1, 1]} : vector<32x8xf32> to vector<16x8xf32>
    %cst_236 = arith.constant dense<0.000000e+00> : vector<16x8xf32>
    %737 = tpu.matmul %732, %736, %cst_236 {dimension_numbers = #tpu.dot_dimension_numbers<[1], [0], [0], [1], [0, 0, 1, 1], [], []>} : vector<16x16xf32>, vector<16x8xf32>, vector<16x8xf32> -> vector<16x8xf32>
    %738 = arith.addf %735, %737 : vector<16x8xf32>
    %c0_237 = arith.constant 0 : index
    %c0_238 = arith.constant 0 : index
    %739 = vector.load %arg10[%c0_237, %c0_238] : memref<1x8xf32, #tpu.memory_space<vmem>>, vector<1x8xf32>
    %740 = vector.broadcast %739 : vector<1x8xf32> to vector<16x8xf32>
    %741 = arith.addf %738, %740 : vector<16x8xf32>
    %c0_239 = arith.constant 0 : index
    %c0_240 = arith.constant 0 : index
    %742 = vector.load %arg11[%c0_239, %c0_240] : memref<8x8xf32, #tpu.memory_space<vmem>>, vector<8x8xf32>
    %743 = vector.shape_cast %742 : vector<8x8xf32> to vector<1x8x8xf32>
    %c0_241 = arith.constant 0 : index
    %c0_242 = arith.constant 0 : index
    %744 = vector.load %arg1[%c0_241, %c0_242] : memref<16x1xf32, #tpu.memory_space<vmem>>, vector<16x1xf32>
    %c0_243 = arith.constant 0 : index
    %c0_244 = arith.constant 0 : index
    %745 = vector.load %arg12[%c0_243, %c0_244] : memref<1x8xf32, #tpu.memory_space<vmem>>, vector<1x8xf32>
    %746 = vector.extract_strided_slice %741 {offsets = [0, 0], sizes = [2, 8], strides = [1, 1]} : vector<16x8xf32> to vector<2x8xf32>
    %747 = vector.broadcast %745 : vector<1x8xf32> to vector<2x8xf32>
    %748 = arith.addf %747, %746 : vector<2x8xf32>
    %749 = vector.extract_strided_slice %741 {offsets = [2, 0], sizes = [2, 8], strides = [1, 1]} : vector<16x8xf32> to vector<2x8xf32>
    %750 = vector.extract_strided_slice %744 {offsets = [2, 0], sizes = [2, 1], strides = [1, 1]} : vector<16x1xf32> to vector<2x1xf32>
    %751 = vector.shape_cast %748 : vector<2x8xf32> to vector<2x1x8xf32>
    %752 = vector.broadcast %751 : vector<2x1x8xf32> to vector<2x8x8xf32>
    %753 = vector.broadcast %743 : vector<1x8x8xf32> to vector<2x8x8xf32>
    %754 = arith.addf %752, %753 : vector<2x8x8xf32>
    %755 = vector.shape_cast %749 : vector<2x8xf32> to vector<2x8x1xf32>
    %756 = vector.broadcast %755 : vector<2x8x1xf32> to vector<2x8x8xf32>
    %757 = arith.addf %754, %756 : vector<2x8x8xf32>
    %cst_245 = arith.constant dense<0xFF800000> : vector<2x8xf32>
    %758 = vector.multi_reduction <maximumf>, %757, %cst_245 [2] : vector<2x8x8xf32> to vector<2x8xf32>
    %759 = tpu.iota {dimensions = array<i32: 2>} : vector<2x8x8xi32>
    %760 = vector.shape_cast %758 : vector<2x8xf32> to vector<2x8x1xf32>
    %761 = vector.broadcast %760 : vector<2x8x1xf32> to vector<2x8x8xf32>
    %762 = arith.cmpf oeq, %757, %761 : vector<2x8x8xf32>
    %c8_i32 = arith.constant 8 : i32
    %763 = vector.broadcast %c8_i32 : i32 to vector<2x8x8xi32>
    %764 = arith.select %762, %759, %763 : vector<2x8x8xi1>, vector<2x8x8xi32>
    %cst_246 = arith.constant dense<2147483647> : vector<2x8xi32>
    %765 = vector.multi_reduction <minsi>, %764, %cst_246 [2] : vector<2x8x8xi32> to vector<2x8xi32>
    %cst_247 = arith.constant 0.000000e+00 : f32
    %766 = vector.broadcast %cst_247 : f32 to vector<2x1xf32>
    %767 = arith.cmpf ogt, %750, %766 : vector<2x1xf32>
    %768 = vector.shape_cast %767 : vector<2x1xi1> to vector<2x1xi1>
    %769 = vector.broadcast %768 : vector<2x1xi1> to vector<2x8xi1>
    %770 = arith.select %769, %758, %748 : vector<2x8xi1>, vector<2x8xf32>
    %771 = vector.extract_strided_slice %741 {offsets = [4, 0], sizes = [2, 8], strides = [1, 1]} : vector<16x8xf32> to vector<2x8xf32>
    %772 = vector.extract_strided_slice %744 {offsets = [4, 0], sizes = [2, 1], strides = [1, 1]} : vector<16x1xf32> to vector<2x1xf32>
    %773 = vector.shape_cast %770 : vector<2x8xf32> to vector<2x1x8xf32>
    %774 = vector.broadcast %773 : vector<2x1x8xf32> to vector<2x8x8xf32>
    %775 = vector.broadcast %743 : vector<1x8x8xf32> to vector<2x8x8xf32>
    %776 = arith.addf %774, %775 : vector<2x8x8xf32>
    %777 = vector.shape_cast %771 : vector<2x8xf32> to vector<2x8x1xf32>
    %778 = vector.broadcast %777 : vector<2x8x1xf32> to vector<2x8x8xf32>
    %779 = arith.addf %776, %778 : vector<2x8x8xf32>
    %cst_248 = arith.constant dense<0xFF800000> : vector<2x8xf32>
    %780 = vector.multi_reduction <maximumf>, %779, %cst_248 [2] : vector<2x8x8xf32> to vector<2x8xf32>
    %781 = tpu.iota {dimensions = array<i32: 2>} : vector<2x8x8xi32>
    %782 = vector.shape_cast %780 : vector<2x8xf32> to vector<2x8x1xf32>
    %783 = vector.broadcast %782 : vector<2x8x1xf32> to vector<2x8x8xf32>
    %784 = arith.cmpf oeq, %779, %783 : vector<2x8x8xf32>
    %c8_i32_249 = arith.constant 8 : i32
    %785 = vector.broadcast %c8_i32_249 : i32 to vector<2x8x8xi32>
    %786 = arith.select %784, %781, %785 : vector<2x8x8xi1>, vector<2x8x8xi32>
    %cst_250 = arith.constant dense<2147483647> : vector<2x8xi32>
    %787 = vector.multi_reduction <minsi>, %786, %cst_250 [2] : vector<2x8x8xi32> to vector<2x8xi32>
    %cst_251 = arith.constant 0.000000e+00 : f32
    %788 = vector.broadcast %cst_251 : f32 to vector<2x1xf32>
    %789 = arith.cmpf ogt, %772, %788 : vector<2x1xf32>
    %790 = vector.shape_cast %789 : vector<2x1xi1> to vector<2x1xi1>
    %791 = vector.broadcast %790 : vector<2x1xi1> to vector<2x8xi1>
    %792 = arith.select %791, %780, %770 : vector<2x8xi1>, vector<2x8xf32>
    %793 = vector.extract_strided_slice %741 {offsets = [6, 0], sizes = [2, 8], strides = [1, 1]} : vector<16x8xf32> to vector<2x8xf32>
    %794 = vector.extract_strided_slice %744 {offsets = [6, 0], sizes = [2, 1], strides = [1, 1]} : vector<16x1xf32> to vector<2x1xf32>
    %795 = vector.shape_cast %792 : vector<2x8xf32> to vector<2x1x8xf32>
    %796 = vector.broadcast %795 : vector<2x1x8xf32> to vector<2x8x8xf32>
    %797 = vector.broadcast %743 : vector<1x8x8xf32> to vector<2x8x8xf32>
    %798 = arith.addf %796, %797 : vector<2x8x8xf32>
    %799 = vector.shape_cast %793 : vector<2x8xf32> to vector<2x8x1xf32>
    %800 = vector.broadcast %799 : vector<2x8x1xf32> to vector<2x8x8xf32>
    %801 = arith.addf %798, %800 : vector<2x8x8xf32>
    %cst_252 = arith.constant dense<0xFF800000> : vector<2x8xf32>
    %802 = vector.multi_reduction <maximumf>, %801, %cst_252 [2] : vector<2x8x8xf32> to vector<2x8xf32>
    %803 = tpu.iota {dimensions = array<i32: 2>} : vector<2x8x8xi32>
    %804 = vector.shape_cast %802 : vector<2x8xf32> to vector<2x8x1xf32>
    %805 = vector.broadcast %804 : vector<2x8x1xf32> to vector<2x8x8xf32>
    %806 = arith.cmpf oeq, %801, %805 : vector<2x8x8xf32>
    %c8_i32_253 = arith.constant 8 : i32
    %807 = vector.broadcast %c8_i32_253 : i32 to vector<2x8x8xi32>
    %808 = arith.select %806, %803, %807 : vector<2x8x8xi1>, vector<2x8x8xi32>
    %cst_254 = arith.constant dense<2147483647> : vector<2x8xi32>
    %809 = vector.multi_reduction <minsi>, %808, %cst_254 [2] : vector<2x8x8xi32> to vector<2x8xi32>
    %cst_255 = arith.constant 0.000000e+00 : f32
    %810 = vector.broadcast %cst_255 : f32 to vector<2x1xf32>
    %811 = arith.cmpf ogt, %794, %810 : vector<2x1xf32>
    %812 = vector.shape_cast %811 : vector<2x1xi1> to vector<2x1xi1>
    %813 = vector.broadcast %812 : vector<2x1xi1> to vector<2x8xi1>
    %814 = arith.select %813, %802, %792 : vector<2x8xi1>, vector<2x8xf32>
    %815 = vector.extract_strided_slice %741 {offsets = [8, 0], sizes = [2, 8], strides = [1, 1]} : vector<16x8xf32> to vector<2x8xf32>
    %816 = vector.extract_strided_slice %744 {offsets = [8, 0], sizes = [2, 1], strides = [1, 1]} : vector<16x1xf32> to vector<2x1xf32>
    %817 = vector.shape_cast %814 : vector<2x8xf32> to vector<2x1x8xf32>
    %818 = vector.broadcast %817 : vector<2x1x8xf32> to vector<2x8x8xf32>
    %819 = vector.broadcast %743 : vector<1x8x8xf32> to vector<2x8x8xf32>
    %820 = arith.addf %818, %819 : vector<2x8x8xf32>
    %821 = vector.shape_cast %815 : vector<2x8xf32> to vector<2x8x1xf32>
    %822 = vector.broadcast %821 : vector<2x8x1xf32> to vector<2x8x8xf32>
    %823 = arith.addf %820, %822 : vector<2x8x8xf32>
    %cst_256 = arith.constant dense<0xFF800000> : vector<2x8xf32>
    %824 = vector.multi_reduction <maximumf>, %823, %cst_256 [2] : vector<2x8x8xf32> to vector<2x8xf32>
    %825 = tpu.iota {dimensions = array<i32: 2>} : vector<2x8x8xi32>
    %826 = vector.shape_cast %824 : vector<2x8xf32> to vector<2x8x1xf32>
    %827 = vector.broadcast %826 : vector<2x8x1xf32> to vector<2x8x8xf32>
    %828 = arith.cmpf oeq, %823, %827 : vector<2x8x8xf32>
    %c8_i32_257 = arith.constant 8 : i32
    %829 = vector.broadcast %c8_i32_257 : i32 to vector<2x8x8xi32>
    %830 = arith.select %828, %825, %829 : vector<2x8x8xi1>, vector<2x8x8xi32>
    %cst_258 = arith.constant dense<2147483647> : vector<2x8xi32>
    %831 = vector.multi_reduction <minsi>, %830, %cst_258 [2] : vector<2x8x8xi32> to vector<2x8xi32>
    %cst_259 = arith.constant 0.000000e+00 : f32
    %832 = vector.broadcast %cst_259 : f32 to vector<2x1xf32>
    %833 = arith.cmpf ogt, %816, %832 : vector<2x1xf32>
    %834 = vector.shape_cast %833 : vector<2x1xi1> to vector<2x1xi1>
    %835 = vector.broadcast %834 : vector<2x1xi1> to vector<2x8xi1>
    %836 = arith.select %835, %824, %814 : vector<2x8xi1>, vector<2x8xf32>
    %837 = vector.extract_strided_slice %741 {offsets = [10, 0], sizes = [2, 8], strides = [1, 1]} : vector<16x8xf32> to vector<2x8xf32>
    %838 = vector.extract_strided_slice %744 {offsets = [10, 0], sizes = [2, 1], strides = [1, 1]} : vector<16x1xf32> to vector<2x1xf32>
    %839 = vector.shape_cast %836 : vector<2x8xf32> to vector<2x1x8xf32>
    %840 = vector.broadcast %839 : vector<2x1x8xf32> to vector<2x8x8xf32>
    %841 = vector.broadcast %743 : vector<1x8x8xf32> to vector<2x8x8xf32>
    %842 = arith.addf %840, %841 : vector<2x8x8xf32>
    %843 = vector.shape_cast %837 : vector<2x8xf32> to vector<2x8x1xf32>
    %844 = vector.broadcast %843 : vector<2x8x1xf32> to vector<2x8x8xf32>
    %845 = arith.addf %842, %844 : vector<2x8x8xf32>
    %cst_260 = arith.constant dense<0xFF800000> : vector<2x8xf32>
    %846 = vector.multi_reduction <maximumf>, %845, %cst_260 [2] : vector<2x8x8xf32> to vector<2x8xf32>
    %847 = tpu.iota {dimensions = array<i32: 2>} : vector<2x8x8xi32>
    %848 = vector.shape_cast %846 : vector<2x8xf32> to vector<2x8x1xf32>
    %849 = vector.broadcast %848 : vector<2x8x1xf32> to vector<2x8x8xf32>
    %850 = arith.cmpf oeq, %845, %849 : vector<2x8x8xf32>
    %c8_i32_261 = arith.constant 8 : i32
    %851 = vector.broadcast %c8_i32_261 : i32 to vector<2x8x8xi32>
    %852 = arith.select %850, %847, %851 : vector<2x8x8xi1>, vector<2x8x8xi32>
    %cst_262 = arith.constant dense<2147483647> : vector<2x8xi32>
    %853 = vector.multi_reduction <minsi>, %852, %cst_262 [2] : vector<2x8x8xi32> to vector<2x8xi32>
    %cst_263 = arith.constant 0.000000e+00 : f32
    %854 = vector.broadcast %cst_263 : f32 to vector<2x1xf32>
    %855 = arith.cmpf ogt, %838, %854 : vector<2x1xf32>
    %856 = vector.shape_cast %855 : vector<2x1xi1> to vector<2x1xi1>
    %857 = vector.broadcast %856 : vector<2x1xi1> to vector<2x8xi1>
    %858 = arith.select %857, %846, %836 : vector<2x8xi1>, vector<2x8xf32>
    %859 = vector.extract_strided_slice %741 {offsets = [12, 0], sizes = [2, 8], strides = [1, 1]} : vector<16x8xf32> to vector<2x8xf32>
    %860 = vector.extract_strided_slice %744 {offsets = [12, 0], sizes = [2, 1], strides = [1, 1]} : vector<16x1xf32> to vector<2x1xf32>
    %861 = vector.shape_cast %858 : vector<2x8xf32> to vector<2x1x8xf32>
    %862 = vector.broadcast %861 : vector<2x1x8xf32> to vector<2x8x8xf32>
    %863 = vector.broadcast %743 : vector<1x8x8xf32> to vector<2x8x8xf32>
    %864 = arith.addf %862, %863 : vector<2x8x8xf32>
    %865 = vector.shape_cast %859 : vector<2x8xf32> to vector<2x8x1xf32>
    %866 = vector.broadcast %865 : vector<2x8x1xf32> to vector<2x8x8xf32>
    %867 = arith.addf %864, %866 : vector<2x8x8xf32>
    %cst_264 = arith.constant dense<0xFF800000> : vector<2x8xf32>
    %868 = vector.multi_reduction <maximumf>, %867, %cst_264 [2] : vector<2x8x8xf32> to vector<2x8xf32>
    %869 = tpu.iota {dimensions = array<i32: 2>} : vector<2x8x8xi32>
    %870 = vector.shape_cast %868 : vector<2x8xf32> to vector<2x8x1xf32>
    %871 = vector.broadcast %870 : vector<2x8x1xf32> to vector<2x8x8xf32>
    %872 = arith.cmpf oeq, %867, %871 : vector<2x8x8xf32>
    %c8_i32_265 = arith.constant 8 : i32
    %873 = vector.broadcast %c8_i32_265 : i32 to vector<2x8x8xi32>
    %874 = arith.select %872, %869, %873 : vector<2x8x8xi1>, vector<2x8x8xi32>
    %cst_266 = arith.constant dense<2147483647> : vector<2x8xi32>
    %875 = vector.multi_reduction <minsi>, %874, %cst_266 [2] : vector<2x8x8xi32> to vector<2x8xi32>
    %cst_267 = arith.constant 0.000000e+00 : f32
    %876 = vector.broadcast %cst_267 : f32 to vector<2x1xf32>
    %877 = arith.cmpf ogt, %860, %876 : vector<2x1xf32>
    %878 = vector.shape_cast %877 : vector<2x1xi1> to vector<2x1xi1>
    %879 = vector.broadcast %878 : vector<2x1xi1> to vector<2x8xi1>
    %880 = arith.select %879, %868, %858 : vector<2x8xi1>, vector<2x8xf32>
    %881 = vector.extract_strided_slice %741 {offsets = [14, 0], sizes = [2, 8], strides = [1, 1]} : vector<16x8xf32> to vector<2x8xf32>
    %882 = vector.extract_strided_slice %744 {offsets = [14, 0], sizes = [2, 1], strides = [1, 1]} : vector<16x1xf32> to vector<2x1xf32>
    %883 = vector.shape_cast %880 : vector<2x8xf32> to vector<2x1x8xf32>
    %884 = vector.broadcast %883 : vector<2x1x8xf32> to vector<2x8x8xf32>
    %885 = vector.broadcast %743 : vector<1x8x8xf32> to vector<2x8x8xf32>
    %886 = arith.addf %884, %885 : vector<2x8x8xf32>
    %887 = vector.shape_cast %881 : vector<2x8xf32> to vector<2x8x1xf32>
    %888 = vector.broadcast %887 : vector<2x8x1xf32> to vector<2x8x8xf32>
    %889 = arith.addf %886, %888 : vector<2x8x8xf32>
    %cst_268 = arith.constant dense<0xFF800000> : vector<2x8xf32>
    %890 = vector.multi_reduction <maximumf>, %889, %cst_268 [2] : vector<2x8x8xf32> to vector<2x8xf32>
    %891 = tpu.iota {dimensions = array<i32: 2>} : vector<2x8x8xi32>
    %892 = vector.shape_cast %890 : vector<2x8xf32> to vector<2x8x1xf32>
    %893 = vector.broadcast %892 : vector<2x8x1xf32> to vector<2x8x8xf32>
    %894 = arith.cmpf oeq, %889, %893 : vector<2x8x8xf32>
    %c8_i32_269 = arith.constant 8 : i32
    %895 = vector.broadcast %c8_i32_269 : i32 to vector<2x8x8xi32>
    %896 = arith.select %894, %891, %895 : vector<2x8x8xi1>, vector<2x8x8xi32>
    %cst_270 = arith.constant dense<2147483647> : vector<2x8xi32>
    %897 = vector.multi_reduction <minsi>, %896, %cst_270 [2] : vector<2x8x8xi32> to vector<2x8xi32>
    %cst_271 = arith.constant 0.000000e+00 : f32
    %898 = vector.broadcast %cst_271 : f32 to vector<2x1xf32>
    %899 = arith.cmpf ogt, %882, %898 : vector<2x1xf32>
    %900 = vector.shape_cast %899 : vector<2x1xi1> to vector<2x1xi1>
    %901 = vector.broadcast %900 : vector<2x1xi1> to vector<2x8xi1>
    %902 = arith.select %901, %890, %880 : vector<2x8xi1>, vector<2x8xf32>
    %c0_272 = arith.constant 0 : index
    %c0_273 = arith.constant 0 : index
    %903 = vector.load %arg13[%c0_272, %c0_273] : memref<1x8xf32, #tpu.memory_space<vmem>>, vector<1x8xf32>
    %904 = vector.broadcast %903 : vector<1x8xf32> to vector<2x8xf32>
    %905 = arith.addf %902, %904 : vector<2x8xf32>
    %906 = tpu.iota {dimensions = array<i32: 1>} : vector<2x8xi32>
    %907 = tpu.iota {dimensions = array<i32: 1>} : vector<2x8xi32>
    %c0_274 = arith.constant 0 : index
    %c0_275 = arith.constant 0 : index
    %908 = vector.load %arg2[%c0_274, %c0_275] : memref<2x1xi32, #tpu.memory_space<vmem>>, vector<2x1xi32>
    %cst_276 = arith.constant dense<0xFF800000> : vector<2xf32>
    %909 = vector.multi_reduction <maximumf>, %905, %cst_276 [1] : vector<2x8xf32> to vector<2xf32>
    %910 = vector.shape_cast %909 : vector<2xf32> to vector<2x1xf32>
    %911 = vector.broadcast %910 : vector<2x1xf32> to vector<2x8xf32>
    %912 = arith.cmpf oeq, %905, %911 : vector<2x8xf32>
    %c8_i32_277 = arith.constant 8 : i32
    %913 = vector.broadcast %c8_i32_277 : i32 to vector<2x8xi32>
    %914 = arith.select %912, %906, %913 : vector<2x8xi1>, vector<2x8xi32>
    %cst_278 = arith.constant dense<2147483647> : vector<2xi32>
    %915 = vector.multi_reduction <minsi>, %914, %cst_278 [1] : vector<2x8xi32> to vector<2xi32>
    %916 = vector.shape_cast %915 : vector<2xi32> to vector<2x1xi32>
    %c0_i32 = arith.constant 0 : i32
    %917 = vector.broadcast %c0_i32 : i32 to vector<2x8xi32>
    %918 = vector.broadcast %916 : vector<2x1xi32> to vector<2x8xi32>
    %919 = arith.cmpi eq, %906, %918 : vector<2x8xi32>
    %c0_i32_279 = arith.constant 0 : i32
    %920 = vector.broadcast %c0_i32_279 : i32 to vector<2x8xi32>
    %921 = arith.select %919, %897, %920 : vector<2x8xi1>, vector<2x8xi32>
    %cst_280 = arith.constant dense<0> : vector<2xi32>
    %922 = vector.multi_reduction <add>, %921, %cst_280 [1] : vector<2x8xi32> to vector<2xi32>
    %923 = vector.shape_cast %922 : vector<2xi32> to vector<2x1xi32>
    %c7_i32 = arith.constant 7 : i32
    %924 = vector.broadcast %c7_i32 : i32 to vector<2x1xi32>
    %925 = arith.cmpi sle, %908, %924 : vector<2x1xi32>
    %926 = arith.select %925, %916, %923 : vector<2x1xi1>, vector<2x1xi32>
    %c7_i32_281 = arith.constant 7 : i32
    %927 = vector.broadcast %c7_i32_281 : i32 to vector<2x8xi32>
    %928 = arith.cmpi eq, %907, %927 : vector<2x8xi32>
    %929 = vector.shape_cast %926 : vector<2x1xi32> to vector<2x1xi32>
    %930 = vector.broadcast %929 : vector<2x1xi32> to vector<2x8xi32>
    %931 = arith.select %928, %930, %917 : vector<2x8xi1>, vector<2x8xi32>
    %932 = vector.broadcast %926 : vector<2x1xi32> to vector<2x8xi32>
    %933 = arith.cmpi eq, %906, %932 : vector<2x8xi32>
    %c0_i32_282 = arith.constant 0 : i32
    %934 = vector.broadcast %c0_i32_282 : i32 to vector<2x8xi32>
    %935 = arith.select %933, %897, %934 : vector<2x8xi1>, vector<2x8xi32>
    %cst_283 = arith.constant dense<0> : vector<2xi32>
    %936 = vector.multi_reduction <add>, %935, %cst_283 [1] : vector<2x8xi32> to vector<2xi32>
    %937 = vector.shape_cast %936 : vector<2xi32> to vector<2x1xi32>
    %c6_i32 = arith.constant 6 : i32
    %938 = vector.broadcast %c6_i32 : i32 to vector<2x1xi32>
    %939 = arith.cmpi sle, %908, %938 : vector<2x1xi32>
    %940 = arith.select %939, %916, %937 : vector<2x1xi1>, vector<2x1xi32>
    %c6_i32_284 = arith.constant 6 : i32
    %941 = vector.broadcast %c6_i32_284 : i32 to vector<2x8xi32>
    %942 = arith.cmpi eq, %907, %941 : vector<2x8xi32>
    %943 = vector.shape_cast %940 : vector<2x1xi32> to vector<2x1xi32>
    %944 = vector.broadcast %943 : vector<2x1xi32> to vector<2x8xi32>
    %945 = arith.select %942, %944, %931 : vector<2x8xi1>, vector<2x8xi32>
    %946 = vector.broadcast %940 : vector<2x1xi32> to vector<2x8xi32>
    %947 = arith.cmpi eq, %906, %946 : vector<2x8xi32>
    %c0_i32_285 = arith.constant 0 : i32
    %948 = vector.broadcast %c0_i32_285 : i32 to vector<2x8xi32>
    %949 = arith.select %947, %875, %948 : vector<2x8xi1>, vector<2x8xi32>
    %cst_286 = arith.constant dense<0> : vector<2xi32>
    %950 = vector.multi_reduction <add>, %949, %cst_286 [1] : vector<2x8xi32> to vector<2xi32>
    %951 = vector.shape_cast %950 : vector<2xi32> to vector<2x1xi32>
    %c5_i32 = arith.constant 5 : i32
    %952 = vector.broadcast %c5_i32 : i32 to vector<2x1xi32>
    %953 = arith.cmpi sle, %908, %952 : vector<2x1xi32>
    %954 = arith.select %953, %916, %951 : vector<2x1xi1>, vector<2x1xi32>
    %c5_i32_287 = arith.constant 5 : i32
    %955 = vector.broadcast %c5_i32_287 : i32 to vector<2x8xi32>
    %956 = arith.cmpi eq, %907, %955 : vector<2x8xi32>
    %957 = vector.shape_cast %954 : vector<2x1xi32> to vector<2x1xi32>
    %958 = vector.broadcast %957 : vector<2x1xi32> to vector<2x8xi32>
    %959 = arith.select %956, %958, %945 : vector<2x8xi1>, vector<2x8xi32>
    %960 = vector.broadcast %954 : vector<2x1xi32> to vector<2x8xi32>
    %961 = arith.cmpi eq, %906, %960 : vector<2x8xi32>
    %c0_i32_288 = arith.constant 0 : i32
    %962 = vector.broadcast %c0_i32_288 : i32 to vector<2x8xi32>
    %963 = arith.select %961, %853, %962 : vector<2x8xi1>, vector<2x8xi32>
    %cst_289 = arith.constant dense<0> : vector<2xi32>
    %964 = vector.multi_reduction <add>, %963, %cst_289 [1] : vector<2x8xi32> to vector<2xi32>
    %965 = vector.shape_cast %964 : vector<2xi32> to vector<2x1xi32>
    %c4_i32 = arith.constant 4 : i32
    %966 = vector.broadcast %c4_i32 : i32 to vector<2x1xi32>
    %967 = arith.cmpi sle, %908, %966 : vector<2x1xi32>
    %968 = arith.select %967, %916, %965 : vector<2x1xi1>, vector<2x1xi32>
    %c4_i32_290 = arith.constant 4 : i32
    %969 = vector.broadcast %c4_i32_290 : i32 to vector<2x8xi32>
    %970 = arith.cmpi eq, %907, %969 : vector<2x8xi32>
    %971 = vector.shape_cast %968 : vector<2x1xi32> to vector<2x1xi32>
    %972 = vector.broadcast %971 : vector<2x1xi32> to vector<2x8xi32>
    %973 = arith.select %970, %972, %959 : vector<2x8xi1>, vector<2x8xi32>
    %974 = vector.broadcast %968 : vector<2x1xi32> to vector<2x8xi32>
    %975 = arith.cmpi eq, %906, %974 : vector<2x8xi32>
    %c0_i32_291 = arith.constant 0 : i32
    %976 = vector.broadcast %c0_i32_291 : i32 to vector<2x8xi32>
    %977 = arith.select %975, %831, %976 : vector<2x8xi1>, vector<2x8xi32>
    %cst_292 = arith.constant dense<0> : vector<2xi32>
    %978 = vector.multi_reduction <add>, %977, %cst_292 [1] : vector<2x8xi32> to vector<2xi32>
    %979 = vector.shape_cast %978 : vector<2xi32> to vector<2x1xi32>
    %c3_i32 = arith.constant 3 : i32
    %980 = vector.broadcast %c3_i32 : i32 to vector<2x1xi32>
    %981 = arith.cmpi sle, %908, %980 : vector<2x1xi32>
    %982 = arith.select %981, %916, %979 : vector<2x1xi1>, vector<2x1xi32>
    %c3_i32_293 = arith.constant 3 : i32
    %983 = vector.broadcast %c3_i32_293 : i32 to vector<2x8xi32>
    %984 = arith.cmpi eq, %907, %983 : vector<2x8xi32>
    %985 = vector.shape_cast %982 : vector<2x1xi32> to vector<2x1xi32>
    %986 = vector.broadcast %985 : vector<2x1xi32> to vector<2x8xi32>
    %987 = arith.select %984, %986, %973 : vector<2x8xi1>, vector<2x8xi32>
    %988 = vector.broadcast %982 : vector<2x1xi32> to vector<2x8xi32>
    %989 = arith.cmpi eq, %906, %988 : vector<2x8xi32>
    %c0_i32_294 = arith.constant 0 : i32
    %990 = vector.broadcast %c0_i32_294 : i32 to vector<2x8xi32>
    %991 = arith.select %989, %809, %990 : vector<2x8xi1>, vector<2x8xi32>
    %cst_295 = arith.constant dense<0> : vector<2xi32>
    %992 = vector.multi_reduction <add>, %991, %cst_295 [1] : vector<2x8xi32> to vector<2xi32>
    %993 = vector.shape_cast %992 : vector<2xi32> to vector<2x1xi32>
    %c2_i32 = arith.constant 2 : i32
    %994 = vector.broadcast %c2_i32 : i32 to vector<2x1xi32>
    %995 = arith.cmpi sle, %908, %994 : vector<2x1xi32>
    %996 = arith.select %995, %916, %993 : vector<2x1xi1>, vector<2x1xi32>
    %c2_i32_296 = arith.constant 2 : i32
    %997 = vector.broadcast %c2_i32_296 : i32 to vector<2x8xi32>
    %998 = arith.cmpi eq, %907, %997 : vector<2x8xi32>
    %999 = vector.shape_cast %996 : vector<2x1xi32> to vector<2x1xi32>
    %1000 = vector.broadcast %999 : vector<2x1xi32> to vector<2x8xi32>
    %1001 = arith.select %998, %1000, %987 : vector<2x8xi1>, vector<2x8xi32>
    %1002 = vector.broadcast %996 : vector<2x1xi32> to vector<2x8xi32>
    %1003 = arith.cmpi eq, %906, %1002 : vector<2x8xi32>
    %c0_i32_297 = arith.constant 0 : i32
    %1004 = vector.broadcast %c0_i32_297 : i32 to vector<2x8xi32>
    %1005 = arith.select %1003, %787, %1004 : vector<2x8xi1>, vector<2x8xi32>
    %cst_298 = arith.constant dense<0> : vector<2xi32>
    %1006 = vector.multi_reduction <add>, %1005, %cst_298 [1] : vector<2x8xi32> to vector<2xi32>
    %1007 = vector.shape_cast %1006 : vector<2xi32> to vector<2x1xi32>
    %c1_i32 = arith.constant 1 : i32
    %1008 = vector.broadcast %c1_i32 : i32 to vector<2x1xi32>
    %1009 = arith.cmpi sle, %908, %1008 : vector<2x1xi32>
    %1010 = arith.select %1009, %916, %1007 : vector<2x1xi1>, vector<2x1xi32>
    %c1_i32_299 = arith.constant 1 : i32
    %1011 = vector.broadcast %c1_i32_299 : i32 to vector<2x8xi32>
    %1012 = arith.cmpi eq, %907, %1011 : vector<2x8xi32>
    %1013 = vector.shape_cast %1010 : vector<2x1xi32> to vector<2x1xi32>
    %1014 = vector.broadcast %1013 : vector<2x1xi32> to vector<2x8xi32>
    %1015 = arith.select %1012, %1014, %1001 : vector<2x8xi1>, vector<2x8xi32>
    %1016 = vector.broadcast %1010 : vector<2x1xi32> to vector<2x8xi32>
    %1017 = arith.cmpi eq, %906, %1016 : vector<2x8xi32>
    %c0_i32_300 = arith.constant 0 : i32
    %1018 = vector.broadcast %c0_i32_300 : i32 to vector<2x8xi32>
    %1019 = arith.select %1017, %765, %1018 : vector<2x8xi1>, vector<2x8xi32>
    %cst_301 = arith.constant dense<0> : vector<2xi32>
    %1020 = vector.multi_reduction <add>, %1019, %cst_301 [1] : vector<2x8xi32> to vector<2xi32>
    %1021 = vector.shape_cast %1020 : vector<2xi32> to vector<2x1xi32>
    %c0_i32_302 = arith.constant 0 : i32
    %1022 = vector.broadcast %c0_i32_302 : i32 to vector<2x1xi32>
    %1023 = arith.cmpi sle, %908, %1022 : vector<2x1xi32>
    %1024 = arith.select %1023, %916, %1021 : vector<2x1xi1>, vector<2x1xi32>
    %c0_i32_303 = arith.constant 0 : i32
    %1025 = vector.broadcast %c0_i32_303 : i32 to vector<2x8xi32>
    %1026 = arith.cmpi eq, %907, %1025 : vector<2x8xi32>
    %1027 = vector.shape_cast %1024 : vector<2x1xi32> to vector<2x1xi32>
    %1028 = vector.broadcast %1027 : vector<2x1xi32> to vector<2x8xi32>
    %1029 = arith.select %1026, %1028, %1015 : vector<2x8xi1>, vector<2x8xi32>
    %c0_304 = arith.constant 0 : index
    %c0_305 = arith.constant 0 : index
    %1030 = vector.load %arg14[%c0_304, %c0_305] : memref<2x8xi32, #tpu.memory_space<vmem>>, vector<2x8xi32>
    tpu.vector_store %arg14[%c0_304, %c0_305], %1029 {strides = array<i32>} : memref<2x8xi32, #tpu.memory_space<vmem>>, vector<2x8xi32>,
    return
  }
}

</mosaic_0001>

<bundles_post_ra>
// kernel: msar_ner_decode.1
= control target key start
LH: loop header
LB: loop body
LE: loop exit
PB: predicated region body
PF: predicated region fallthrough
CT: control target
= control target key end

     0   :  { %vm61_vm0 = vcmask 261120   ;;  %vm147_vm1 = vcmask 254976   ;;  %v4759_v4 = vmov 0.0|0.0   ;;  %v4760_v13 = vmov 0.0   ;;  %s5819_s0 = inlined_call_operand.vmem [shape: f32[16,32], index: 0, kind: input, shape index: {}]   ;;  %s5820_s1 = inlined_call_operand.vmem [shape: f32[16,1], index: 1, kind: input, shape index: {}]   ;;  %s5821_s2 = inlined_call_operand.vmem [shape: s32[2,1], index: 2, kind: input, shape index: {}]   ;;  %s5822_s3 = inlined_call_operand.vmem [shape: f32[32,128], index: 3, kind: input, shape index: {}]   ;;  %s5823_s4 = inlined_call_operand.vmem [shape: f32[32,128], index: 4, kind: input, shape index: {}]   ;;  %s5824_s5 = inlined_call_operand.vmem [shape: f32[1,128], index: 5, kind: input, shape index: {}]   ;;  %s5825_s6 = inlined_call_operand.vmem [shape: f32[32,128], index: 6, kind: input, shape index: {}]   ;;  %s5826_s7 = inlined_call_operand.vmem [shape: f32[32,128], index: 7, kind: input, shape index: {}]   ;;  %s5827_s8 = inlined_call_operand.vmem [shape: f32[1,128], index: 8, kind: input, shape index: {}]   ;;  %s5828_s9 = inlined_call_operand.vmem [shape: f32[32,8], index: 9, kind: input, shape index: {}]   ;;  %s5829_s10 = inlined_call_operand.vmem [shape: f32[1,8], index: 10, kind: input, shape index: {}]   ;;  %s5830_s11 = inlined_call_operand.vmem [shape: f32[8,8], index: 11, kind: input, shape index: {}]   ;;  %s5831_s12 = inlined_call_operand.vmem [shape: f32[1,8], index: 12, kind: input, shape index: {}]   ;;  %s5832_s13 = inlined_call_operand.vmem [shape: f32[1,8], index: 13, kind: input, shape index: {}]   ;;  %s5833_s14 = inlined_call_operand.hbm [shape: s32[2,8], index: 14, kind: output, shape index: {}]  }
   0x1   :  { %v50_v0 = vld [vmem:[%s5822_s3] sm:$0xff]  ;;  %v51_v1 = vld [vmem:[%s5822_s3 + $0x8] sm:$0xff]  ;;  %4350 = vmatprep.subr.bf16.mxu1 %v4759_v4  ;;  %v52_v6 = vld [vmem:[%s5822_s3 + $0x10] sm:$0xff]  ;;  %148 = vst.msk [vmem:[#allocation2] sm:$0x3] %vm147_vm1, %v4760_v13  ;;  %vm4761_vm2 = vmmov 0  }
   0x2   :  { %v143_v2 = vld [vmem:[%s5823_s4] sm:$0xff]  ;;  %v4342_v3 = vpack.c.bf16 %v51_v1, %v50_v0  ;;  %v144_v5 = vld [vmem:[%s5823_s4 + $0x8] sm:$0xff]  ;;  %v53_v7 = vld [vmem:[%s5822_s3 + $0x18] sm:$0xff]  ;;  %4146 = vmatprep.mubr.msk.f32.mxu1 %vm4761_vm2, %v4760_v13 }
   0x3   :  { %v4864_v8 = vpack.c.bf16 %v144_v5, %v143_v2  ;;  %v4346_v9 = vpack.c.bf16 %v53_v7, %v52_v6  ;;  %v145_v10 = vld [vmem:[%s5823_s4 + $0x10] sm:$0xff]  ;;  %v146_v11 = vld [vmem:[%s5823_s4 + $0x18] sm:$0xff]  ;;  %v48_v12 = vld [vmem:[%s5819_s0] sm:$0xff] }
   0x4   :  { %4343 = vmatprep.subr.bf16.mxu0 %v4342_v3  ;;  %4135 = vmatprep.mubr.msk.f32.mxu0 %vm61_vm0, %v48_v12 }
   0x5   :  { %19 = vsyncpa [#allocation6], 0  ;;  %4345 = vmatpush3.bf16.msra.mxu0 %v4342_v3  ;;  %4352 = vmatpush3.bf16.msra.mxu1 %v4864_v8  ;;  %v4881_v14 = vpack.c.bf16 %v146_v11, %v145_v10  ;;  %v49_v15 = vld [vmem:[%s5819_s0 + $0x8] sm:$0xff]  ;;  %v3962_v17 = vld [vmem:[%s5824_s5] ss:$0 sm:$0xff]  ;;  %s4762_s16 = smov 80  }
   0x6   :  { %4347 = vmatprep.subr.bf16.mxu0 %v4346_v9  ;;  %4353 = vmatprep.subr.bf16.mxu1 %v4759_v4  ;;  %s4763_s5 = smov 16   ;;  %s4764_s17 = smov 96   ;;  %vm280_vm3 = vcmask 123904   ;;  %vm286_vm4 = vcmask 261254   ;;  %vm433_vm5 = vcmask 125954   ;;  %vm439_vm6 = vcmask 259204  }
   0x7   :  { %s4765_s18 = smov 48   ;;  %vm445_vm7 = vcmask 128004   ;;  %vm591_vm8 = vcmask 257154   ;;  %vm292_vm9 = vcmask 130054   ;;  %vm740_vm10 = vcmask 255104   ;;  %s4766_s19 = smov 32  }
   0x8   :  { %v149_v16 = vld [vmem:[#allocation2] sm:$0x3]  ;;  %vm1351_vm11 = vcmask 130048   ;;  %vm2955_vm12 = vcmask 64512   ;;  %vm3014_vm14 = vcmask 1043459  }
   0x9   :  { %4349 = vmatpush3.bf16.msra.mxu0 %v4346_v9  ;;  %4355 = vmatpush3.bf16.msra.mxu1 %v4881_v14 }
   0xa   :  { %4356 = vmatprep.subr.bf16.mxu0 %v4759_v4  ;;  %4362 = vmatprep.subr.bf16.mxu1 %v4759_v4 }
   0xc   :  { %4136 = vmatmul.mubr.msk.f32.vlgmr.msra.gmra.mrb[0].mxu0 %vm61_vm0, %v49_v15  ;;  %4147 = vmatmul.mubr.msk.f32.vlgmr.msra.gmra.mrb[0].mxu1 %vm61_vm0, %v149_v16 }
   0xd   :  { %4358 = vmatpush3.bf16.msra.mxu0 %v4864_v8  ;;  %4157 = vmatprep.mubr.msk.f32.mxu0 %vm4761_vm2, %v4760_v13 }
   0xe   :  { %4359 = vmatprep.subr.bf16.mxu0 %v4759_v4  ;;  %4364 = vmatpush3.bf16.msra.mxu1 %v4864_v8 }
   0xf   :  { %4365 = vmatprep.subr.bf16.mxu1 %v4759_v4  ;;  %4168 = vmatprep.mubr.msk.f32.mxu1 %vm4761_vm2, %v4760_v13 }
  0x11   :  { %4361 = vmatpush3.bf16.msra.mxu0 %v4881_v14 }
  0x12   :  { %4367 = vmatpush3.bf16.msra.mxu1 %v4881_v14  ;;  %4368 = vmatprep.subr.bf16.mxu0 %v4759_v4 }
  0x13   :  { %4374 = vmatprep.subr.bf16.mxu1 %v4759_v4 }
  0xdf   :  { %v4137_v18 = vpop.f32.mrb[0].mxu0  ;;  %v219_v19 = vpop.f32.mrb[0].mxu1 }
  0xe0   :  { %v134_v20 = vpop.f32.mrb[1].mxu0  ;;  %v4148_v21 = vpop.f32.mrb[1].mxu1  ;;  %v4907_v22 = vadd.f32 %v4137_v18, %v3962_v17  ;;  %v225_v23 = vrot.slane %v219_v19, 2 }
  0xe1   :  { %v4909_v24 = vadd.f32 %v3962_v17, %v134_v20 }
  0xe2   :  { %v227_v26 = vadd.f32 %v225_v23, %v4907_v22 }
  0xe3   :  { %v223_v25 = vadd.f32 %v219_v19, %v4909_v24 }
  0xe4   :  { %v3967_v30 = vmul.f32 -1.442695, %v227_v26 }
  0xe5   :  { %4479 = vtanh.f32 %v223_v25  ;;  %v3966_v29 = vmul.f32 -1.442695, %v223_v25 }
  0xe6   :  { %4481 = vtanh.f32 %v227_v26 }
  0xe7   :  { %4483 = vpow2.f32 %v3966_v29 }
  0xe8   :  { %4485 = vpow2.f32 %v3967_v30 }
  0xef   :  { %v4480_v27 = vpop.eup %4479 }
  0xf0   :  { %244 = vrot.lane.b32.xlu0 %v4480_v27, %s4762_s16  ;;  %v4482_v28 = vpop.eup %4481 }
  0xf1   :  { %v4484_v31 = vpop.eup %4483 }
  0xf2   :  { %v231_v32 = vadd.f32 1.0, %v4484_v31  ;;  %v4486_v33 = vpop.eup %4485 }
  0xf3   :  { %v237_v34 = vadd.f32 1.0, %v4486_v33 }
  0xf4   :  { %255 = vrot.lane.b32.xlu0 %v4482_v28, %s4762_s16  ;;  %4487 = vrcp.f32 %v231_v32 }
  0xf5   :  { %4489 = vrcp.f32 %v237_v34 }
  0xfe   :  { %v4488_v35 = vpop.eup %4487 }
  0xff   :  { %v4490_v38 = vpop.eup %4489  ;;  %v242_v41 = vmul.f32 0.0, %v4488_v35 }
 0x100   :  { %v253_v44 = vmul.f32 0.0, %v4490_v38 }
 0x162   :  { %v245_v36 = vpop.permute.xlu0 %244 }
 0x163   :  { %v247_v37 = vmul.f32 %v4488_v35, %v245_v36 }
 0x165   :  { %249 = vrot.lane.b32.xlu1 %v247_v37, %s4763_s5 }
 0x166   :  { %v256_v39 = vpop.permute.xlu0 %255 }
 0x167   :  { %v258_v40 = vmul.f32 %v4490_v38, %v256_v39 }
 0x169   :  { %260 = vrot.lane.b32.xlu1 %v258_v40, %s4763_s5 }
 0x1d7   :  { %v250_v42 = vpop.permute.xlu1 %249 }
 0x1d8   :  { %v4917_v43 = vadd.f32 %v250_v42, %v242_v41 }
 0x1da   :  { %4491 = vtanh.f32 %v4917_v43  ;;  %v390_v16 = vrot.slane %v4917_v43, 6 }
 0x1db   :  { %v261_v45 = vpop.permute.xlu1 %260 }
 0x1dc   :  { %v263_v46 = vadd.f32 %v261_v45, %v253_v44 }
 0x1de   :  { %4493 = vtanh.f32 %v263_v46  ;;  %v404_v17 = vrot.slane %v263_v46, 2 }
 0x1e4   :  { %v4492_v47 = vpop.eup %4491 }
 0x1e5   :  { %266 = vrot.lane.b32.xlu0 %v4492_v47, %s4763_s5 }
 0x1e8   :  { %v4494_v48 = vpop.eup %4493 }
 0x1e9   :  { %272 = vrot.lane.b32.xlu1 %v4494_v48, %s4763_s5 }
 0x257   :  { %v267_v49 = vpop.permute.xlu0 %266 }
 0x258   :  { %v269_v50 = vmul.f32 %v4488_v35, %v267_v49 }
 0x25a   :  { %277 = vrot.lane.b32.xlu0 %v269_v50, %s4764_s17 }
 0x25b   :  { %v273_v51 = vpop.permute.xlu1 %272 }
 0x25c   :  { %v4923_v52 = vmul.f32 %v4490_v38, %v273_v51 }
 0x25e   :  { %283 = vrot.lane.b32.xlu1 %v4923_v52, %s4765_s18 }
 0x2cc   :  { %v278_v53 = vpop.permute.xlu0 %277 }
 0x2cd   :  { %281 = vst.msk [vmem:[#allocation2] sm:$0x3] %vm280_vm3, %v278_v53  ;;  %288 = vst.msk [vmem:[#allocation3] sm:$0x3] %vm280_vm3, %v278_v53 }
 0x2d0   :  { %v284_v54 = vpop.permute.xlu1 %283 }
 0x2d1   :  { %287 = vst.msk [vmem:[#allocation2 - $0x6] sm:$0xc0] %vm286_vm4, %v284_v54 }
 0x2d8   :  { %v294_v55 = vld [vmem:[#allocation2] sm:$0x3] }
 0x2d9   :  { %4158 = vmatmul.mubr.msk.f32.vlgmr.msra.gmra.mrb[2].mxu0 %vm61_vm0, %v294_v55 }
 0x2da   :  { %4370 = vmatpush3.bf16.msra.mxu0 %v4864_v8  ;;  %4179 = vmatprep.mubr.msk.f32.mxu0 %vm4761_vm2, %v4760_v13 }
 0x2db   :  { %4371 = vmatprep.subr.bf16.mxu0 %v4759_v4 }
 0x2de   :  { %4373 = vmatpush3.bf16.msra.mxu0 %v4881_v14 }
 0x2df   :  { %4380 = vmatprep.subr.bf16.mxu0 %v4759_v4 }
 0x3ac   :  { %v364_v56 = vpop.f32.mrb[2].mxu0 }
 0x3ad   :  { %v369_v57 = vrot.slane %v364_v56, 6  ;;  %v372_v58 = vrot.slane %v364_v56, 4  ;;  %v4159_v59 = vpop.f32.mrb[3].mxu0 }
 0x3af   :  { %v371_v60 = vadd.f32 %v369_v57, %v4909_v24  ;;  %v374_v61 = vadd.f32 %v372_v58, %v4907_v22 }
 0x3b1   :  { %4495 = vtanh.f32 %v371_v60  ;;  %v3969_v0 = vmul.f32 -1.442695, %v371_v60  ;;  %v3970_v1 = vmul.f32 -1.442695, %v374_v61 }
 0x3b2   :  { %4497 = vtanh.f32 %v374_v61 }
 0x3b3   :  { %4499 = vpow2.f32 %v3969_v0 }
 0x3b4   :  { %4501 = vpow2.f32 %v3970_v1 }
 0x3bb   :  { %v4496_v62 = vpop.eup %4495 }
 0x3bc   :  { %v4498_v63 = vpop.eup %4497  ;;  %394 = vrot.lane.b32.xlu0 %v4496_v62, %s4762_s16 }
 0x3bd   :  { %408 = vrot.lane.b32.xlu1 %v4498_v63, %s4762_s16  ;;  %v4500_v2 = vpop.eup %4499 }
 0x3be   :  { %v4502_v3 = vpop.eup %4501  ;;  %v378_v5 = vadd.f32 1.0, %v4500_v2 }
 0x3bf   :  { %v384_v6 = vadd.f32 1.0, %v4502_v3 }
 0x3c0   :  { %4503 = vrcp.f32 %v378_v5 }
 0x3c1   :  { %4505 = vrcp.f32 %v384_v6 }
 0x3ca   :  { %v4504_v7 = vpop.eup %4503 }
 0x3cb   :  { %v4506_v10 = vpop.eup %4505  ;;  %v392_v18 = vmul.f32 %v4504_v7, %v390_v16 }
 0x3cc   :  { %v406_v19 = vmul.f32 %v4506_v10, %v404_v17 }
 0x42e   :  { %v395_v9 = vpop.permute.xlu0 %394 }
 0x42f   :  { %v409_v11 = vpop.permute.xlu1 %408  ;;  %v397_v12 = vmul.f32 %v4504_v7, %v395_v9 }
 0x430   :  { %v411_v15 = vmul.f32 %v4506_v10, %v409_v11 }
 0x431   :  { %399 = vrot.lane.b32.xlu0 %v397_v12, %s4763_s5 }
 0x432   :  { %413 = vrot.lane.b32.xlu1 %v411_v15, %s4763_s5 }
 0x4a3   :  { %v400_v20 = vpop.permute.xlu0 %399 }
 0x4a4   :  { %v414_v21 = vpop.permute.xlu1 %413  ;;  %v402_v23 = vadd.f32 %v400_v20, %v392_v18 }
 0x4a5   :  { %v416_v25 = vadd.f32 %v414_v21, %v406_v19 }
 0x4a6   :  { %4507 = vtanh.f32 %v402_v23  ;;  %v543_v56 = vrot.slane %v402_v23, 6 }
 0x4a7   :  { %4509 = vtanh.f32 %v416_v25  ;;  %v557_v57 = vrot.slane %v416_v25, 2 }
 0x4b0   :  { %v4508_v26 = vpop.eup %4507 }
 0x4b1   :  { %v4510_v27 = vpop.eup %4509  ;;  %419 = vrot.lane.b32.xlu0 %v4508_v26, %s4763_s5 }
 0x4b2   :  { %425 = vrot.lane.b32.xlu1 %v4510_v27, %s4763_s5 }
 0x523   :  { %v420_v28 = vpop.permute.xlu0 %419 }
 0x524   :  { %v426_v29 = vpop.permute.xlu1 %425  ;;  %v422_v30 = vmul.f32 %v4504_v7, %v420_v28 }
 0x525   :  { %v4946_v31 = vmul.f32 %v4506_v10, %v426_v29 }
 0x526   :  { %430 = vrot.lane.b32.xlu0 %v422_v30, %s4764_s17 }
 0x527   :  { %436 = vrot.lane.b32.xlu1 %v4946_v31, %s4765_s18 }
 0x598   :  { %v431_v32 = vpop.permute.xlu0 %430 }
 0x599   :  { %v437_v33 = vpop.permute.xlu1 %436  ;;  %434 = vst.msk [vmem:[#allocation2 - $0x2] sm:$0xc] %vm433_vm5, %v431_v32  ;;  %441 = vst.msk [vmem:[#allocation3] sm:$0xc] %vm433_vm5, %v431_v32 }
 0x59a   :  { %440 = vst.msk [vmem:[#allocation2 - $0x4] sm:$0x30] %vm439_vm6, %v437_v33 }
 0x5a1   :  { %v447_v34 = vld [vmem:[#allocation2] sm:$0x3] }
 0x5a2   :  { %4169 = vmatmul.mubr.msk.f32.vlgmr.msra.gmra.mrb[2].mxu1 %vm61_vm0, %v447_v34 }
 0x5a3   :  { %4376 = vmatpush3.bf16.msra.mxu1 %v4864_v8  ;;  %4190 = vmatprep.mubr.msk.f32.mxu1 %vm4761_vm2, %v4760_v13 }
 0x5a4   :  { %4377 = vmatprep.subr.bf16.mxu1 %v4759_v4 }
 0x5a7   :  { %4379 = vmatpush3.bf16.msra.mxu1 %v4881_v14 }
 0x5a8   :  { %4386 = vmatprep.subr.bf16.mxu1 %v4759_v4 }
 0x675   :  { %v517_v35 = vpop.f32.mrb[2].mxu1 }
 0x676   :  { %v522_v36 = vrot.slane %v517_v35, 4  ;;  %v525_v37 = vrot.slane %v517_v35, 6  ;;  %v4170_v38 = vpop.f32.mrb[3].mxu1 }
 0x678   :  { %v524_v39 = vadd.f32 %v522_v36, %v4909_v24  ;;  %v527_v40 = vadd.f32 %v525_v37, %v4907_v22 }
 0x67a   :  { %4511 = vtanh.f32 %v524_v39  ;;  %v3972_v43 = vmul.f32 -1.442695, %v524_v39  ;;  %v3973_v44 = vmul.f32 -1.442695, %v527_v40 }
 0x67b   :  { %4513 = vtanh.f32 %v527_v40 }
 0x67c   :  { %4515 = vpow2.f32 %v3972_v43 }
 0x67d   :  { %4517 = vpow2.f32 %v3973_v44 }
 0x684   :  { %v4512_v41 = vpop.eup %4511 }
 0x685   :  { %v4514_v42 = vpop.eup %4513  ;;  %547 = vrot.lane.b32.xlu0 %v4512_v41, %s4762_s16 }
 0x686   :  { %561 = vrot.lane.b32.xlu1 %v4514_v42, %s4762_s16  ;;  %v4516_v45 = vpop.eup %4515 }
 0x687   :  { %v4518_v46 = vpop.eup %4517  ;;  %v531_v47 = vadd.f32 1.0, %v4516_v45 }
 0x688   :  { %v537_v48 = vadd.f32 1.0, %v4518_v46 }
 0x689   :  { %4519 = vrcp.f32 %v531_v47 }
 0x68a   :  { %4521 = vrcp.f32 %v537_v48 }
 0x693   :  { %v4520_v49 = vpop.eup %4519 }
 0x694   :  { %v4522_v51 = vpop.eup %4521  ;;  %v545_v58 = vmul.f32 %v4520_v49, %v543_v56 }
 0x695   :  { %v559_v59 = vmul.f32 %v4522_v51, %v557_v57 }
 0x6f7   :  { %v548_v50 = vpop.permute.xlu0 %547 }
 0x6f8   :  { %v562_v53 = vpop.permute.xlu1 %561  ;;  %v550_v54 = vmul.f32 %v4520_v49, %v548_v50 }
 0x6f9   :  { %v564_v55 = vmul.f32 %v4522_v51, %v562_v53 }
 0x6fa   :  { %552 = vrot.lane.b32.xlu0 %v550_v54, %s4763_s5 }
 0x6fb   :  { %566 = vrot.lane.b32.xlu1 %v564_v55, %s4763_s5 }
 0x76c   :  { %v553_v60 = vpop.permute.xlu0 %552 }
 0x76d   :  { %v567_v61 = vpop.permute.xlu1 %566  ;;  %v4967_v62 = vadd.f32 %v553_v60, %v545_v58 }
 0x76e   :  { %v569_v63 = vadd.f32 %v567_v61, %v559_v59 }
 0x76f   :  { %4523 = vtanh.f32 %v4967_v62  ;;  %v692_v37 = vrot.slane %v4967_v62, 6 }
 0x770   :  { %4525 = vtanh.f32 %v569_v63  ;;  %v706_v35 = vrot.slane %v569_v63, 2 }
 0x779   :  { %v4524_v0 = vpop.eup %4523 }
 0x77a   :  { %v4526_v1 = vpop.eup %4525  ;;  %572 = vrot.lane.b32.xlu0 %v4524_v0, %s4763_s5 }
 0x77b   :  { %578 = vrot.lane.b32.xlu1 %v4526_v1, %s4763_s5 }
 0x7ec   :  { %v573_v2 = vpop.permute.xlu0 %572 }
 0x7ed   :  { %v579_v3 = vpop.permute.xlu1 %578  ;;  %v575_v5 = vmul.f32 %v4520_v49, %v573_v2 }
 0x7ee   :  { %v4972_v6 = vmul.f32 %v4522_v51, %v579_v3 }
 0x7ef   :  { %583 = vrot.lane.b32.xlu0 %v575_v5, %s4764_s17 }
 0x7f0   :  { %588 = vrot.lane.b32.xlu1 %v4972_v6, %s4765_s18 }
 0x861   :  { %v584_v7 = vpop.permute.xlu0 %583 }
 0x862   :  { %v589_v9 = vpop.permute.xlu1 %588  ;;  %586 = vst.msk [vmem:[#allocation2 - $0x4] sm:$0x30] %vm445_vm7, %v584_v7  ;;  %593 = vst.msk [vmem:[#allocation3] sm:$0x30] %vm445_vm7, %v584_v7 }
 0x863   :  { %592 = vst.msk [vmem:[#allocation2 - $0x2] sm:$0xc] %vm591_vm8, %v589_v9 }
 0x86a   :  { %v598_v10 = vld [vmem:[#allocation2] sm:$0x3] }
 0x86b   :  { %4180 = vmatmul.mubr.msk.f32.vlgmr.msra.gmra.mrb[4].mxu0 %vm61_vm0, %v598_v10 }
 0x86c   :  { %4382 = vmatpush3.bf16.msra.mxu0 %v4864_v8  ;;  %4201 = vmatprep.mubr.msk.f32.mxu0 %vm4761_vm2, %v4760_v13 }
 0x86d   :  { %4383 = vmatprep.subr.bf16.mxu0 %v4759_v4 }
 0x870   :  { %4385 = vmatpush3.bf16.msra.mxu0 %v4881_v14 }
 0x871   :  { %4392 = vmatprep.subr.bf16.mxu0 %v4759_v4 }
 0x93e   :  { %v668_v11 = vpop.f32.mrb[4].mxu0 }
 0x93f   :  { %v673_v12 = vrot.slane %v668_v11, 2  ;;  %v676_v15 = vadd.f32 %v668_v11, %v4907_v22  ;;  %v4181_v16 = vpop.f32.mrb[5].mxu0 }
 0x941   :  { %v675_v17 = vadd.f32 %v673_v12, %v4909_v24  ;;  %4527 = vtanh.f32 %v676_v15  ;;  %v3976_v20 = vmul.f32 -1.442695, %v676_v15 }
 0x943   :  { %4529 = vtanh.f32 %v675_v17  ;;  %v3975_v21 = vmul.f32 -1.442695, %v675_v17 }
 0x944   :  { %4531 = vpow2.f32 %v3976_v20 }
 0x945   :  { %4533 = vpow2.f32 %v3975_v21 }
 0x94b   :  { %v4528_v18 = vpop.eup %4527 }
 0x94c   :  { %710 = vrot.lane.b32.xlu1 %v4528_v18, %s4762_s16 }
 0x94d   :  { %v4530_v19 = vpop.eup %4529 }
 0x94e   :  { %696 = vrot.lane.b32.xlu0 %v4530_v19, %s4762_s16  ;;  %v4532_v23 = vpop.eup %4531 }
 0x94f   :  { %v4534_v25 = vpop.eup %4533  ;;  %v686_v26 = vadd.f32 1.0, %v4532_v23 }
 0x950   :  { %v680_v27 = vadd.f32 1.0, %v4534_v25 }
 0x951   :  { %4535 = vrcp.f32 %v686_v26 }
 0x952   :  { %4537 = vrcp.f32 %v680_v27 }
 0x95b   :  { %v4536_v28 = vpop.eup %4535 }
 0x95c   :  { %v4538_v32 = vpop.eup %4537  ;;  %v708_v36 = vmul.f32 %v4536_v28, %v706_v35 }
 0x95d   :  { %v694_v40 = vmul.f32 %v4538_v32, %v692_v37 }
 0x9be   :  { %v711_v29 = vpop.permute.xlu1 %710 }
 0x9bf   :  { %v713_v30 = vmul.f32 %v4536_v28, %v711_v29 }
 0x9c0   :  { %v697_v33 = vpop.permute.xlu0 %696 }
 0x9c1   :  { %715 = vrot.lane.b32.xlu1 %v713_v30, %s4763_s5  ;;  %v699_v34 = vmul.f32 %v4538_v32, %v697_v33 }
 0x9c3   :  { %701 = vrot.lane.b32.xlu0 %v699_v34, %s4763_s5 }
 0xa33   :  { %v716_v38 = vpop.permute.xlu1 %715 }
 0xa34   :  { %v4994_v39 = vadd.f32 %v716_v38, %v708_v36 }
 0xa35   :  { %v702_v41 = vpop.permute.xlu0 %701 }
 0xa36   :  { %4539 = vtanh.f32 %v4994_v39  ;;  %v704_v42 = vadd.f32 %v702_v41, %v694_v40  ;;  %v855_v15 = vrot.slane %v4994_v39, 2 }
 0xa38   :  { %4541 = vtanh.f32 %v704_v42  ;;  %v841_v11 = vrot.slane %v704_v42, 6 }
 0xa40   :  { %v4540_v43 = vpop.eup %4539 }
 0xa41   :  { %727 = vrot.lane.b32.xlu1 %v4540_v43, %s4763_s5 }
 0xa42   :  { %v4542_v44 = vpop.eup %4541 }
 0xa43   :  { %721 = vrot.lane.b32.xlu0 %v4542_v44, %s4763_s5 }
 0xab3   :  { %v728_v45 = vpop.permute.xlu1 %727 }
 0xab4   :  { %v4999_v46 = vmul.f32 %v4536_v28, %v728_v45 }
 0xab5   :  { %v722_v47 = vpop.permute.xlu0 %721 }
 0xab6   :  { %737 = vrot.lane.b32.xlu1 %v4999_v46, %s4765_s18  ;;  %v724_v48 = vmul.f32 %v4538_v32, %v722_v47 }
 0xab8   :  { %732 = vrot.lane.b32.xlu0 %v724_v48, %s4764_s17 }
 0xb28   :  { %v738_v50 = vpop.permute.xlu1 %737 }
 0xb2a   :  { %v733_v49 = vpop.permute.xlu0 %732 }
 0xb2b   :  { %735 = vst.msk [vmem:[#allocation2 - $0x6] sm:$0xc0] %vm292_vm9, %v733_v49  ;;  %742 = vst.msk [vmem:[#allocation3] sm:$0xc0] %vm292_vm9, %v733_v49 }
 0xb2c   :  { %741 = vst.msk [vmem:[#allocation2] sm:$0x3] %vm740_vm10, %v738_v50 }
 0xb33   :  { %v747_v51 = vld [vmem:[#allocation2] sm:$0x3] }
 0xb34   :  { %4191 = vmatmul.mubr.msk.f32.vlgmr.msra.gmra.mrb[4].mxu1 %vm61_vm0, %v747_v51 }
 0xb35   :  { %4388 = vmatpush3.bf16.msra.mxu1 %v4864_v8  ;;  %4212 = vmatprep.mubr.msk.f32.mxu1 %vm4761_vm2, %v4760_v13 }
 0xb36   :  { %4389 = vmatprep.subr.bf16.mxu1 %v4759_v4 }
 0xb39   :  { %4391 = vmatpush3.bf16.msra.mxu1 %v4881_v14 }
 0xc07   :  { %v817_v53 = vpop.f32.mrb[4].mxu1 }
 0xc08   :  { %v821_v54 = vadd.f32 %v817_v53, %v4907_v22  ;;  %v823_v55 = vrot.slane %v817_v53, 2  ;;  %v4192_v56 = vpop.f32.mrb[5].mxu1 }
 0xc0a   :  { %v825_v57 = vadd.f32 %v823_v55, %v4909_v24  ;;  %4543 = vtanh.f32 %v821_v54  ;;  %v3978_v60 = vmul.f32 -1.442695, %v821_v54 }
 0xc0c   :  { %4545 = vtanh.f32 %v825_v57  ;;  %v3979_v61 = vmul.f32 -1.442695, %v825_v57 }
 0xc0d   :  { %4547 = vpow2.f32 %v3978_v60 }
 0xc0e   :  { %4549 = vpow2.f32 %v3979_v61 }
 0xc14   :  { %v4544_v58 = vpop.eup %4543 }
 0xc15   :  { %845 = vrot.lane.b32.xlu0 %v4544_v58, %s4762_s16 }
 0xc16   :  { %v4546_v59 = vpop.eup %4545 }
 0xc17   :  { %859 = vrot.lane.b32.xlu1 %v4546_v59, %s4762_s16  ;;  %v4548_v62 = vpop.eup %4547 }
 0xc18   :  { %v4550_v63 = vpop.eup %4549  ;;  %v829_v0 = vadd.f32 1.0, %v4548_v62 }
 0xc19   :  { %v835_v1 = vadd.f32 1.0, %v4550_v63 }
 0xc1a   :  { %4551 = vrcp.f32 %v829_v0 }
 0xc1b   :  { %4553 = vrcp.f32 %v835_v1 }
 0xc24   :  { %v4552_v2 = vpop.eup %4551 }
 0xc25   :  { %v4554_v7 = vpop.eup %4553  ;;  %v843_v12 = vmul.f32 %v4552_v2, %v841_v11 }
 0xc26   :  { %v857_v18 = vmul.f32 %v4554_v7, %v855_v15 }
 0xc87   :  { %v846_v3 = vpop.permute.xlu0 %845 }
 0xc88   :  { %v848_v5 = vmul.f32 %v4552_v2, %v846_v3 }
 0xc89   :  { %v860_v9 = vpop.permute.xlu1 %859 }
 0xc8a   :  { %850 = vrot.lane.b32.xlu0 %v848_v5, %s4763_s5  ;;  %v862_v10 = vmul.f32 %v4554_v7, %v860_v9 }
 0xc8c   :  { %864 = vrot.lane.b32.xlu1 %v862_v10, %s4763_s5 }
 0xcfc   :  { %v851_v16 = vpop.permute.xlu0 %850 }
 0xcfd   :  { %v853_v17 = vadd.f32 %v851_v16, %v843_v12 }
 0xcfe   :  { %v865_v19 = vpop.permute.xlu1 %864 }
 0xcff   :  { %4555 = vtanh.f32 %v853_v17  ;;  %v867_v20 = vadd.f32 %v865_v19, %v857_v18  ;;  %v991_v53 = vrot.slane %v853_v17, 6 }
 0xd01   :  { %4557 = vtanh.f32 %v867_v20  ;;  %v1005_v54 = vrot.slane %v867_v20, 2 }
 0xd09   :  { %v4556_v21 = vpop.eup %4555 }
 0xd0a   :  { %870 = vrot.lane.b32.xlu0 %v4556_v21, %s4763_s5 }
 0xd0b   :  { %v4558_v23 = vpop.eup %4557 }
 0xd0c   :  { %876 = vrot.lane.b32.xlu1 %v4558_v23, %s4763_s5 }
 0xd7c   :  { %v871_v25 = vpop.permute.xlu0 %870 }
 0xd7d   :  { %v873_v26 = vmul.f32 %v4552_v2, %v871_v25 }
 0xd7e   :  { %v877_v27 = vpop.permute.xlu1 %876 }
 0xd7f   :  { %881 = vrot.lane.b32.xlu0 %v873_v26, %s4764_s17  ;;  %v5023_v28 = vmul.f32 %v4554_v7, %v877_v27 }
 0xd81   :  { %886 = vrot.lane.b32.xlu1 %v5023_v28, %s4765_s18 }
 0xdf1   :  { %v882_v29 = vpop.permute.xlu0 %881 }
 0xdf2   :  { %884 = vst.msk [vmem:[#allocation2] sm:$0x3] %vm280_vm3, %v882_v29  ;;  %890 = vst.msk [vmem:[#allocation3 + $0x8] sm:$0x3] %vm280_vm3, %v882_v29 }
 0xdf3   :  { %v887_v30 = vpop.permute.xlu1 %886 }
 0xdf4   :  { %889 = vst.msk [vmem:[#allocation2 - $0x6] sm:$0xc0] %vm286_vm4, %v887_v30 }
 0xdfb   :  { %v895_v32 = vld [vmem:[#allocation2] sm:$0x3] }
 0xdfc   :  { %4202 = vmatmul.mubr.msk.f32.vlgmr.msra.gmra.mrb[6].mxu0 %vm61_vm0, %v895_v32 }
 0xdfd   :  { %4394 = vmatpush3.bf16.msra.mxu0 %v4864_v8  ;;  %4223 = vmatprep.mubr.msk.f32.mxu0 %vm4761_vm2, %v4760_v13 }
 0xdfe   :  { %4395 = vmatprep.subr.bf16.mxu0 %v4759_v4 }
 0xe01   :  { %4397 = vmatpush3.bf16.msra.mxu0 %v4881_v14 }
 0xe02   :  { %4406 = vmatprep.subr.bf16.mxu0 %v4759_v4 }
 0xecf   :  { %v965_v33 = vpop.f32.mrb[6].mxu0 }
 0xed0   :  { %v970_v34 = vrot.slane %v965_v33, 6  ;;  %v973_v35 = vrot.slane %v965_v33, 4  ;;  %v4203_v36 = vpop.f32.mrb[7].mxu0 }
 0xed2   :  { %v972_v37 = vadd.f32 %v970_v34, %v4907_v22  ;;  %v975_v38 = vadd.f32 %v973_v35, %v4909_v24 }
 0xed4   :  { %4559 = vtanh.f32 %v972_v37  ;;  %v3981_v40 = vmul.f32 -1.442695, %v972_v37  ;;  %v3982_v14 = vmul.f32 -1.442695, %v975_v38 }
 0xed5   :  { %4561 = vtanh.f32 %v975_v38 }
 0xed6   :  { %4563 = vpow2.f32 %v3981_v40 }
 0xed7   :  { %4565 = vpow2.f32 %v3982_v14 }
 0xede   :  { %v4560_v8 = vpop.eup %4559 }
 0xedf   :  { %v4562_v39 = vpop.eup %4561  ;;  %995 = vrot.lane.b32.xlu0 %v4560_v8, %s4762_s16 }
 0xee0   :  { %1009 = vrot.lane.b32.xlu1 %v4562_v39, %s4762_s16  ;;  %v4564_v41 = vpop.eup %4563 }
 0xee1   :  { %v4566_v42 = vpop.eup %4565  ;;  %v979_v43 = vadd.f32 1.0, %v4564_v41 }
 0xee2   :  { %v985_v44 = vadd.f32 1.0, %v4566_v42 }
 0xee3   :  { %4567 = vrcp.f32 %v979_v43 }
 0xee4   :  { %4569 = vrcp.f32 %v985_v44 }
 0xeed   :  { %v4568_v45 = vpop.eup %4567 }
 0xeee   :  { %v4570_v48 = vpop.eup %4569  ;;  %v993_v55 = vmul.f32 %v4568_v45, %v991_v53 }
 0xeef   :  { %v1007_v56 = vmul.f32 %v4570_v48, %v1005_v54 }
 0xf51   :  { %v996_v47 = vpop.permute.xlu0 %995 }
 0xf52   :  { %v1010_v49 = vpop.permute.xlu1 %1009  ;;  %v998_v50 = vmul.f32 %v4568_v45, %v996_v47 }
 0xf53   :  { %v1012_v51 = vmul.f32 %v4570_v48, %v1010_v49 }
 0xf54   :  { %1000 = vrot.lane.b32.xlu0 %v998_v50, %s4763_s5 }
 0xf55   :  { %1014 = vrot.lane.b32.xlu1 %v1012_v51, %s4763_s5 }
 0xfc6   :  { %v1001_v57 = vpop.permute.xlu0 %1000 }
 0xfc7   :  { %v1015_v58 = vpop.permute.xlu1 %1014  ;;  %v1003_v59 = vadd.f32 %v1001_v57, %v993_v55 }
 0xfc8   :  { %v1017_v60 = vadd.f32 %v1015_v58, %v1007_v56 }
 0xfc9   :  { %4571 = vtanh.f32 %v1003_v59  ;;  %v1141_v35 = vrot.slane %v1003_v59, 6 }
 0xfca   :  { %4573 = vtanh.f32 %v1017_v60  ;;  %v1155_v36 = vrot.slane %v1017_v60, 2 }
 0xfd3   :  { %v4572_v61 = vpop.eup %4571 }
 0xfd4   :  { %v4574_v62 = vpop.eup %4573  ;;  %1020 = vrot.lane.b32.xlu0 %v4572_v61, %s4763_s5 }
 0xfd5   :  { %1026 = vrot.lane.b32.xlu1 %v4574_v62, %s4763_s5 }
0x1046   :  { %v1021_v63 = vpop.permute.xlu0 %1020 }
0x1047   :  { %v1027_v0 = vpop.permute.xlu1 %1026  ;;  %v1023_v1 = vmul.f32 %v4568_v45, %v1021_v63 }
0x1048   :  { %v5045_v2 = vmul.f32 %v4570_v48, %v1027_v0 }
0x1049   :  { %1031 = vrot.lane.b32.xlu0 %v1023_v1, %s4764_s17 }
0x104a   :  { %1036 = vrot.lane.b32.xlu1 %v5045_v2, %s4765_s18 }
0x10bb   :  { %v1032_v3 = vpop.permute.xlu0 %1031 }
0x10bc   :  { %v1037_v5 = vpop.permute.xlu1 %1036  ;;  %1034 = vst.msk [vmem:[#allocation2 - $0x2] sm:$0xc] %vm433_vm5, %v1032_v3  ;;  %1040 = vst.msk [vmem:[#allocation3 + $0x8] sm:$0xc] %vm433_vm5, %v1032_v3 }
0x10bd   :  { %1039 = vst.msk [vmem:[#allocation2 - $0x4] sm:$0x30] %vm439_vm6, %v1037_v5 }
0x10c4   :  { %v1045_v7 = vld [vmem:[#allocation2] sm:$0x3] }
0x10c5   :  { %4213 = vmatmul.mubr.msk.f32.vlgmr.msra.gmra.mrb[6].mxu1 %vm61_vm0, %v1045_v7 }
0x1198   :  { %v1115_v9 = vpop.f32.mrb[6].mxu1 }
0x1199   :  { %v1120_v10 = vrot.slane %v1115_v9, 4  ;;  %v1123_v11 = vrot.slane %v1115_v9, 6  ;;  %v4214_v12 = vpop.f32.mrb[7].mxu1 }
0x119b   :  { %v1122_v15 = vadd.f32 %v1120_v10, %v4907_v22  ;;  %v1125_v16 = vadd.f32 %v1123_v11, %v4909_v24 }
0x119d   :  { %4575 = vtanh.f32 %v1122_v15  ;;  %v3984_v19 = vmul.f32 -1.442695, %v1122_v15  ;;  %v3985_v20 = vmul.f32 -1.442695, %v1125_v16 }
0x119e   :  { %4577 = vtanh.f32 %v1125_v16 }
0x119f   :  { %4579 = vpow2.f32 %v3984_v19 }
0x11a0   :  { %4581 = vpow2.f32 %v3985_v20 }
0x11a7   :  { %v4576_v17 = vpop.eup %4575 }
0x11a8   :  { %v4578_v18 = vpop.eup %4577  ;;  %1145 = vrot.lane.b32.xlu0 %v4576_v17, %s4762_s16 }
0x11a9   :  { %1159 = vrot.lane.b32.xlu1 %v4578_v18, %s4762_s16  ;;  %v4580_v21 = vpop.eup %4579 }
0x11aa   :  { %v4582_v23 = vpop.eup %4581  ;;  %v1129_v25 = vadd.f32 1.0, %v4580_v21  ;;  %v1349_v21 = vld [vmem:[%s5825_s6 + $0x10] sm:$0xff] }
0x11ab   :  { %v1135_v26 = vadd.f32 1.0, %v4582_v23 }
0x11ac   :  { %4583 = vrcp.f32 %v1129_v25 }
0x11ad   :  { %4585 = vrcp.f32 %v1135_v26  ;;  %v1523_v26 = vld [vmem:[%s5826_s7] sm:$0xff] }
0x11b6   :  { %v4584_v27 = vpop.eup %4583 }
0x11b7   :  { %v4586_v30 = vpop.eup %4585  ;;  %v1143_v37 = vmul.f32 %v4584_v27, %v1141_v35 }
0x11b8   :  { %v1157_v38 = vmul.f32 %v4586_v30, %v1155_v36 }
0x121a   :  { %v1146_v29 = vpop.permute.xlu0 %1145 }
0x121b   :  { %v1160_v32 = vpop.permute.xlu1 %1159  ;;  %v1148_v33 = vmul.f32 %v4584_v27, %v1146_v29 }
0x121c   :  { %v1162_v34 = vmul.f32 %v4586_v30, %v1160_v32  ;;  %v1525_v32 = vld [vmem:[%s5826_s7 + $0x10] sm:$0xff] }
0x121d   :  { %1150 = vrot.lane.b32.xlu0 %v1148_v33, %s4763_s5  ;;  %v1526_v33 = vld [vmem:[%s5826_s7 + $0x18] sm:$0xff] }
0x121e   :  { %1164 = vrot.lane.b32.xlu1 %v1162_v34, %s4763_s5  ;;  %v5117_v36 = vpack.c.bf16 %v1526_v33, %v1525_v32 }
0x128f   :  { %v1151_v8 = vpop.permute.xlu0 %1150 }
0x1290   :  { %v1165_v39 = vpop.permute.xlu1 %1164  ;;  %v1153_v40 = vadd.f32 %v1151_v8, %v1143_v37 }
0x1291   :  { %v1167_v14 = vadd.f32 %v1165_v39, %v1157_v38 }
0x1292   :  { %4587 = vtanh.f32 %v1153_v40  ;;  %v1289_v11 = vrot.slane %v1153_v40, 6 }
0x1293   :  { %4589 = vtanh.f32 %v1167_v14  ;;  %v1303_v9 = vrot.slane %v1167_v14, 2 }
0x129c   :  { %v4588_v41 = vpop.eup %4587 }
0x129d   :  { %v4590_v42 = vpop.eup %4589  ;;  %1170 = vrot.lane.b32.xlu0 %v4588_v41, %s4763_s5 }
0x129e   :  { %1176 = vrot.lane.b32.xlu1 %v4590_v42, %s4763_s5 }
0x130f   :  { %v1171_v43 = vpop.permute.xlu0 %1170 }
0x1310   :  { %v1177_v44 = vpop.permute.xlu1 %1176  ;;  %v1173_v45 = vmul.f32 %v4584_v27, %v1171_v43  ;;  %v1524_v27 = vld [vmem:[%s5826_s7 + $0x8] sm:$0xff] }
0x1311   :  { %v1179_v47 = vmul.f32 %v4586_v30, %v1177_v44  ;;  %v5107_v29 = vpack.c.bf16 %v1524_v27, %v1523_v26 }
0x1312   :  { %1181 = vrot.lane.b32.xlu0 %v1173_v45, %s4764_s17  ;;  %v1343_v45 = vld [vmem:[#allocation3] sm:$0xff] }
0x1313   :  { %1186 = vrot.lane.b32.xlu1 %v1179_v47, %s4765_s18 }
0x1384   :  { %v1182_v48 = vpop.permute.xlu0 %1181 }
0x1385   :  { %v1187_v49 = vpop.permute.xlu1 %1186  ;;  %1184 = vst.msk [vmem:[#allocation2 - $0x4] sm:$0x30] %vm445_vm7, %v1182_v48  ;;  %1190 = vst.msk [vmem:[#allocation3 + $0x8] sm:$0x30] %vm445_vm7, %v1182_v48 }
0x1386   :  { %1189 = vst.msk [vmem:[#allocation2 - $0x2] sm:$0xc] %vm591_vm8, %v1187_v49 }
0x138d   :  { %v1195_v50 = vld [vmem:[#allocation2] sm:$0x3] }
0x138e   :  { %4224 = vmatmul.mubr.msk.f32.vlgmr.msra.gmra.mrb[8].mxu0 %vm61_vm0, %v1195_v50  ;;  %v3993_v50 = vld [vmem:[%s5827_s8] ss:$0 sm:$0xff] }
0x138f   :  { %4248 = vmatprep.mubr.msk.f32.mxu0 %vm4761_vm2, %v4760_v13  ;;  %4408 = vmatpush3.bf16.msra.mxu0 %v5107_v29 }
0x1390   :  { %4409 = vmatprep.subr.bf16.mxu0 %v4759_v4 }
0x1393   :  { %4411 = vmatpush3.bf16.msra.mxu0 %v5117_v36 }
0x1394   :  { %4418 = vmatprep.subr.bf16.mxu0 %v4759_v4 }
0x1461   :  { %v1265_v51 = vpop.f32.mrb[8].mxu0 }
0x1462   :  { %v1270_v53 = vrot.slane %v1265_v51, 2  ;;  %v1273_v54 = vadd.f32 %v1265_v51, %v4909_v24  ;;  %v4225_v55 = vpop.f32.mrb[9].mxu0 }
0x1464   :  { %v1272_v56 = vadd.f32 %v1270_v53, %v4907_v22  ;;  %4591 = vtanh.f32 %v1273_v54  ;;  %v3988_v59 = vmul.f32 -1.442695, %v1273_v54 }
0x1466   :  { %4593 = vtanh.f32 %v1272_v56  ;;  %v3987_v60 = vmul.f32 -1.442695, %v1272_v56 }
0x1467   :  { %4595 = vpow2.f32 %v3988_v59 }
0x1468   :  { %4597 = vpow2.f32 %v3987_v60 }
0x146e   :  { %v4592_v57 = vpop.eup %4591 }
0x146f   :  { %1307 = vrot.lane.b32.xlu0 %v4592_v57, %s4762_s16 }
0x1470   :  { %v4594_v58 = vpop.eup %4593 }
0x1471   :  { %1293 = vrot.lane.b32.xlu1 %v4594_v58, %s4762_s16  ;;  %v4596_v61 = vpop.eup %4595 }
0x1472   :  { %v4598_v62 = vpop.eup %4597  ;;  %v1283_v63 = vadd.f32 1.0, %v4596_v61 }
0x1473   :  { %v1277_v0 = vadd.f32 1.0, %v4598_v62 }
0x1474   :  { %4599 = vrcp.f32 %v1283_v63 }
0x1475   :  { %4601 = vrcp.f32 %v1277_v0 }
0x147e   :  { %v4600_v24 = vpop.eup %4599 }
0x147f   :  { %v4602_v3 = vpop.eup %4601  ;;  %v1305_v10 = vmul.f32 %v4600_v24, %v1303_v9 }
0x1480   :  { %v1291_v16 = vmul.f32 %v4602_v3, %v1289_v11 }
0x14e1   :  { %v1308_v22 = vpop.permute.xlu0 %1307 }
0x14e2   :  { %v1310_v1 = vmul.f32 %v4600_v24, %v1308_v22 }
0x14e3   :  { %v1294_v5 = vpop.permute.xlu1 %1293 }
0x14e4   :  { %1312 = vrot.lane.b32.xlu0 %v1310_v1, %s4763_s5  ;;  %v1296_v7 = vmul.f32 %v4602_v3, %v1294_v5 }
0x14e6   :  { %1298 = vrot.lane.b32.xlu1 %v1296_v7, %s4763_s5 }
0x1556   :  { %v1313_v12 = vpop.permute.xlu0 %1312 }
0x1557   :  { %v1315_v15 = vadd.f32 %v1313_v12, %v1305_v10 }
0x1558   :  { %v1299_v17 = vpop.permute.xlu1 %1298 }
0x1559   :  { %4603 = vtanh.f32 %v1315_v15  ;;  %v1301_v18 = vadd.f32 %v1299_v17, %v1291_v16 }
0x155b   :  { %4605 = vtanh.f32 %v1301_v18 }
0x1563   :  { %v4604_v19 = vpop.eup %4603 }
0x1564   :  { %1324 = vrot.lane.b32.xlu0 %v4604_v19, %s4763_s5 }
0x1565   :  { %v4606_v20 = vpop.eup %4605 }
0x1566   :  { %1318 = vrot.lane.b32.xlu1 %v4606_v20, %s4763_s5 }
0x1568   :  { %891 = vrot.lane.b32.xlu0 %v5023_v28, %s4766_s19  ;;  %v1350_v28 = vld [vmem:[%s5825_s6 + $0x18] sm:$0xff] }
0x156a   :  { %1041 = vrot.lane.b32.xlu1 %v5045_v2, %s4766_s19  ;;  %v4398_v2 = vpack.c.bf16 %v1350_v28, %v1349_v21 }
0x156c   :  { %1191 = vrot.lane.b32.xlu0 %v1179_v47, %s4766_s19  ;;  %4399 = vmatprep.subr.bf16.mxu1 %v4398_v2 }
0x156d   :  { %4401 = vmatpush3.bf16.msra.mxu1 %v4398_v2 }
0x156e   :  { %442 = vrot.lane.b32.xlu1 %v4946_v31, %s4766_s19  ;;  %v1347_v31 = vld [vmem:[%s5825_s6] sm:$0xff] }
0x1570   :  { %289 = vrot.lane.b32.xlu0 %v4923_v52, %s4766_s19  ;;  %v1348_v52 = vld [vmem:[%s5825_s6 + $0x8] sm:$0xff] }
0x1571   :  { %v4402_v23 = vpack.c.bf16 %v1348_v52, %v1347_v31 }
0x1573   :  { %4403 = vmatprep.subr.bf16.mxu1 %v4402_v23 }
0x1574   :  { %594 = vrot.lane.b32.xlu0 %v4972_v6, %s4766_s19 }
0x15d6   :  { %v1325_v6 = vpop.permute.xlu0 %1324 }
0x15d7   :  { %v1327_v25 = vmul.f32 %v4600_v24, %v1325_v6 }
0x15d8   :  { %v1319_v30 = vpop.permute.xlu1 %1318 }
0x15d9   :  { %1339 = vrot.lane.b32.xlu1 %v1327_v25, %s4766_s19  ;;  %v1321_v34 = vmul.f32 %v4602_v3, %v1319_v30 }
0x15da   :  { %v892_v35 = vpop.permute.xlu0 %891 }
0x15db   :  { %894 = vst.msk [vmem:[#allocation4] sm:$0xc0] %vm292_vm9, %v892_v35  ;;  %1329 = vrot.lane.b32.xlu0 %v1321_v34, %s4764_s17 }
0x15dc   :  { %v1042_v37 = vpop.permute.xlu1 %1041 }
0x15dd   :  { %743 = vrot.lane.b32.xlu1 %v4999_v46, %s4766_s19  ;;  %1044 = vst.msk [vmem:[#allocation4] sm:$0x30] %vm445_vm7, %v1042_v37 }
0x15de   :  { %v1192_v38 = vpop.permute.xlu0 %1191 }
0x15df   :  { %1194 = vst.msk [vmem:[#allocation4] sm:$0xc] %vm433_vm5, %v1192_v38 }
0x15e0   :  { %v443_v8 = vpop.permute.xlu1 %442 }
0x15e1   :  { %1334 = vrot.lane.b32.xlu1 %v1327_v25, %s4765_s18  ;;  %446 = vst.msk [vmem:[#allocation4 + $0x8] sm:$0x30] %vm445_vm7, %v443_v8 }
0x15e2   :  { %v290_v39 = vpop.permute.xlu0 %289 }
0x15e3   :  { %293 = vst.msk [vmem:[#allocation4 + $0x8] sm:$0xc0] %vm292_vm9, %v290_v39 }
0x15e6   :  { %v595_v40 = vpop.permute.xlu0 %594 }
0x15e7   :  { %597 = vst.msk [vmem:[#allocation4 + $0x8] sm:$0xc] %vm433_vm5, %v595_v40 }
0x164b   :  { %v1340_v46 = vpop.permute.xlu1 %1339 }
0x164c   :  { %1342 = vst.msk [vmem:[#allocation4] sm:$0x3] %vm280_vm3, %v1340_v46 }
0x164d   :  { %v1330_v14 = vpop.permute.xlu0 %1329 }
0x164e   :  { %1332 = vst.msk [vmem:[#allocation2 - $0x6] sm:$0xc0] %vm292_vm9, %v1330_v14  ;;  %1338 = vst.msk [vmem:[#allocation3 + $0x8] sm:$0xc0] %vm292_vm9, %v1330_v14 }
0x164f   :  { %v744_v41 = vpop.permute.xlu1 %743 }
0x1650   :  { %746 = vst.msk [vmem:[#allocation4 + $0x8] sm:$0x3] %vm280_vm3, %v744_v41 }
0x1653   :  { %v1335_v42 = vpop.permute.xlu1 %1334  ;;  %v1345_v43 = vld [vmem:[#allocation4] sm:$0xff] }
0x1654   :  { %1337 = vst.msk [vmem:[#allocation2] sm:$0x3] %vm740_vm10, %v1335_v42  ;;  %4230 = vmatprep.mubr.msk.f32.mxu1 %vm1351_vm11, %v1345_v43 }
0x1655   :  { %1527 = vst.msk [vmem:[#allocation2] sm:$0x3] %vm147_vm1, %v4760_v13  ;;  %v1344_v48 = vld [vmem:[#allocation3 + $0x8] sm:$0xff] }
0x1657   :  { %v1346_v44 = vld [vmem:[#allocation4 + $0x8] sm:$0xff] }
0x1658   :  { %4231 = vmatmul.mubr.msk.f32.vlgmr.msra.gmra.mrb[8].mxu1 %vm1351_vm11, %v1346_v44 }
0x1659   :  { %4405 = vmatpush3.bf16.msra.mxu1 %v4402_v23  ;;  %4237 = vmatprep.mubr.msk.f32.mxu1 %vm1351_vm11, %v1343_v45 }
0x165a   :  { %4412 = vmatprep.subr.bf16.mxu1 %v4759_v4 }
0x165c   :  { %v1528_v47 = vld [vmem:[#allocation2] sm:$0x3] }
0x165d   :  { %4249 = vmatmul.mubr.msk.f32.vlgmr.msra.gmra.mrb[10].mxu0 %vm61_vm0, %v1528_v47 }
0x165e   :  { %4420 = vmatpush3.bf16.msra.mxu0 %v5107_v29  ;;  %4270 = vmatprep.mubr.msk.f32.mxu0 %vm4761_vm2, %v4760_v13 }
0x165f   :  { %4421 = vmatprep.subr.bf16.mxu0 %v4759_v4 }
0x1660   :  { %4238 = vmatmul.mubr.msk.f32.vlgmr.msra.gmra.mrb[8].mxu1 %vm1351_vm11, %v1344_v48 }
0x1661   :  { %4414 = vmatpush3.bf16.msra.mxu1 %v5107_v29  ;;  %4259 = vmatprep.mubr.msk.f32.mxu1 %vm4761_vm2, %v4760_v13 }
0x1662   :  { %4415 = vmatprep.subr.bf16.mxu1 %v4759_v4  ;;  %4423 = vmatpush3.bf16.msra.mxu0 %v5117_v36 }
0x1663   :  { %4430 = vmatprep.subr.bf16.mxu0 %v4759_v4 }
0x1665   :  { %4417 = vmatpush3.bf16.msra.mxu1 %v5117_v36 }
0x1666   :  { %4424 = vmatprep.subr.bf16.mxu1 %v4759_v4 }
0x1730   :  { %v1598_v49 = vpop.f32.mrb[10].mxu0 }
0x1731   :  { %v4250_v51 = vpop.f32.mrb[11].mxu0  ;;  %v1604_v53 = vrot.slane %v1598_v49, 2 }
0x1733   :  { %v4239_v54 = vpop.f32.mrb[8].mxu1 }
0x1734   :  { %v5160_v55 = vadd.f32 %v4239_v54, %v3993_v50  ;;  %v1505_v56 = vpop.f32.mrb[9].mxu1 }
0x1735   :  { %v5162_v57 = vadd.f32 %v3993_v50, %v1505_v56 }
0x1736   :  { %v1606_v58 = vadd.f32 %v1604_v53, %v5160_v55 }
0x1737   :  { %v1602_v59 = vadd.f32 %v1598_v49, %v5162_v57 }
0x1738   :  { %4607 = vtanh.f32 %v1606_v58  ;;  %v3996_v62 = vmul.f32 -1.442695, %v1606_v58 }
0x1739   :  { %4609 = vtanh.f32 %v1602_v59  ;;  %v3995_v63 = vmul.f32 -1.442695, %v1602_v59 }
0x173a   :  { %4611 = vpow2.f32 %v3996_v62 }
0x173b   :  { %4613 = vpow2.f32 %v3995_v63 }
0x1742   :  { %v4608_v60 = vpop.eup %4607 }
0x1743   :  { %v4610_v61 = vpop.eup %4609  ;;  %1634 = vrot.lane.b32.xlu1 %v4608_v60, %s4762_s16 }
0x1744   :  { %1623 = vrot.lane.b32.xlu0 %v4610_v61, %s4762_s16  ;;  %v4612_v0 = vpop.eup %4611 }
0x1745   :  { %v4614_v24 = vpop.eup %4613  ;;  %v1616_v22 = vadd.f32 1.0, %v4612_v0 }
0x1746   :  { %v1610_v1 = vadd.f32 1.0, %v4614_v24 }
0x1747   :  { %4615 = vrcp.f32 %v1616_v22 }
0x1748   :  { %4617 = vrcp.f32 %v1610_v1 }
0x1751   :  { %v4616_v3 = vpop.eup %4615 }
0x1752   :  { %v4618_v7 = vpop.eup %4617  ;;  %v1632_v12 = vmul.f32 0.0, %v4616_v3 }
0x1753   :  { %v1621_v16 = vmul.f32 0.0, %v4618_v7 }
0x17b5   :  { %v1635_v5 = vpop.permute.xlu1 %1634 }
0x17b6   :  { %v1637_v9 = vmul.f32 %v4616_v3, %v1635_v5  ;;  %v1624_v10 = vpop.permute.xlu0 %1623 }
0x17b7   :  { %v1626_v11 = vmul.f32 %v4618_v7, %v1624_v10 }
0x17b8   :  { %1639 = vrot.lane.b32.xlu1 %v1637_v9, %s4763_s5 }
0x17b9   :  { %1628 = vrot.lane.b32.xlu0 %v1626_v11, %s4763_s5 }
0x182a   :  { %v1640_v15 = vpop.permute.xlu1 %1639 }
0x182b   :  { %v1642_v17 = vadd.f32 %v1640_v15, %v1632_v12  ;;  %v1629_v18 = vpop.permute.xlu0 %1628 }
0x182c   :  { %v1631_v19 = vadd.f32 %v1629_v18, %v1621_v16 }
0x182d   :  { %4619 = vtanh.f32 %v1642_v17  ;;  %v1780_v49 = vrot.slane %v1642_v17, 2 }
0x182e   :  { %4621 = vtanh.f32 %v1631_v19  ;;  %v1766_v48 = vrot.slane %v1631_v19, 6 }
0x1837   :  { %v4620_v20 = vpop.eup %4619 }
0x1838   :  { %v4622_v21 = vpop.eup %4621  ;;  %1651 = vrot.lane.b32.xlu1 %v4620_v20, %s4763_s5 }
0x1839   :  { %1645 = vrot.lane.b32.xlu0 %v4622_v21, %s4763_s5 }
0x18aa   :  { %v1652_v28 = vpop.permute.xlu1 %1651 }
0x18ab   :  { %v5172_v2 = vmul.f32 %v4616_v3, %v1652_v28  ;;  %v1646_v31 = vpop.permute.xlu0 %1645 }
0x18ac   :  { %v1648_v52 = vmul.f32 %v4618_v7, %v1646_v31 }
0x18ad   :  { %1661 = vrot.lane.b32.xlu1 %v5172_v2, %s4765_s18 }
0x18ae   :  { %1656 = vrot.lane.b32.xlu0 %v1648_v52, %s4764_s17 }
0x191f   :  { %v1662_v23 = vpop.permute.xlu1 %1661 }
0x1920   :  { %v1657_v6 = vpop.permute.xlu0 %1656 }
0x1921   :  { %1659 = vst.msk [vmem:[#allocation2] sm:$0x3] %vm280_vm3, %v1657_v6  ;;  %1665 = vst.msk [vmem:[#allocation3] sm:$0x3] %vm280_vm3, %v1657_v6 }
0x1922   :  { %1664 = vst.msk [vmem:[#allocation2 - $0x6] sm:$0xc0] %vm286_vm4, %v1662_v23 }
0x1929   :  { %v1670_v25 = vld [vmem:[#allocation2] sm:$0x3] }
0x192a   :  { %4260 = vmatmul.mubr.msk.f32.vlgmr.msra.gmra.mrb[10].mxu1 %vm61_vm0, %v1670_v25 }
0x192b   :  { %4426 = vmatpush3.bf16.msra.mxu1 %v5107_v29  ;;  %4281 = vmatprep.mubr.msk.f32.mxu1 %vm4761_vm2, %v4760_v13 }
0x192c   :  { %4427 = vmatprep.subr.bf16.mxu1 %v4759_v4 }
0x192f   :  { %4429 = vmatpush3.bf16.msra.mxu1 %v5117_v36 }
0x1930   :  { %4436 = vmatprep.subr.bf16.mxu1 %v4759_v4 }
0x19fd   :  { %v1740_v26 = vpop.f32.mrb[10].mxu1 }
0x19fe   :  { %v1745_v27 = vrot.slane %v1740_v26, 6  ;;  %v1748_v30 = vrot.slane %v1740_v26, 4  ;;  %v4261_v32 = vpop.f32.mrb[11].mxu1 }
0x1a00   :  { %v1747_v33 = vadd.f32 %v1745_v27, %v5162_v57  ;;  %v1750_v34 = vadd.f32 %v1748_v30, %v5160_v55 }
0x1a02   :  { %4623 = vtanh.f32 %v1747_v33  ;;  %v3998_v38 = vmul.f32 -1.442695, %v1747_v33  ;;  %v3999_v8 = vmul.f32 -1.442695, %v1750_v34 }
0x1a03   :  { %4625 = vtanh.f32 %v1750_v34 }
0x1a04   :  { %4627 = vpow2.f32 %v3998_v38 }
0x1a05   :  { %4629 = vpow2.f32 %v3999_v8 }
0x1a0c   :  { %v4624_v35 = vpop.eup %4623 }
0x1a0d   :  { %v4626_v37 = vpop.eup %4625  ;;  %1770 = vrot.lane.b32.xlu0 %v4624_v35, %s4762_s16 }
0x1a0e   :  { %1784 = vrot.lane.b32.xlu1 %v4626_v37, %s4762_s16  ;;  %v4628_v39 = vpop.eup %4627 }
0x1a0f   :  { %v4630_v40 = vpop.eup %4629  ;;  %v1754_v46 = vadd.f32 1.0, %v4628_v39 }
0x1a10   :  { %v1760_v14 = vadd.f32 1.0, %v4630_v40 }
0x1a11   :  { %4631 = vrcp.f32 %v1754_v46 }
0x1a12   :  { %4633 = vrcp.f32 %v1760_v14 }
0x1a1b   :  { %v4632_v41 = vpop.eup %4631 }
0x1a1c   :  { %v4634_v43 = vpop.eup %4633  ;;  %v1768_v50 = vmul.f32 %v4632_v41, %v1766_v48 }
0x1a1d   :  { %v1782_v51 = vmul.f32 %v4634_v43, %v1780_v49 }
0x1a7f   :  { %v1771_v42 = vpop.permute.xlu0 %1770 }
0x1a80   :  { %v1785_v44 = vpop.permute.xlu1 %1784  ;;  %v1773_v45 = vmul.f32 %v4632_v41, %v1771_v42 }
0x1a81   :  { %v1787_v47 = vmul.f32 %v4634_v43, %v1785_v44 }
0x1a82   :  { %1775 = vrot.lane.b32.xlu0 %v1773_v45, %s4763_s5 }
0x1a83   :  { %1789 = vrot.lane.b32.xlu1 %v1787_v47, %s4763_s5 }
0x1af4   :  { %v1776_v53 = vpop.permute.xlu0 %1775 }
0x1af5   :  { %v1790_v54 = vpop.permute.xlu1 %1789  ;;  %v1778_v56 = vadd.f32 %v1776_v53, %v1768_v50 }
0x1af6   :  { %v1792_v58 = vadd.f32 %v1790_v54, %v1782_v51 }
0x1af7   :  { %4635 = vtanh.f32 %v1778_v56  ;;  %v1916_v26 = vrot.slane %v1778_v56, 6 }
0x1af8   :  { %4637 = vtanh.f32 %v1792_v58  ;;  %v1930_v27 = vrot.slane %v1792_v58, 2 }
0x1b01   :  { %v4636_v59 = vpop.eup %4635 }
0x1b02   :  { %v4638_v60 = vpop.eup %4637  ;;  %1795 = vrot.lane.b32.xlu0 %v4636_v59, %s4763_s5 }
0x1b03   :  { %1801 = vrot.lane.b32.xlu1 %v4638_v60, %s4763_s5 }
0x1b74   :  { %v1796_v61 = vpop.permute.xlu0 %1795 }
0x1b75   :  { %v1802_v62 = vpop.permute.xlu1 %1801  ;;  %v1798_v63 = vmul.f32 %v4632_v41, %v1796_v61 }
0x1b76   :  { %v5195_v0 = vmul.f32 %v4634_v43, %v1802_v62 }
0x1b77   :  { %1806 = vrot.lane.b32.xlu0 %v1798_v63, %s4764_s17 }
0x1b78   :  { %1811 = vrot.lane.b32.xlu1 %v5195_v0, %s4765_s18 }
0x1be9   :  { %v1807_v24 = vpop.permute.xlu0 %1806 }
0x1bea   :  { %v1812_v22 = vpop.permute.xlu1 %1811  ;;  %1809 = vst.msk [vmem:[#allocation2 - $0x2] sm:$0xc] %vm433_vm5, %v1807_v24  ;;  %1815 = vst.msk [vmem:[#allocation3] sm:$0xc] %vm433_vm5, %v1807_v24 }
0x1beb   :  { %1814 = vst.msk [vmem:[#allocation2 - $0x4] sm:$0x30] %vm439_vm6, %v1812_v22 }
0x1bf2   :  { %v1820_v1 = vld [vmem:[#allocation2] sm:$0x3] }
0x1bf3   :  { %4271 = vmatmul.mubr.msk.f32.vlgmr.msra.gmra.mrb[12].mxu0 %vm61_vm0, %v1820_v1 }
0x1bf4   :  { %4432 = vmatpush3.bf16.msra.mxu0 %v5107_v29  ;;  %4292 = vmatprep.mubr.msk.f32.mxu0 %vm4761_vm2, %v4760_v13 }
0x1bf5   :  { %4433 = vmatprep.subr.bf16.mxu0 %v4759_v4 }
0x1bf8   :  { %4435 = vmatpush3.bf16.msra.mxu0 %v5117_v36 }
0x1bf9   :  { %4442 = vmatprep.subr.bf16.mxu0 %v4759_v4 }
0x1cc6   :  { %v1890_v3 = vpop.f32.mrb[12].mxu0 }
0x1cc7   :  { %v1895_v5 = vrot.slane %v1890_v3, 4  ;;  %v1898_v7 = vrot.slane %v1890_v3, 6  ;;  %v4272_v9 = vpop.f32.mrb[13].mxu0 }
0x1cc9   :  { %v1897_v10 = vadd.f32 %v1895_v5, %v5162_v57  ;;  %v1900_v11 = vadd.f32 %v1898_v7, %v5160_v55 }
0x1ccb   :  { %4639 = vtanh.f32 %v1897_v10  ;;  %v4001_v16 = vmul.f32 -1.442695, %v1897_v10  ;;  %v4002_v17 = vmul.f32 -1.442695, %v1900_v11 }
0x1ccc   :  { %4641 = vtanh.f32 %v1900_v11 }
0x1ccd   :  { %4643 = vpow2.f32 %v4001_v16 }
0x1cce   :  { %4645 = vpow2.f32 %v4002_v17 }
0x1cd5   :  { %v4640_v12 = vpop.eup %4639 }
0x1cd6   :  { %v4642_v15 = vpop.eup %4641  ;;  %1920 = vrot.lane.b32.xlu0 %v4640_v12, %s4762_s16 }
0x1cd7   :  { %1934 = vrot.lane.b32.xlu1 %v4642_v15, %s4762_s16  ;;  %v4644_v18 = vpop.eup %4643 }
0x1cd8   :  { %v4646_v19 = vpop.eup %4645  ;;  %v1904_v20 = vadd.f32 1.0, %v4644_v18 }
0x1cd9   :  { %v1910_v21 = vadd.f32 1.0, %v4646_v19 }
0x1cda   :  { %4647 = vrcp.f32 %v1904_v20 }
0x1cdb   :  { %4649 = vrcp.f32 %v1910_v21 }
0x1ce4   :  { %v4648_v28 = vpop.eup %4647 }
0x1ce5   :  { %v4650_v52 = vpop.eup %4649  ;;  %v1918_v30 = vmul.f32 %v4648_v28, %v1916_v26 }
0x1ce6   :  { %v1932_v32 = vmul.f32 %v4650_v52, %v1930_v27 }
0x1d48   :  { %v1921_v31 = vpop.permute.xlu0 %1920 }
0x1d49   :  { %v1935_v6 = vpop.permute.xlu1 %1934  ;;  %v1923_v23 = vmul.f32 %v4648_v28, %v1921_v31 }
0x1d4a   :  { %v1937_v25 = vmul.f32 %v4650_v52, %v1935_v6 }
0x1d4b   :  { %1925 = vrot.lane.b32.xlu0 %v1923_v23, %s4763_s5 }
0x1d4c   :  { %1939 = vrot.lane.b32.xlu1 %v1937_v25, %s4763_s5 }
0x1dbd   :  { %v1926_v33 = vpop.permute.xlu0 %1925 }
0x1dbe   :  { %v1940_v34 = vpop.permute.xlu1 %1939  ;;  %v1928_v35 = vadd.f32 %v1926_v33, %v1918_v30 }
0x1dbf   :  { %v1942_v37 = vadd.f32 %v1940_v34, %v1932_v32 }
0x1dc0   :  { %4651 = vtanh.f32 %v1928_v35  ;;  %v2064_v7 = vrot.slane %v1928_v35, 6 }
0x1dc1   :  { %4653 = vtanh.f32 %v1942_v37  ;;  %v2078_v3 = vrot.slane %v1942_v37, 2 }
0x1dca   :  { %v4652_v38 = vpop.eup %4651 }
0x1dcb   :  { %v4654_v8 = vpop.eup %4653  ;;  %1945 = vrot.lane.b32.xlu0 %v4652_v38, %s4763_s5 }
0x1dcc   :  { %1951 = vrot.lane.b32.xlu1 %v4654_v8, %s4763_s5 }
0x1e3d   :  { %v1946_v39 = vpop.permute.xlu0 %1945 }
0x1e3e   :  { %v1952_v40 = vpop.permute.xlu1 %1951  ;;  %v1948_v46 = vmul.f32 %v4648_v28, %v1946_v39 }
0x1e3f   :  { %v5218_v14 = vmul.f32 %v4650_v52, %v1952_v40 }
0x1e40   :  { %1956 = vrot.lane.b32.xlu0 %v1948_v46, %s4764_s17 }
0x1e41   :  { %1961 = vrot.lane.b32.xlu1 %v5218_v14, %s4765_s18 }
0x1eb2   :  { %v1957_v41 = vpop.permute.xlu0 %1956 }
0x1eb3   :  { %v1962_v42 = vpop.permute.xlu1 %1961  ;;  %1959 = vst.msk [vmem:[#allocation2 - $0x4] sm:$0x30] %vm445_vm7, %v1957_v41  ;;  %1965 = vst.msk [vmem:[#allocation3] sm:$0x30] %vm445_vm7, %v1957_v41 }
0x1eb4   :  { %1964 = vst.msk [vmem:[#allocation2 - $0x2] sm:$0xc] %vm591_vm8, %v1962_v42 }
0x1ebb   :  { %v1970_v43 = vld [vmem:[#allocation2] sm:$0x3] }
0x1ebc   :  { %4282 = vmatmul.mubr.msk.f32.vlgmr.msra.gmra.mrb[12].mxu1 %vm61_vm0, %v1970_v43 }
0x1ebd   :  { %4438 = vmatpush3.bf16.msra.mxu1 %v5107_v29  ;;  %4303 = vmatprep.mubr.msk.f32.mxu1 %vm4761_vm2, %v4760_v13 }
0x1ebe   :  { %4439 = vmatprep.subr.bf16.mxu1 %v4759_v4 }
0x1ec1   :  { %4441 = vmatpush3.bf16.msra.mxu1 %v5117_v36 }
0x1ec2   :  { %4448 = vmatprep.subr.bf16.mxu1 %v4759_v4 }
0x1f8f   :  { %v2040_v44 = vpop.f32.mrb[12].mxu1 }
0x1f90   :  { %v2045_v45 = vrot.slane %v2040_v44, 2  ;;  %v2048_v47 = vadd.f32 %v2040_v44, %v5160_v55  ;;  %v4283_v48 = vpop.f32.mrb[13].mxu1 }
0x1f92   :  { %v2047_v49 = vadd.f32 %v2045_v45, %v5162_v57  ;;  %4655 = vtanh.f32 %v2048_v47  ;;  %v4005_v53 = vmul.f32 -1.442695, %v2048_v47 }
0x1f94   :  { %4657 = vtanh.f32 %v2047_v49  ;;  %v4004_v54 = vmul.f32 -1.442695, %v2047_v49 }
0x1f95   :  { %4659 = vpow2.f32 %v4005_v53 }
0x1f96   :  { %4661 = vpow2.f32 %v4004_v54 }
0x1f9c   :  { %v4656_v50 = vpop.eup %4655 }
0x1f9d   :  { %2082 = vrot.lane.b32.xlu1 %v4656_v50, %s4762_s16 }
0x1f9e   :  { %v4658_v51 = vpop.eup %4657 }
0x1f9f   :  { %2068 = vrot.lane.b32.xlu0 %v4658_v51, %s4762_s16  ;;  %v4660_v56 = vpop.eup %4659 }
0x1fa0   :  { %v4662_v58 = vpop.eup %4661  ;;  %v2058_v59 = vadd.f32 1.0, %v4660_v56 }
0x1fa1   :  { %v2052_v60 = vadd.f32 1.0, %v4662_v58 }
0x1fa2   :  { %4663 = vrcp.f32 %v2058_v59 }
0x1fa3   :  { %4665 = vrcp.f32 %v2052_v60 }
0x1fac   :  { %v4664_v61 = vpop.eup %4663 }
0x1fad   :  { %v4666_v24 = vpop.eup %4665  ;;  %v2080_v5 = vmul.f32 %v4664_v61, %v2078_v3 }
0x1fae   :  { %v2066_v11 = vmul.f32 %v4666_v24, %v2064_v7 }
0x200f   :  { %v2083_v62 = vpop.permute.xlu1 %2082 }
0x2010   :  { %v2085_v63 = vmul.f32 %v4664_v61, %v2083_v62 }
0x2011   :  { %v2069_v22 = vpop.permute.xlu0 %2068 }
0x2012   :  { %2087 = vrot.lane.b32.xlu1 %v2085_v63, %s4763_s5  ;;  %v2071_v1 = vmul.f32 %v4666_v24, %v2069_v22 }
0x2014   :  { %2073 = vrot.lane.b32.xlu0 %v2071_v1, %s4763_s5 }
0x2084   :  { %v2088_v9 = vpop.permute.xlu1 %2087 }
0x2085   :  { %v2090_v10 = vadd.f32 %v2088_v9, %v2080_v5 }
0x2086   :  { %v2074_v12 = vpop.permute.xlu0 %2073 }
0x2087   :  { %4667 = vtanh.f32 %v2090_v10  ;;  %v2076_v15 = vadd.f32 %v2074_v12, %v2066_v11  ;;  %v2226_v47 = vrot.slane %v2090_v10, 2 }
0x2089   :  { %4669 = vtanh.f32 %v2076_v15  ;;  %v2212_v44 = vrot.slane %v2076_v15, 6 }
0x2091   :  { %v4668_v16 = vpop.eup %4667 }
0x2092   :  { %2099 = vrot.lane.b32.xlu1 %v4668_v16, %s4763_s5 }
0x2093   :  { %v4670_v17 = vpop.eup %4669 }
0x2094   :  { %2093 = vrot.lane.b32.xlu0 %v4670_v17, %s4763_s5 }
0x2104   :  { %v2100_v18 = vpop.permute.xlu1 %2099 }
0x2105   :  { %v5241_v19 = vmul.f32 %v4664_v61, %v2100_v18 }
0x2106   :  { %v2094_v20 = vpop.permute.xlu0 %2093 }
0x2107   :  { %2109 = vrot.lane.b32.xlu1 %v5241_v19, %s4765_s18  ;;  %v2096_v21 = vmul.f32 %v4666_v24, %v2094_v20 }
0x2109   :  { %2104 = vrot.lane.b32.xlu0 %v2096_v21, %s4764_s17 }
0x2179   :  { %v2110_v31 = vpop.permute.xlu1 %2109 }
0x217b   :  { %v2105_v28 = vpop.permute.xlu0 %2104 }
0x217c   :  { %2107 = vst.msk [vmem:[#allocation2 - $0x6] sm:$0xc0] %vm292_vm9, %v2105_v28  ;;  %2113 = vst.msk [vmem:[#allocation3] sm:$0xc0] %vm292_vm9, %v2105_v28 }
0x217d   :  { %2112 = vst.msk [vmem:[#allocation2] sm:$0x3] %vm740_vm10, %v2110_v31 }
0x2184   :  { %v2118_v52 = vld [vmem:[#allocation2] sm:$0x3] }
0x2185   :  { %4293 = vmatmul.mubr.msk.f32.vlgmr.msra.gmra.mrb[14].mxu0 %vm61_vm0, %v2118_v52 }
0x2186   :  { %4444 = vmatpush3.bf16.msra.mxu0 %v5107_v29  ;;  %4314 = vmatprep.mubr.msk.f32.mxu0 %vm4761_vm2, %v4760_v13 }
0x2187   :  { %4445 = vmatprep.subr.bf16.mxu0 %v4759_v4 }
0x218a   :  { %4447 = vmatpush3.bf16.msra.mxu0 %v5117_v36 }
0x2258   :  { %v2188_v6 = vpop.f32.mrb[14].mxu0 }
0x2259   :  { %v2192_v23 = vadd.f32 %v2188_v6, %v5160_v55  ;;  %v2194_v25 = vrot.slane %v2188_v6, 2  ;;  %v4294_v26 = vpop.f32.mrb[15].mxu0 }
0x225b   :  { %v2196_v27 = vadd.f32 %v2194_v25, %v5162_v57  ;;  %4671 = vtanh.f32 %v2192_v23  ;;  %v4007_v33 = vmul.f32 -1.442695, %v2192_v23 }
0x225d   :  { %4673 = vtanh.f32 %v2196_v27  ;;  %v4008_v34 = vmul.f32 -1.442695, %v2196_v27 }
0x225e   :  { %4675 = vpow2.f32 %v4007_v33 }
0x225f   :  { %4677 = vpow2.f32 %v4008_v34 }
0x2265   :  { %v4672_v30 = vpop.eup %4671 }
0x2266   :  { %2216 = vrot.lane.b32.xlu0 %v4672_v30, %s4762_s16 }
0x2267   :  { %v4674_v32 = vpop.eup %4673 }
0x2268   :  { %2230 = vrot.lane.b32.xlu1 %v4674_v32, %s4762_s16  ;;  %v4676_v35 = vpop.eup %4675 }
0x2269   :  { %v4678_v37 = vpop.eup %4677  ;;  %v2200_v38 = vadd.f32 1.0, %v4676_v35 }
0x226a   :  { %v2206_v8 = vadd.f32 1.0, %v4678_v37 }
0x226b   :  { %4679 = vrcp.f32 %v2200_v38 }
0x226c   :  { %4681 = vrcp.f32 %v2206_v8 }
0x2275   :  { %v4680_v39 = vpop.eup %4679 }
0x2276   :  { %v4682_v41 = vpop.eup %4681  ;;  %v2214_v45 = vmul.f32 %v4680_v39, %v2212_v44 }
0x2277   :  { %v2228_v50 = vmul.f32 %v4682_v41, %v2226_v47 }
0x22d8   :  { %v2217_v40 = vpop.permute.xlu0 %2216 }
0x22d9   :  { %v2219_v46 = vmul.f32 %v4680_v39, %v2217_v40 }
0x22da   :  { %v2231_v42 = vpop.permute.xlu1 %2230 }
0x22db   :  { %2221 = vrot.lane.b32.xlu0 %v2219_v46, %s4763_s5  ;;  %v2233_v43 = vmul.f32 %v4682_v41, %v2231_v42  ;;  %v2714_v46 = vld [vmem:[#allocation3] sm:$0xff] }
0x22dd   :  { %2235 = vrot.lane.b32.xlu1 %v2233_v43, %s4763_s5 }
0x234d   :  { %v2222_v48 = vpop.permute.xlu0 %2221 }
0x234e   :  { %v2224_v49 = vadd.f32 %v2222_v48, %v2214_v45 }
0x234f   :  { %v2236_v51 = vpop.permute.xlu1 %2235 }
0x2350   :  { %4683 = vtanh.f32 %v2224_v49  ;;  %v2238_v53 = vadd.f32 %v2236_v51, %v2228_v50  ;;  %v2362_v31 = vrot.slane %v2224_v49, 6 }
0x2352   :  { %4685 = vtanh.f32 %v2238_v53  ;;  %v2376_v52 = vrot.slane %v2238_v53, 2 }
0x235a   :  { %v4684_v54 = vpop.eup %4683 }
0x235b   :  { %2241 = vrot.lane.b32.xlu0 %v4684_v54, %s4763_s5 }
0x235c   :  { %v4686_v56 = vpop.eup %4685 }
0x235d   :  { %2247 = vrot.lane.b32.xlu1 %v4686_v56, %s4763_s5 }
0x23cd   :  { %v2242_v58 = vpop.permute.xlu0 %2241 }
0x23ce   :  { %v2244_v59 = vmul.f32 %v4680_v39, %v2242_v58 }
0x23cf   :  { %v2248_v60 = vpop.permute.xlu1 %2247 }
0x23d0   :  { %2252 = vrot.lane.b32.xlu0 %v2244_v59, %s4764_s17  ;;  %v5264_v61 = vmul.f32 %v4682_v41, %v2248_v60 }
0x23d2   :  { %2257 = vrot.lane.b32.xlu1 %v5264_v61, %s4765_s18 }
0x2442   :  { %v2253_v62 = vpop.permute.xlu0 %2252 }
0x2443   :  { %2255 = vst.msk [vmem:[#allocation2] sm:$0x3] %vm280_vm3, %v2253_v62  ;;  %2261 = vst.msk [vmem:[#allocation3 + $0x8] sm:$0x3] %vm280_vm3, %v2253_v62 }
0x2444   :  { %v2258_v63 = vpop.permute.xlu1 %2257 }
0x2445   :  { %2260 = vst.msk [vmem:[#allocation2 - $0x6] sm:$0xc0] %vm286_vm4, %v2258_v63 }
0x244c   :  { %v2266_v24 = vld [vmem:[#allocation2] sm:$0x3] }
0x244d   :  { %4304 = vmatmul.mubr.msk.f32.vlgmr.msra.gmra.mrb[14].mxu1 %vm61_vm0, %v2266_v24 }
0x244e   :  { %4450 = vmatpush3.bf16.msra.mxu1 %v5107_v29  ;;  %4325 = vmatprep.mubr.msk.f32.mxu1 %vm4761_vm2, %v4760_v13  ;;  %vm3231_vm2 = vcmask 1047559  }
0x244f   :  { %4451 = vmatprep.subr.bf16.mxu1 %v4759_v4 }
0x2452   :  { %4453 = vmatpush3.bf16.msra.mxu1 %v5117_v36 }
0x2520   :  { %v2336_v22 = vpop.f32.mrb[14].mxu1 }
0x2521   :  { %v2341_v1 = vrot.slane %v2336_v22, 6  ;;  %v2344_v3 = vrot.slane %v2336_v22, 4  ;;  %v4305_v5 = vpop.f32.mrb[15].mxu1 }
0x2523   :  { %v2343_v7 = vadd.f32 %v2341_v1, %v5160_v55  ;;  %v2346_v9 = vadd.f32 %v2344_v3, %v5162_v57 }
0x2525   :  { %4687 = vtanh.f32 %v2343_v7  ;;  %v4010_v13 = vmul.f32 -1.442695, %v2343_v7  ;;  %v4011_v4 = vmul.f32 -1.442695, %v2346_v9 }
0x2526   :  { %4689 = vtanh.f32 %v2346_v9 }
0x2527   :  { %4691 = vpow2.f32 %v4010_v13 }
0x2528   :  { %4693 = vpow2.f32 %v4011_v4 }
0x252f   :  { %v4688_v10 = vpop.eup %4687 }
0x2530   :  { %v4690_v11 = vpop.eup %4689  ;;  %2366 = vrot.lane.b32.xlu0 %v4688_v10, %s4762_s16 }
0x2531   :  { %2380 = vrot.lane.b32.xlu1 %v4690_v11, %s4762_s16  ;;  %v4692_v29 = vpop.eup %4691 }
0x2532   :  { %v4694_v36 = vpop.eup %4693  ;;  %v2350_v12 = vadd.f32 1.0, %v4692_v29 }
0x2533   :  { %v2356_v15 = vadd.f32 1.0, %v4694_v36 }
0x2534   :  { %4695 = vrcp.f32 %v2350_v12 }
0x2535   :  { %4697 = vrcp.f32 %v2356_v15 }
0x253e   :  { %v4696_v16 = vpop.eup %4695 }
0x253f   :  { %v4698_v18 = vpop.eup %4697  ;;  %v2364_v6 = vmul.f32 %v4696_v16, %v2362_v31 }
0x2540   :  { %v2378_v23 = vmul.f32 %v4698_v18, %v2376_v52 }
0x25a2   :  { %v2367_v17 = vpop.permute.xlu0 %2366 }
0x25a3   :  { %v2381_v20 = vpop.permute.xlu1 %2380  ;;  %v2369_v21 = vmul.f32 %v4696_v16, %v2367_v17 }
0x25a4   :  { %v2383_v28 = vmul.f32 %v4698_v18, %v2381_v20 }
0x25a5   :  { %2371 = vrot.lane.b32.xlu0 %v2369_v21, %s4763_s5 }
0x25a6   :  { %2385 = vrot.lane.b32.xlu1 %v2383_v28, %s4763_s5 }
0x2617   :  { %v2372_v25 = vpop.permute.xlu0 %2371 }
0x2618   :  { %v2386_v26 = vpop.permute.xlu1 %2385  ;;  %v2374_v27 = vadd.f32 %v2372_v25, %v2364_v6 }
0x2619   :  { %v2388_v30 = vadd.f32 %v2386_v26, %v2378_v23 }
0x261a   :  { %4699 = vtanh.f32 %v2374_v27  ;;  %v2512_v1 = vrot.slane %v2374_v27, 6 }
0x261b   :  { %4701 = vtanh.f32 %v2388_v30  ;;  %v2526_v3 = vrot.slane %v2388_v30, 2 }
0x2624   :  { %v4700_v32 = vpop.eup %4699 }
0x2625   :  { %v4702_v33 = vpop.eup %4701  ;;  %2391 = vrot.lane.b32.xlu0 %v4700_v32, %s4763_s5 }
0x2626   :  { %2397 = vrot.lane.b32.xlu1 %v4702_v33, %s4763_s5 }
0x2697   :  { %v2392_v34 = vpop.permute.xlu0 %2391 }
0x2698   :  { %v2398_v35 = vpop.permute.xlu1 %2397  ;;  %v2394_v37 = vmul.f32 %v4696_v16, %v2392_v34 }
0x2699   :  { %v5285_v38 = vmul.f32 %v4698_v18, %v2398_v35 }
0x269a   :  { %2402 = vrot.lane.b32.xlu0 %v2394_v37, %s4764_s17 }
0x269b   :  { %2407 = vrot.lane.b32.xlu1 %v5285_v38, %s4765_s18 }
0x270c   :  { %v2403_v8 = vpop.permute.xlu0 %2402 }
0x270d   :  { %v2408_v39 = vpop.permute.xlu1 %2407  ;;  %2405 = vst.msk [vmem:[#allocation2 - $0x2] sm:$0xc] %vm433_vm5, %v2403_v8  ;;  %2411 = vst.msk [vmem:[#allocation3 + $0x8] sm:$0xc] %vm433_vm5, %v2403_v8 }
0x270e   :  { %2410 = vst.msk [vmem:[#allocation2 - $0x4] sm:$0x30] %vm439_vm6, %v2408_v39 }
0x2715   :  { %v2416_v40 = vld [vmem:[#allocation2] sm:$0x3] }
0x2716   :  { %4315 = vmatmul.mubr.msk.f32.vlgmr.msra.gmra.mrb[16].mxu0 %vm61_vm0, %v2416_v40 }
0x2717   :  { %4339 = vmatprep.mubr.msk.f32.mxu0 %vm1351_vm11, %v2714_v46 }
0x27e9   :  { %v2486_v41 = vpop.f32.mrb[16].mxu0 }
0x27ea   :  { %v2491_v42 = vrot.slane %v2486_v41, 4  ;;  %v2494_v43 = vrot.slane %v2486_v41, 6  ;;  %v4316_v44 = vpop.f32.mrb[17].mxu0 }
0x27ec   :  { %v2493_v45 = vadd.f32 %v2491_v42, %v5160_v55  ;;  %v2496_v47 = vadd.f32 %v2494_v43, %v5162_v57 }
0x27ee   :  { %4703 = vtanh.f32 %v2493_v45  ;;  %v4013_v50 = vmul.f32 -1.442695, %v2493_v45  ;;  %v4014_v51 = vmul.f32 -1.442695, %v2496_v47 }
0x27ef   :  { %4705 = vtanh.f32 %v2496_v47 }
0x27f0   :  { %4707 = vpow2.f32 %v4013_v50  ;;  %v2718_v50 = vld [vmem:[%s5828_s9] sm:$0xff] }
0x27f1   :  { %4709 = vpow2.f32 %v4014_v51 }
0x27f8   :  { %v4704_v48 = vpop.eup %4703 }
0x27f9   :  { %v4706_v49 = vpop.eup %4705  ;;  %2516 = vrot.lane.b32.xlu0 %v4704_v48, %s4762_s16 }
0x27fa   :  { %2530 = vrot.lane.b32.xlu1 %v4706_v49, %s4762_s16  ;;  %v4708_v53 = vpop.eup %4707 }
0x27fb   :  { %v4710_v54 = vpop.eup %4709  ;;  %v2500_v56 = vadd.f32 1.0, %v4708_v53 }
0x27fc   :  { %v2506_v58 = vadd.f32 1.0, %v4710_v54 }
0x27fd   :  { %4711 = vrcp.f32 %v2500_v56 }
0x27fe   :  { %4713 = vrcp.f32 %v2506_v58 }
0x2807   :  { %v4712_v59 = vpop.eup %4711 }
0x2808   :  { %v4714_v62 = vpop.eup %4713  ;;  %v2514_v5 = vmul.f32 %v4712_v59, %v2512_v1 }
0x2809   :  { %v2528_v7 = vmul.f32 %v4714_v62, %v2526_v3 }
0x286b   :  { %v2517_v60 = vpop.permute.xlu0 %2516 }
0x286c   :  { %v2531_v63 = vpop.permute.xlu1 %2530  ;;  %v2519_v24 = vmul.f32 %v4712_v59, %v2517_v60 }
0x286d   :  { %v2533_v22 = vmul.f32 %v4714_v62, %v2531_v63 }
0x286e   :  { %2521 = vrot.lane.b32.xlu0 %v2519_v24, %s4763_s5 }
0x286f   :  { %2535 = vrot.lane.b32.xlu1 %v2533_v22, %s4763_s5 }
0x28e0   :  { %v2522_v9 = vpop.permute.xlu0 %2521 }
0x28e1   :  { %v2536_v10 = vpop.permute.xlu1 %2535  ;;  %v2524_v11 = vadd.f32 %v2522_v9, %v2514_v5  ;;  %v2908_v9 = vlaneseq }
0x28e2   :  { %v2538_v13 = vadd.f32 %v2536_v10, %v2528_v7 }
0x28e3   :  { %4715 = vtanh.f32 %v2524_v11  ;;  %v2660_v41 = vrot.slane %v2524_v11, 6  ;;  %v5361_v10 = vshrl.u32 %v2908_v9, 7 }
0x28e4   :  { %4717 = vtanh.f32 %v2538_v13  ;;  %v2674_v40 = vrot.slane %v2538_v13, 2 }
0x28ed   :  { %v4716_v4 = vpop.eup %4715 }
0x28ee   :  { %v4718_v29 = vpop.eup %4717  ;;  %2541 = vrot.lane.b32.xlu0 %v4716_v4, %s4763_s5 }
0x28ef   :  { %2547 = vrot.lane.b32.xlu1 %v4718_v29, %s4763_s5  ;;  %v4022_v29 = vld [vmem:[%s5829_s10] ss:$0 sm:$0xff] }
0x2960   :  { %v2542_v36 = vpop.permute.xlu0 %2541 }
0x2961   :  { %v2548_v12 = vpop.permute.xlu1 %2547  ;;  %v2544_v15 = vmul.f32 %v4712_v59, %v2542_v36 }
0x2962   :  { %v2550_v16 = vmul.f32 %v4714_v62, %v2548_v12 }
0x2963   :  { %2552 = vrot.lane.b32.xlu0 %v2544_v15, %s4764_s17  ;;  %v2948_v15 = vsub.s32 3, %v5361_v10 }
0x2964   :  { %2557 = vrot.lane.b32.xlu1 %v2550_v16, %s4765_s18 }
0x29d5   :  { %v2553_v17 = vpop.permute.xlu0 %2552 }
0x29d6   :  { %v2558_v18 = vpop.permute.xlu1 %2557  ;;  %2555 = vst.msk [vmem:[#allocation2 - $0x4] sm:$0x30] %vm445_vm7, %v2553_v17  ;;  %2561 = vst.msk [vmem:[#allocation3 + $0x8] sm:$0x30] %vm445_vm7, %v2553_v17  ;;  %v3284_v17 = vsub.s32 1, %v5361_v10 }
0x29d7   :  { %2560 = vst.msk [vmem:[#allocation2 - $0x2] sm:$0xc] %vm591_vm8, %v2558_v18 }
0x29de   :  { %v2566_v20 = vld [vmem:[#allocation2] sm:$0x3] }
0x29df   :  { %4326 = vmatmul.mubr.msk.f32.vlgmr.msra.gmra.mrb[16].mxu1 %vm61_vm0, %v2566_v20  ;;  %v3059_v20 = vsub.s32 4, %v5361_v10  ;;  %vm3123_vm0 = vcmask 1045509  }
0x2ab2   :  { %v2636_v21 = vpop.f32.mrb[16].mxu1 }
0x2ab3   :  { %v2641_v28 = vrot.slane %v2636_v21, 2  ;;  %v2644_v31 = vadd.f32 %v2636_v21, %v5162_v57  ;;  %v4327_v52 = vpop.f32.mrb[17].mxu1 }
0x2ab4   :  { %v3174_v52 = vsub.s32 7, %v5361_v10 }
0x2ab5   :  { %v2643_v6 = vadd.f32 %v2641_v28, %v5160_v55  ;;  %4719 = vtanh.f32 %v2644_v31  ;;  %v4017_v26 = vmul.f32 -1.442695, %v2644_v31  ;;  %v3066_v28 = vsub.s32 5, %v5361_v10 }
0x2ab6   :  { %v3167_v31 = vsub.s32 6, %v5361_v10 }
0x2ab7   :  { %4721 = vtanh.f32 %v2643_v6  ;;  %v4016_v27 = vmul.f32 -1.442695, %v2643_v6 }
0x2ab8   :  { %4723 = vpow2.f32 %v4017_v26 }
0x2ab9   :  { %4725 = vpow2.f32 %v4016_v27 }
0x2abf   :  { %v4720_v23 = vpop.eup %4719 }
0x2ac0   :  { %2678 = vrot.lane.b32.xlu0 %v4720_v23, %s4762_s16 }
0x2ac1   :  { %v4722_v25 = vpop.eup %4721 }
0x2ac2   :  { %2664 = vrot.lane.b32.xlu1 %v4722_v25, %s4762_s16  ;;  %v4724_v30 = vpop.eup %4723 }
0x2ac3   :  { %v4726_v32 = vpop.eup %4725  ;;  %v2654_v33 = vadd.f32 1.0, %v4724_v30 }
0x2ac4   :  { %v2648_v34 = vadd.f32 1.0, %v4726_v32 }
0x2ac5   :  { %4727 = vrcp.f32 %v2654_v33 }
0x2ac6   :  { %4729 = vrcp.f32 %v2648_v34 }
0x2acf   :  { %v4728_v57 = vpop.eup %4727 }
0x2ad0   :  { %v4730_v37 = vpop.eup %4729  ;;  %v2676_v46 = vmul.f32 %v4728_v57, %v2674_v40  ;;  %v4768_v40 = vmov 1966171168  }
0x2ad1   :  { %v2662_v44 = vmul.f32 %v4730_v37, %v2660_v41 }
0x2b32   :  { %v2679_v55 = vpop.permute.xlu0 %2678 }
0x2b33   :  { %v2681_v35 = vmul.f32 %v4728_v57, %v2679_v55 }
0x2b34   :  { %v2665_v8 = vpop.permute.xlu1 %2664 }
0x2b35   :  { %2683 = vrot.lane.b32.xlu0 %v2681_v35, %s4763_s5  ;;  %v2667_v39 = vmul.f32 %v4730_v37, %v2665_v8 }
0x2b37   :  { %2669 = vrot.lane.b32.xlu1 %v2667_v39, %s4763_s5  ;;  %v4767_v39 = vmov 0  }
0x2b38   :  { %4477 = vset.pattern.permute.xlu0 %v4767_v39  ;;  %4478 = vset.pattern.permute.xlu1 %v4767_v39 }
0x2ba7   :  { %v2684_v42 = vpop.permute.xlu0 %2683 }
0x2ba8   :  { %v2686_v43 = vadd.f32 %v2684_v42, %v2676_v46  ;;  %v2906_v46 = vunpack.c.l.s4 %v4768_v40  ;;  %v4023_v42 = vld [vmem:[%s5831_s12] ss:$0 sm:$0xff] }
0x2ba9   :  { %v2670_v45 = vpop.permute.xlu1 %2669 }
0x2baa   :  { %4731 = vtanh.f32 %v2686_v43  ;;  %v2672_v47 = vadd.f32 %v2670_v45, %v2662_v44  ;;  %v2907_v41 = vunpack.c.0.s8 %v2906_v46 }
0x2bac   :  { %4733 = vtanh.f32 %v2672_v47  ;;  %v5406_v43 = vsub.s32 %v2907_v41, %v5361_v10 }
0x2bb4   :  { %v4732_v48 = vpop.eup %4731 }
0x2bb5   :  { %2695 = vrot.lane.b32.xlu0 %v4732_v48, %s4763_s5 }
0x2bb6   :  { %v4734_v49 = vpop.eup %4733 }
0x2bb7   :  { %2689 = vrot.lane.b32.xlu1 %v4734_v49, %s4763_s5 }
0x2bb9   :  { %2262 = vrot.lane.b32.xlu0 %v5264_v61, %s4766_s19  ;;  %v2719_v61 = vld [vmem:[%s5828_s9 + $0x8] sm:$0xff] }
0x2bba   :  { %v4458_v51 = vpack.c.bf16 %v2719_v61, %v2718_v50  ;;  %v5412_v50 = vsub.s32 0, %v5361_v10 }
0x2bbb   :  { %2412 = vrot.lane.b32.xlu1 %v5285_v38, %s4766_s19  ;;  %v2720_v38 = vld [vmem:[%s5828_s9 + $0x10] sm:$0xff] }
0x2bbc   :  { %4459 = vmatprep.subr.bf16.mxu0 %v4458_v51 }
0x2bbd   :  { %2562 = vrot.lane.b32.xlu0 %v2550_v16, %s4766_s19  ;;  %4461 = vmatpush3.bf16.msra.mxu0 %v4458_v51  ;;  %v2941_v16 = vsub.s32 2, %v5361_v10  ;;  %v5419_v51 = vld [vmem:[%s5830_s11] sm:$0xff] }
0x2bbf   :  { %1816 = vrot.lane.b32.xlu1 %v5195_v0, %s4766_s19 }
0x2bc1   :  { %1666 = vrot.lane.b32.xlu0 %v5172_v2, %s4766_s19  ;;  %v2721_v2 = vld [vmem:[%s5828_s9 + $0x18] sm:$0xff] }
0x2bc2   :  { %v4454_v0 = vpack.c.bf16 %v2721_v2, %v2720_v38 }
0x2bc4   :  { %4455 = vmatprep.subr.bf16.mxu1 %v4454_v0 }
0x2bc5   :  { %1966 = vrot.lane.b32.xlu0 %v5218_v14, %s4766_s19  ;;  %4457 = vmatpush3.bf16.msra.mxu1 %v4454_v0 }
0x2c27   :  { %v2696_v14 = vpop.permute.xlu0 %2695 }
0x2c28   :  { %v5340_v53 = vmul.f32 %v4728_v57, %v2696_v14 }
0x2c29   :  { %v2690_v54 = vpop.permute.xlu1 %2689 }
0x2c2a   :  { %2710 = vrot.lane.b32.xlu1 %v5340_v53, %s4766_s19  ;;  %v2692_v56 = vmul.f32 %v4730_v37, %v2690_v54 }
0x2c2b   :  { %v2263_v58 = vpop.permute.xlu0 %2262 }
0x2c2c   :  { %2265 = vst.msk [vmem:[#allocation4] sm:$0xc0] %vm292_vm9, %v2263_v58  ;;  %2700 = vrot.lane.b32.xlu0 %v2692_v56, %s4764_s17 }
0x2c2d   :  { %v2413_v59 = vpop.permute.xlu1 %2412 }
0x2c2e   :  { %2114 = vrot.lane.b32.xlu1 %v5241_v19, %s4766_s19  ;;  %2415 = vst.msk [vmem:[#allocation4] sm:$0x30] %vm445_vm7, %v2413_v59 }
0x2c2f   :  { %v2563_v60 = vpop.permute.xlu0 %2562 }
0x2c30   :  { %2565 = vst.msk [vmem:[#allocation4] sm:$0xc] %vm433_vm5, %v2563_v60 }
0x2c31   :  { %v1817_v62 = vpop.permute.xlu1 %1816 }
0x2c32   :  { %1819 = vst.msk [vmem:[#allocation4 + $0x8] sm:$0x30] %vm445_vm7, %v1817_v62  ;;  %v2894_v62 = vld [vmem:[%s5820_s1] sm:$0xff]  ;;  %vm3683_vm7 = vcmask 64518  }
0x2c33   :  { %v1667_v63 = vpop.permute.xlu0 %1666  ;;  %vm2998_vm13 = vcmp.gt.f32.partialorder %v2894_v62, 0.0 }
0x2c34   :  { %1669 = vst.msk [vmem:[#allocation4 + $0x8] sm:$0xc0] %vm292_vm9, %v1667_v63  ;;  %v2999_v63 = vsel %vm2998_vm13, 1, %v4767_v39 }
0x2c37   :  { %v1967_v24 = vpop.permute.xlu0 %1966 }
0x2c38   :  { %1969 = vst.msk [vmem:[#allocation4 + $0x8] sm:$0xc] %vm433_vm5, %v1967_v24  ;;  %v5436_v24 = vand.u32 127, %v2908_v9 }
0x2c9c   :  { %v2711_v22 = vpop.permute.xlu1 %2710 }
0x2c9d   :  { %2713 = vst.msk [vmem:[#allocation4] sm:$0x3] %vm280_vm3, %v2711_v22  ;;  %v5440_v22 = vsub.s32 %v5436_v24, %v5361_v10 }
0x2c9e   :  { %v2701_v1 = vpop.permute.xlu0 %2700 }
0x2c9f   :  { %2703 = vst.msk [vmem:[#allocation2 - $0x6] sm:$0xc0] %vm292_vm9, %v2701_v1  ;;  %2709 = vst.msk [vmem:[#allocation3 + $0x8] sm:$0xc0] %vm292_vm9, %v2701_v1 }
0x2ca0   :  { %v2115_v19 = vpop.permute.xlu1 %2114 }
0x2ca1   :  { %2117 = vst.msk [vmem:[#allocation4 + $0x8] sm:$0x3] %vm280_vm3, %v2115_v19  ;;  %vm3347_vm3 = vcmask 1041409  }
0x2ca4   :  { %v2716_v3 = vld [vmem:[#allocation4] sm:$0xff] }
0x2ca5   :  { %4332 = vmatprep.mubr.msk.f32.mxu1 %vm1351_vm11, %v2716_v3 }
0x2ca6   :  { %v2715_v5 = vld [vmem:[#allocation3 + $0x8] sm:$0xff] }
0x2ca7   :  { %4340 = vmatmul.mubr.msk.f32.vlgmr.msra.gmra.mrb[18].mxu0 %vm1351_vm11, %v2715_v5 }
0x2ca8   :  { %v2717_v7 = vld [vmem:[#allocation4 + $0x8] sm:$0xff] }
0x2ca9   :  { %4333 = vmatmul.mubr.msk.f32.vlgmr.msra.gmra.mrb[18].mxu1 %vm1351_vm11, %v2717_v7 }
0x2d7a   :  { %v4341_v11 = vpop.f32.mrb[18].mxu0 }
0x2d7b   :  { %v2875_v13 = vpop.f32.mrb[19].mxu0 }
0x2d7c   :  { %v4334_v4 = vpop.f32.mrb[18].mxu1 }
0x2d7d   :  { %v2881_v36 = vadd.f32 %v4341_v11, %v4334_v4  ;;  %v2794_v12 = vpop.f32.mrb[19].mxu1 }
0x2d7e   :  { %v2876_v18 = vadd.f32 %v2875_v13, %v2794_v12 }
0x2d7f   :  { %v5370_v21 = vadd.f32 %v4022_v29, %v2881_v36 }
0x2d80   :  { %v2891_v6 = vadd.f32 %v4022_v29, %v2876_v18 }
0x2d81   :  { %v5376_v23 = vrot.slane %v5370_v21, %v3284_v17  ;;  %v5379_v25 = vrot.slane %v5370_v21, %v2948_v15  ;;  %v5382_v26 = vrot.slane %v5370_v21, %v2941_v16  ;;  %v5389_v55 = vrot.slane %v5370_v21, %v3059_v20 }
0x2d82   :  { %v2949_v27 = vrot.slane %v2891_v6, %v2948_v15  ;;  %v2942_v30 = vrot.slane %v2891_v6, %v2941_v16  ;;  %v3060_v32 = vrot.slane %v2891_v6, %v3059_v20  ;;  %v3067_v33 = vrot.slane %v2891_v6, %v3066_v28 }
0x2d83   :  { %v5384_v34 = vrot.slane %v2891_v6, %v3167_v31  ;;  %v5386_v57 = vrot.slane %v2891_v6, %v3174_v52  ;;  %v5392_v35 = vrot.slane %v5370_v21, %v3066_v28  ;;  %v5395_v37 = vrot.slane %v5370_v21, %v3167_v31 }
0x2d84   :  { %2951 = vbcast.lane.b32.xlu0 %v2949_v27, 256  ;;  %2944 = vbcast.lane.b32.xlu1 %v2942_v30, 256  ;;  %v5398_v8 = vrot.slane %v5370_v21, %v3174_v52  ;;  %v2903_v44 = vadd.f32 %v4023_v42, %v2891_v6 }
0x2d86   :  { %v2911_v45 = vrot.slane %v2903_v44, %v5406_v43  ;;  %v3017_v7 = vrot.slane %v2903_v44, 6 }
0x2d88   :  { %v2912_v47 = vcombine.high %v2911_v45, %v2911_v45  ;;  %v2919_v49 = vrot.slane %v2911_v45, %v5406_v43 }
0x2d8a   :  { %v2926_v48 = vrot.slane %v2912_v47, %v5406_v43  ;;  %v2930_v38 = vrot.slane %v2919_v49, %v5412_v50 }
0x2d8c   :  { %v2934_v61 = vrot.slane %v2926_v48, %v5412_v50  ;;  %v2937_v0 = vadd.f32 %v2930_v38, %v5419_v51 }
0x2d8e   :  { %v2938_v2 = vadd.f32 %v2934_v61, %v5419_v51 }
0x2df6   :  { %v2952_v14 = vpop.permute.xlu0 %2951  ;;  %v2945_v54 = vpop.permute.xlu1 %2944 }
0x2df7   :  { %v5423_v56 = vadd.f32 %v2952_v14, %v2938_v2  ;;  %v5425_v58 = vadd.f32 %v2945_v54, %v2937_v0 }
0x2df9   :  { %v2956_v59 = vsel %vm2955_vm12, %v5425_v58, -inf  ;;  %v2959_v60 = vsel %vm2955_vm12, %v5423_v56, -inf }
0x2dfa   :  { %2957 = vmax.xlane.f32.xlu1 %v2956_v59  ;;  %2960 = vmax.xlane.f32.xlu0 %v2959_v60 }
0x2e0b   :  { %3062 = vbcast.lane.b32.xlu1 %v3060_v32, 256 }
0x2e0f   :  { %3069 = vbcast.lane.b32.xlu1 %v3067_v33, 256 }
0x2e10   :  { %3001 = vperm.xlu0 %4477, %v2999_v63   ;;  %v2895_v63 = vld [vmem:[%s5820_s1 + $0x8] sm:$0xff] }
0x2e11   :  { %vm3331_vm1 = vcmp.gt.f32.partialorder %v2895_v63, 0.0 }
0x2e87   :  { %v5442_v1 = vpop.xlane.xlu1 %2957  ;;  %v5444_v19 = vpop.xlane.xlu0 %2960 }
0x2e88   :  { %v3009_v3 = vrot.slane %v5442_v1, %v5440_v22  ;;  %v3013_v5 = vrot.slane %v5444_v19, %v5440_v22 }
0x2e8a   :  { %v3015_v9 = vsel %vm3014_vm14, %v3013_v5, %v3009_v3  ;;  %v3278_v3 = vrot.slane %v5370_v21, %v5412_v50  ;;  %v3332_v5 = vsel %vm3331_vm1, 1, %v4767_v39 }
0x2e8b   :  { %v3063_v15 = vpop.permute.xlu1 %3062 }
0x2e8f   :  { %v5450_v11 = vpop.permute.xlu0 %3001  ;;  %v3070_v52 = vpop.permute.xlu1 %3069 }
0x2e90   :  { %vm3003_vm15 = vcmp.eq.s32.totalorder %v5450_v11, 1 }
0x2e91   :  { %v3019_v10 = vsel %vm3003_vm15, %v3015_v9, %v3017_v7 }
0x2e92   :  { %v3027_v13 = vrot.slane %v3019_v10, %v5406_v43  ;;  %v3126_v41 = vrot.slane %v3019_v10, 6 }
0x2e94   :  { %v3028_v4 = vcombine.high %v3027_v13, %v3027_v13  ;;  %v3035_v29 = vrot.slane %v3027_v13, %v5406_v43 }
0x2e96   :  { %v3042_v36 = vrot.slane %v3028_v4, %v5406_v43  ;;  %v3043_v12 = vcombine.high %v3035_v29, %v3035_v29 }
0x2e98   :  { %v3044_v16 = vcombine.high %v3042_v36, %v3042_v36  ;;  %v3048_v17 = vrot.slane %v3043_v12, %v5412_v50 }
0x2e9a   :  { %v3055_v18 = vadd.f32 %v3048_v17, %v5419_v51  ;;  %v3052_v20 = vrot.slane %v3044_v16, %v5412_v50 }
0x2e9c   :  { %v5462_v28 = vadd.f32 %v3063_v15, %v3055_v18  ;;  %v3056_v31 = vadd.f32 %v3052_v20, %v5419_v51 }
0x2e9e   :  { %v3073_v6 = vsel %vm2955_vm12, %v5462_v28, -inf  ;;  %v5467_v27 = vadd.f32 %v3070_v52, %v3056_v31 }
0x2e9f   :  { %3074 = vmax.xlane.f32.xlu1 %v3073_v6 }
0x2ea0   :  { %v3076_v30 = vsel %vm2955_vm12, %v5467_v27, -inf }
0x2ea1   :  { %3077 = vmax.xlane.f32.xlu0 %v3076_v30 }
0x2eb0   :  { %3170 = vbcast.lane.b32.xlu1 %v5384_v34, 256 }
0x2eb7   :  { %3177 = vbcast.lane.b32.xlu0 %v5386_v57, 256 }
0x2f2c   :  { %v5473_v32 = vpop.xlane.xlu1 %3074 }
0x2f2d   :  { %v3118_v40 = vrot.slane %v5473_v32, %v5440_v22 }
0x2f2e   :  { %v5475_v33 = vpop.xlane.xlu0 %3077 }
0x2f2f   :  { %v3122_v46 = vrot.slane %v5475_v33, %v5440_v22 }
0x2f30   :  { %v3171_v2 = vpop.permute.xlu1 %3170 }
0x2f31   :  { %v3124_v42 = vsel %vm3123_vm0, %v3122_v46, %v3118_v40 }
0x2f32   :  { %v3128_v44 = vsel %vm3003_vm15, %v3124_v42, %v3126_v41  ;;  %v3178_v54 = vpop.permute.xlu0 %3177 }
0x2f33   :  { %v3130_v34 = vcombine.high %v3128_v44, %v3128_v44  ;;  %v3234_v4 = vrot.slane %v3128_v44, 6 }
0x2f35   :  { %v3137_v57 = vrot.slane %v3130_v34, %v5406_v43 }
0x2f37   :  { %v3145_v45 = vrot.slane %v3137_v57, %v5406_v43  ;;  %v3138_v47 = vcombine.high %v3137_v57, %v3137_v57 }
0x2f39   :  { %v3156_v48 = vrot.slane %v3145_v45, %v5412_v50  ;;  %v3152_v49 = vrot.slane %v3138_v47, %v5406_v43 }
0x2f3b   :  { %v3163_v61 = vadd.f32 %v3156_v48, %v5419_v51  ;;  %v3160_v38 = vrot.slane %v3152_v49, %v5412_v50 }
0x2f3d   :  { %v5490_v0 = vadd.f32 %v3171_v2, %v3163_v61  ;;  %v3164_v14 = vadd.f32 %v3160_v38, %v5419_v51 }
0x2f3f   :  { %v5493_v59 = vadd.f32 %v3178_v54, %v3164_v14  ;;  %v3181_v60 = vsel %vm2955_vm12, %v5490_v0, -inf }
0x2f40   :  { %3182 = vmax.xlane.f32.xlu1 %v3181_v60 }
0x2f41   :  { %v3184_v62 = vsel %vm2955_vm12, %v5493_v59, -inf }
0x2f42   :  { %3185 = vmax.xlane.f32.xlu0 %v3184_v62 }
0x2f51   :  { %3280 = vbcast.lane.b32.xlu1 %v3278_v3, 256 }
0x2f55   :  { %3334 = vperm.xlu1 %4478, %v3332_v5  }
0x2f58   :  { %3287 = vbcast.lane.b32.xlu0 %v5376_v23, 256 }
0x2fcd   :  { %v5506_v7 = vpop.xlane.xlu1 %3182 }
0x2fce   :  { %v3226_v10 = vrot.slane %v5506_v7, %v5440_v22 }
0x2fcf   :  { %v5508_v9 = vpop.xlane.xlu0 %3185 }
0x2fd0   :  { %v3230_v13 = vrot.slane %v5508_v9, %v5440_v22 }
0x2fd1   :  { %v3281_v52 = vpop.permute.xlu1 %3280 }
0x2fd2   :  { %v3232_v21 = vsel %vm3231_vm2, %v3230_v13, %v3226_v10 }
0x2fd3   :  { %v3236_v39 = vsel %vm3003_vm15, %v3232_v21, %v3234_v4  ;;  %v3288_v30 = vpop.permute.xlu0 %3287 }
0x2fd4   :  { %v3238_v29 = vcombine.high %v3236_v39, %v3236_v39  ;;  %v3350_v47 = vrot.slane %v3236_v39, 6 }
0x2fd5   :  { %v5534_v42 = vpop.permute.xlu1 %3334 }
0x2fd6   :  { %v3245_v23 = vrot.slane %v3238_v29, %v5406_v43  ;;  %vm3336_vm4 = vcmp.eq.s32.totalorder %v5534_v42, 1 }
0x2fd8   :  { %v3253_v36 = vrot.slane %v3245_v23, %v5406_v43  ;;  %v3246_v12 = vcombine.high %v3245_v23, %v3245_v23 }
0x2fda   :  { %v3261_v15 = vcombine.high %v3253_v36, %v3253_v36  ;;  %v3260_v16 = vrot.slane %v3246_v12, %v5406_v43 }
0x2fdc   :  { %v3266_v17 = vrot.slane %v3261_v15, %v5412_v50  ;;  %v3262_v18 = vcombine.high %v3260_v16, %v3260_v16 }
0x2fde   :  { %v3273_v20 = vadd.f32 %v3266_v17, %v5419_v51  ;;  %v3270_v31 = vrot.slane %v3262_v18, %v5412_v50 }
0x2fe0   :  { %v5523_v6 = vadd.f32 %v3281_v52, %v3273_v20  ;;  %v3274_v11 = vadd.f32 %v3270_v31, %v5419_v51 }
0x2fe2   :  { %v5526_v40 = vadd.f32 %v3288_v30, %v3274_v11  ;;  %v3291_v46 = vsel %vm2955_vm12, %v5523_v6, -inf }
0x2fe3   :  { %3292 = vmax.xlane.f32.xlu1 %v3291_v46 }
0x2fe4   :  { %v3294_v41 = vsel %vm2955_vm12, %v5526_v40, -inf }
0x2fe5   :  { %3295 = vmax.xlane.f32.xlu0 %v3294_v41 }
0x2ff4   :  { %3400 = vbcast.lane.b32.xlu1 %v5379_v25, 256 }
0x2ffb   :  { %3393 = vbcast.lane.b32.xlu0 %v5382_v26, 256 }
0x3070   :  { %v5536_v44 = vpop.xlane.xlu1 %3292 }
0x3071   :  { %v3342_v57 = vrot.slane %v5536_v44, %v5440_v22 }
0x3072   :  { %v5538_v34 = vpop.xlane.xlu0 %3295 }
0x3073   :  { %v3346_v45 = vrot.slane %v5538_v34, %v5440_v22 }
0x3074   :  { %v3401_v3 = vpop.permute.xlu1 %3400 }
0x3075   :  { %v3348_v25 = vsel %vm3347_vm3, %v3346_v45, %v3342_v57 }
0x3076   :  { %v3352_v26 = vsel %vm3336_vm4, %v3348_v25, %v3350_v47  ;;  %v3394_v60 = vpop.permute.xlu0 %3393 }
0x3077   :  { %v3360_v48 = vrot.slane %v3352_v26, %v5406_v43  ;;  %v3456_v23 = vrot.slane %v3352_v26, 6 }
0x3079   :  { %v3361_v49 = vcombine.high %v3360_v48, %v3360_v48  ;;  %v3368_v61 = vrot.slane %v3360_v48, %v5406_v43 }
0x307b   :  { %v3375_v38 = vrot.slane %v3361_v49, %v5406_v43  ;;  %v3379_v2 = vrot.slane %v3368_v61, %v5412_v50 }
0x307d   :  { %v3383_v14 = vrot.slane %v3375_v38, %v5412_v50  ;;  %v3386_v54 = vadd.f32 %v3379_v2, %v5419_v51 }
0x307f   :  { %v3387_v62 = vadd.f32 %v3383_v14, %v5419_v51  ;;  %v5555_v63 = vadd.f32 %v3394_v60, %v3386_v54 }
0x3081   :  { %v5557_v5 = vadd.f32 %v3401_v3, %v3387_v62  ;;  %v3404_v10 = vsel %vm2955_vm12, %v5555_v63, -inf }
0x3082   :  { %3405 = vmax.xlane.f32.xlu1 %v3404_v10 }
0x3083   :  { %v3407_v13 = vsel %vm2955_vm12, %v5557_v5, -inf }
0x3084   :  { %3408 = vmax.xlane.f32.xlu0 %v3407_v13 }
0x3093   :  { %3501 = vbcast.lane.b32.xlu1 %v5389_v55, 256 }
0x309a   :  { %3508 = vbcast.lane.b32.xlu0 %v5392_v35, 256 }
0x310f   :  { %v5565_v4 = vpop.xlane.xlu1 %3405 }
0x3110   :  { %v3449_v39 = vrot.slane %v5565_v4, %v5440_v22 }
0x3111   :  { %v5567_v21 = vpop.xlane.xlu0 %3408 }
0x3112   :  { %v3453_v29 = vrot.slane %v5567_v21, %v5440_v22 }
0x3113   :  { %v3502_v11 = vpop.permute.xlu1 %3501 }
0x3114   :  { %v3454_v36 = vsel %vm3014_vm14, %v3453_v29, %v3449_v39 }
0x3115   :  { %v3458_v12 = vsel %vm3336_vm4, %v3454_v36, %v3456_v23  ;;  %v3509_v41 = vpop.permute.xlu0 %3508 }
0x3116   :  { %v3466_v55 = vrot.slane %v3458_v12, %v5406_v43  ;;  %v3564_v61 = vrot.slane %v3458_v12, 6 }
0x3118   :  { %v3474_v35 = vrot.slane %v3466_v55, %v5406_v43  ;;  %v3467_v15 = vcombine.high %v3466_v55, %v3466_v55 }
0x311a   :  { %v3482_v16 = vcombine.high %v3474_v35, %v3474_v35  ;;  %v3481_v17 = vrot.slane %v3467_v15, %v5406_v43 }
0x311c   :  { %v3487_v18 = vrot.slane %v3482_v16, %v5412_v50  ;;  %v3483_v20 = vcombine.high %v3481_v17, %v3481_v17 }
0x311e   :  { %v3494_v31 = vadd.f32 %v3487_v18, %v5419_v51  ;;  %v3491_v52 = vrot.slane %v3483_v20, %v5412_v50 }
0x3120   :  { %v5582_v30 = vadd.f32 %v3502_v11, %v3494_v31  ;;  %v3495_v46 = vadd.f32 %v3491_v52, %v5419_v51 }
0x3122   :  { %v5585_v57 = vadd.f32 %v3509_v41, %v3495_v46  ;;  %v3512_v45 = vsel %vm2955_vm12, %v5582_v30, -inf }
0x3123   :  { %3513 = vmax.xlane.f32.xlu1 %v3512_v45 }
0x3124   :  { %v3515_v47 = vsel %vm2955_vm12, %v5585_v57, -inf }
0x3125   :  { %3516 = vmax.xlane.f32.xlu0 %v3515_v47 }
0x3134   :  { %3608 = vbcast.lane.b32.xlu1 %v5395_v37, 256 }
0x313b   :  { %3615 = vbcast.lane.b32.xlu0 %v5398_v8, 256 }
0x31b0   :  { %v5593_v25 = vpop.xlane.xlu1 %3513 }
0x31b1   :  { %v3557_v48 = vrot.slane %v5593_v25, %v5440_v22  ;;  %vm3518_vm14 = vcmp.eq.f32.partialorder %v5582_v30, %v5593_v25 }
0x31b2   :  { %v5595_v26 = vpop.xlane.xlu0 %3516 }
0x31b3   :  { %v3561_v49 = vrot.slane %v5595_v26, %v5440_v22  ;;  %vm3519_vm15 = vcmp.eq.f32.partialorder %v5585_v57, %v5595_v26 }
0x31b4   :  { %v3609_v13 = vpop.permute.xlu1 %3608 }
0x31b5   :  { %v3562_v38 = vsel %vm3123_vm0, %v3561_v49, %v3557_v48 }
0x31b6   :  { %v3566_v2 = vsel %vm3336_vm4, %v3562_v38, %v3564_v61  ;;  %v3616_v23 = vpop.permute.xlu0 %3615 }
0x31b7   :  { %v3568_v14 = vcombine.high %v3566_v2, %v3566_v2  ;;  %v3671_v17 = vrot.slane %v3566_v2, 6 }
0x31b9   :  { %v3575_v37 = vrot.slane %v3568_v14, %v5406_v43 }
0x31bb   :  { %v3583_v8 = vrot.slane %v3575_v37, %v5406_v43  ;;  %v3576_v54 = vcombine.high %v3575_v37, %v3575_v37 }
0x31bd   :  { %v3594_v60 = vrot.slane %v3583_v8, %v5412_v50  ;;  %v3590_v62 = vrot.slane %v3576_v54, %v5406_v43 }
0x31bf   :  { %v3601_v3 = vadd.f32 %v3594_v60, %v5419_v51  ;;  %v3598_v10 = vrot.slane %v3590_v62, %v5412_v50 }
0x31c1   :  { %v3617_v39 = vadd.f32 %v3609_v13, %v3601_v3  ;;  %v3602_v29 = vadd.f32 %v3598_v10, %v5419_v51  ;;  %v4024_v51 = vld [vmem:[%s5832_s13] ss:$0 sm:$0xff] }
0x31c3   :  { %v3618_v36 = vadd.f32 %v3616_v23, %v3602_v29  ;;  %v3619_v12 = vsel %vm2955_vm12, %v3617_v39, -inf }
0x31c4   :  { %3620 = vmax.xlane.f32.xlu1 %v3619_v12 }
0x31c5   :  { %v3622_v55 = vsel %vm2955_vm12, %v3618_v36, -inf }
0x31c6   :  { %3623 = vmax.xlane.f32.xlu0 %v3622_v55 }
0x3251   :  { %v3621_v35 = vpop.xlane.xlu1 %3620 }
0x3252   :  { %vm3625_vm5 = vcmp.eq.f32.partialorder %v3617_v39, %v3621_v35  ;;  %v3664_v16 = vrot.slane %v3621_v35, %v5440_v22 }
0x3253   :  { %v3627_v43 = vsel %vm3625_vm5, %v5436_v24, 8  ;;  %v3624_v15 = vpop.xlane.xlu0 %3623 }
0x3254   :  { %vm3626_vm6 = vcmp.eq.f32.partialorder %v3618_v36, %v3624_v15  ;;  %v3668_v50 = vrot.slane %v3624_v15, %v5440_v22  ;;  %v3629_v18 = vsel %vm2955_vm12, %v3627_v43, 2147483647 }
0x3255   :  { %v3628_v31 = vsel %vm3626_vm6, %v5436_v24, 8  ;;  %v3631_v46 = vshra.s32 %v3629_v18, 16  ;;  %v3630_v38 = vand.u32 65535, %v3629_v18  ;;  %vm3740_vm6 = vcmask 58368  }
0x3256   :  { %v3669_v20 = vsel %vm3231_vm2, %v3668_v50, %v3664_v16  ;;  %v3644_v41 = vsel %vm2955_vm12, %v3628_v31, 2147483647 }
0x3257   :  { %v3673_v52 = vsel %vm3336_vm4, %v3669_v20, %v3671_v17  ;;  %v3633_v47 = vcvt.s32.f32 %v3631_v46  ;;  %v3646_v48 = vshra.s32 %v3644_v41, 16  ;;  %v3632_v8 = vcvt.s32.f32 %v3630_v38 }
0x3258   :  { %v3681_v11 = vadd.f32 %v4024_v51, %v3673_v52  ;;  %v3645_v54 = vand.u32 65535, %v3644_v41  ;;  %vm3411_vm4 = vcmp.eq.f32.partialorder %v5557_v5, %v5567_v21 }
0x3259   :  { %v3648_v49 = vcvt.s32.f32 %v3646_v48  ;;  %v3520_v48 = vsel %vm3518_vm14, %v5436_v24, 8  ;;  %vm3732_vm14 = vcmp.eq.s32.totalorder %v5436_v24, 7 }
0x325a   :  { %v3684_v45 = vsel %vm3683_vm7, %v3681_v11, -inf  ;;  %v3647_v10 = vcvt.s32.f32 %v3645_v54  ;;  %v3522_v38 = vsel %vm2955_vm12, %v3520_v48, 2147483647 }
0x325b   :  { %3685 = vmax.xlane.f32.xlu1 %v3684_v45 }
0x325f   :  { %3634 = vmin.xlane.f32.xlu1 %v3633_v47 }
0x3263   :  { %3649 = vmin.xlane.f32.xlu1 %v3648_v49 }
0x32e8   :  { %v3686_v61 = vpop.xlane.xlu1 %3685 }
0x32e9   :  { %vm3687_vm8 = vcmp.eq.f32.partialorder %v3681_v11, %v3686_v61 }
0x32ea   :  { %v3688_v2 = vsel %vm3687_vm8, %v5436_v24, 8 }
0x32eb   :  { %v3689_v42 = vsel %vm3683_vm7, %v3688_v2, 2147483647 }
0x32ec   :  { %v3691_v14 = vshra.s32 %v3689_v42, 16  ;;  %v3635_v37 = vpop.xlane.xlu1 %3634  ;;  %v3690_v39 = vand.u32 65535, %v3689_v42  ;;  %v3521_v42 = vsel %vm3519_vm15, %v5436_v24, 8  ;;  %vm3756_vm15 = vcmp.eq.s32.totalorder %v5436_v24, 6 }
0x32ed   :  { %vm3636_vm9 = vcmp.eq.f32.partialorder %v3633_v47, %v3635_v37  ;;  %v3641_v29 = vcvt.f32.s32 %v3635_v37  ;;  %v3537_v54 = vsel %vm2955_vm12, %v3521_v42, 2147483647 }
0x32ee   :  { %v3637_v60 = vsel %vm3636_vm9, %v3632_v8, inf  ;;  %v3693_v62 = vcvt.s32.f32 %v3691_v14  ;;  %v3692_v12 = vcvt.s32.f32 %v3690_v39  ;;  %v3524_v8 = vshra.s32 %v3522_v38, 16 }
0x32ef   :  { %3638 = vmin.xlane.f32.xlu0 %v3637_v60  ;;  %v3642_v15 = vshll.u32 %v3641_v29, 16  ;;  %v3539_v26 = vshra.s32 %v3537_v54, 16  ;;  %vm3410_vm9 = vcmp.eq.f32.partialorder %v5555_v63, %v5565_v4 }
0x32f0   :  { %3694 = vmin.xlane.f32.xlu1 %v3693_v62  ;;  %v3650_v3 = vpop.xlane.xlu1 %3649  ;;  %v3526_v57 = vcvt.s32.f32 %v3524_v8 }
0x32f1   :  { %vm3651_vm11 = vcmp.eq.f32.partialorder %v3648_v49, %v3650_v3  ;;  %v3656_v55 = vcvt.f32.s32 %v3650_v3  ;;  %v3541_v60 = vcvt.s32.f32 %v3539_v26 }
0x32f2   :  { %v3652_v13 = vsel %vm3651_vm11, %v3647_v10, inf  ;;  %v3523_v10 = vand.u32 65535, %v3522_v38  ;;  %vm3297_vm11 = vcmp.eq.f32.partialorder %v5523_v6, %v5536_v44 }
0x32f3   :  { %v3657_v50 = vshll.u32 %v3656_v55, 16  ;;  %v3299_v8 = vsel %vm3297_vm11, %v5436_v24, 8 }
0x32f4   :  { %3653 = vmin.xlane.f32.xlu1 %v3652_v13 }
0x337c   :  { %v3639_v23 = vpop.xlane.xlu0 %3638 }
0x337d   :  { %v3695_v36 = vpop.xlane.xlu1 %3694  ;;  %v3640_v35 = vcvt.f32.s32 %v3639_v23  ;;  %v5645_v23 = vld [vmem:[%s5821_s2] sm:$0x3]  ;;  %s4769_s2 = smov [#allocation5]  }
0x337e   :  { %vm3696_vm13 = vcmp.eq.f32.partialorder %v3693_v62, %v3695_v36  ;;  %v3701_v11 = vcvt.f32.s32 %v3695_v36  ;;  %vm3754_vm8 = vcmp.le.s32.totalorder %v5645_v23, 6 }
0x337f   :  { %v3697_v43 = vsel %vm3696_vm13, %v3692_v12, inf  ;;  %v3643_v17 = vadd.s32 %v3642_v15, %v3640_v35  ;;  %v3525_v12 = vcvt.s32.f32 %v3523_v10  ;;  %vm3298_vm13 = vcmp.eq.f32.partialorder %v5526_v40, %v5538_v34 }
0x3380   :  { %3698 = vmin.xlane.f32.xlu0 %v3697_v43  ;;  %v3702_v41 = vshll.u32 %v3701_v11, 16  ;;  %v3300_v26 = vsel %vm3298_vm13, %v5436_v24, 8  ;;  %vm3816_vm13 = vcmp.le.s32.totalorder %v5645_v23, 4 }
0x3381   :  { %v3654_v16 = vpop.xlane.xlu1 %3653  ;;  %v3708_v20 = vrot.slane %v3643_v17, %v5440_v22  ;;  %v5680_v63 = vsel %vm2955_vm12, %v3300_v26, 2147483647 }
0x3382   :  { %v3655_v51 = vcvt.f32.s32 %v3654_v16  ;;  %v3318_v6 = vshra.s32 %v5680_v63, 16 }
0x3384   :  { %v3658_v18 = vadd.s32 %v3657_v50, %v3655_v51  ;;  %v3413_v50 = vsel %vm3411_vm4, %v5436_v24, 8  ;;  %v3538_v51 = vand.u32 65535, %v3537_v54  ;;  %v5683_v44 = vcvt.s32.f32 %v3318_v6 }
0x3386   :  { %v3712_v31 = vrot.slane %v3658_v18, %v5440_v22  ;;  %v5658_v18 = vsel %vm2955_vm12, %v3413_v50, 2147483647 }
0x3388   :  { %v3738_v52 = vsel %vm3347_vm3, %v3712_v31, %v3708_v20  ;;  %v3713_v49 = vsel %vm3231_vm2, %v3712_v31, %v3708_v20  ;;  %vm3728_vm2 = vcmp.le.s32.totalorder %v5645_v23, 7  ;;  %v3540_v20 = vcvt.s32.f32 %v3538_v51 }
0x3389   :  { %v3431_v31 = vshra.s32 %v5658_v18, 16 }
0x340d   :  { %v3699_v46 = vpop.xlane.xlu0 %3698 }
0x340e   :  { %v3700_v45 = vcvt.f32.s32 %v3699_v46  ;;  %v5661_v46 = vcvt.s32.f32 %v3431_v31 }
0x3410   :  { %v3703_v47 = vadd.s32 %v3702_v41, %v3700_v45 }
0x3412   :  { %vm3704_vm0 = vcmp.eq.s32.totalorder %v5436_v24, %v3703_v47  ;;  %v5651_v43 = vrot.slane %v3703_v47, 6 }
0x3413   :  { %v3714_v61 = vsel %vm3704_vm0, %v3713_v49, 0 }
0x3414   :  { %v3715_v2 = vsel %vm3683_vm7, %v3714_v61, 0 }
0x3415   :  { %v3717_v30 = vshrl.u32 %v3715_v2, 16  ;;  %v3716_v25 = vand.u32 65535, %v3715_v2 }
0x3417   :  { %v3719_v14 = vcvt.s32.f32 %v3717_v30  ;;  %v3718_v37 = vcvt.s32.f32 %v3716_v25 }
0x3419   :  { %3722 = vadd.xlane.f32.xlu1 %v3719_v14  ;;  %3720 = vadd.xlane.f32.xlu0 %v3718_v37 }
0x341d   :  { %3527 = vmin.xlane.f32.xlu0 %v3526_v57 }
0x3421   :  { %3542 = vmin.xlane.f32.xlu0 %v3541_v60 }
0x34a6   :  { %v3723_v62 = vpop.xlane.xlu1 %3722  ;;  %v3721_v3 = vpop.xlane.xlu0 %3720 }
0x34a7   :  { %v3725_v13 = vcvt.f32.s32 %v3723_v62  ;;  %v3724_v29 = vcvt.f32.s32 %v3721_v3 }
0x34a9   :  { %v3726_v39 = vshll.u32 %v3725_v13, 16 }
0x34aa   :  { %v5647_v36 = vpop.xlane.xlu0 %3527 }
0x34ab   :  { %v3727_v55 = vadd.s32 %v3726_v39, %v3724_v29  ;;  %vm3529_vm1 = vcmp.eq.f32.partialorder %v3526_v57, %v5647_v36  ;;  %v3301_v57 = vsel %vm2955_vm12, %v3299_v8, 2147483647  ;;  %v3534_v34 = vcvt.f32.s32 %v5647_v36 }
0x34ac   :  { %v3530_v35 = vsel %vm3529_vm1, %v3525_v12, inf  ;;  %v3303_v62 = vshra.s32 %v3301_v57, 16 }
0x34ad   :  { %v3730_v15 = vrot.slane %v3727_v55, 6  ;;  %v3535_v39 = vshll.u32 %v3534_v34, 16 }
0x34ae   :  { %v3543_v17 = vpop.xlane.xlu0 %3542  ;;  %v3305_v4 = vcvt.s32.f32 %v3303_v62 }
0x34af   :  { %v3731_v16 = vsel %vm3728_vm2, %v5651_v43, %v3730_v15  ;;  %vm3544_vm5 = vcmp.eq.f32.partialorder %v3541_v60, %v3543_v17  ;;  %v3549_v10 = vcvt.f32.s32 %v3543_v17 }
0x34b0   :  { %3734 = vperm.xlu1 %4478, %v3731_v16   ;;  %v3545_v11 = vsel %vm3544_vm5, %v3540_v20, inf  ;;  %vm3785_vm5 = vcmp.le.s32.totalorder %v5645_v23, 5 }
0x34b1   :  { %v3550_v12 = vshll.u32 %v3549_v10, 16 }
0x34d4   :  { %3546 = vmin.xlane.f32.xlu1 %v3545_v11 }
0x34d8   :  { %3434 = vmin.xlane.f32.xlu1 %v5661_v46 }
0x352f   :  { %v3735_v41 = vpop.permute.xlu1 %3734 }
0x3530   :  { %vm3737_vm7 = vcmp.eq.s32.totalorder %v5436_v24, %v3735_v41  ;;  %v3736_v50 = vsel %vm3732_vm14, %v3735_v41, 0  ;;  %vm3187_vm14 = vcmp.eq.f32.partialorder %v5490_v0, %v5506_v7 }
0x3531   :  { %v3739_v5 = vsel %vm3737_vm7, %v3738_v52, 0  ;;  %v3412_v52 = vsel %vm3410_vm9, %v5436_v24, 8  ;;  %vm3188_vm7 = vcmp.eq.f32.partialorder %v5493_v59, %v5508_v9  ;;  %vm3787_vm9 = vcmp.eq.s32.totalorder %v5436_v24, 5 }
0x3532   :  { %v3741_v21 = vsel %vm3740_vm6, %v3739_v5, 0  ;;  %v3414_v37 = vsel %vm2955_vm12, %v3412_v52, 2147483647 }
0x3533   :  { %v3743_v45 = vshrl.u32 %v3741_v21, 16  ;;  %v3742_v48 = vand.u32 65535, %v3741_v21  ;;  %v3416_v54 = vshra.s32 %v3414_v37, 16 }
0x3535   :  { %v3745_v47 = vcvt.s32.f32 %v3743_v45  ;;  %v3744_v49 = vcvt.s32.f32 %v3742_v48  ;;  %v3418_v60 = vcvt.s32.f32 %v3416_v54 }
0x3537   :  { %3748 = vadd.xlane.f32.xlu0 %v3745_v47  ;;  %v3415_v47 = vand.u32 65535, %v3414_v37 }
0x3539   :  { %v3417_v41 = vcvt.s32.f32 %v3415_v47 }
0x353b   :  { %3746 = vadd.xlane.f32.xlu0 %v3744_v49 }
0x353f   :  { %3531 = vmin.xlane.f32.xlu0 %v3530_v35 }
0x3561   :  { %v3547_v3 = vpop.xlane.xlu1 %3546 }
0x3562   :  { %v3548_v29 = vcvt.f32.s32 %v3547_v3 }
0x3564   :  { %v3551_v35 = vadd.s32 %v3550_v12, %v3548_v29 }
0x3565   :  { %v3435_v48 = vpop.xlane.xlu1 %3434 }
0x3566   :  { %v3769_v16 = vrot.slane %v3551_v35, %v5440_v22  ;;  %vm3436_vm2 = vcmp.eq.f32.partialorder %v5661_v46, %v3435_v48 }
0x35c4   :  { %v3749_v61 = vpop.xlane.xlu0 %3748 }
0x35c5   :  { %v3751_v38 = vcvt.f32.s32 %v3749_v61  ;;  %v3430_v61 = vand.u32 65535, %v5658_v18 }
0x35c7   :  { %v3752_v42 = vshll.u32 %v3751_v38, 16  ;;  %v3302_v38 = vand.u32 65535, %v3301_v57 }
0x35c8   :  { %v3747_v2 = vpop.xlane.xlu0 %3746 }
0x35c9   :  { %v3750_v30 = vcvt.f32.s32 %v3747_v2 }
0x35cb   :  { %v3753_v25 = vadd.s32 %v3752_v42, %v3750_v30  ;;  %v3432_v30 = vcvt.s32.f32 %v3430_v61 }
0x35cc   :  { %v3532_v40 = vpop.xlane.xlu0 %3531 }
0x35cd   :  { %v3755_v14 = vsel %vm3754_vm8, %v5651_v43, %v3753_v25  ;;  %v3533_v13 = vcvt.f32.s32 %v3532_v40  ;;  %v3304_v25 = vcvt.s32.f32 %v3302_v38 }
0x35ce   :  { %3758 = vperm.xlu0 %4477, %v3755_v14   ;;  %v3437_v14 = vsel %vm3436_vm2, %v3432_v30, inf }
0x35cf   :  { %v3536_v55 = vadd.s32 %v3535_v39, %v3533_v13  ;;  %v3441_v13 = vcvt.f32.s32 %v3435_v48 }
0x35d1   :  { %v3765_v15 = vrot.slane %v3536_v55, %v5440_v22  ;;  %v3442_v29 = vshll.u32 %v3441_v13, 16 }
0x35d3   :  { %v3770_v36 = vsel %vm3347_vm3, %v3769_v16, %v3765_v15 }
0x35ed   :  { %3419 = vmin.xlane.f32.xlu0 %v3418_v60 }
0x35f1   :  { %3306 = vmin.xlane.f32.xlu0 %v3305_v4 }
0x35f5   :  { %3321 = vmin.xlane.f32.xlu0 %v5683_v44 }
0x364d   :  { %v3759_v51 = vpop.permute.xlu0 %3758 }
0x364e   :  { %v5692_v20 = vsel %vm3756_vm15, %v3759_v51, %v3736_v50  ;;  %vm3761_vm0 = vcmp.eq.s32.totalorder %v5436_v24, %v3759_v51  ;;  %vm3079_vm15 = vcmp.eq.f32.partialorder %v5462_v28, %v5473_v32 }
0x364f   :  { %v3771_v17 = vsel %vm3761_vm0, %v3770_v36, 0  ;;  %vm3080_vm0 = vcmp.eq.f32.partialorder %v5467_v27, %v5475_v33 }
0x3650   :  { %v3772_v31 = vsel %vm3740_vm6, %v3771_v17, 0 }
0x3651   :  { %v3774_v11 = vshrl.u32 %v3772_v31, 16  ;;  %v3773_v21 = vand.u32 65535, %v3772_v31 }
0x3653   :  { %v3776_v5 = vcvt.s32.f32 %v3774_v11  ;;  %v3775_v45 = vcvt.s32.f32 %v3773_v21 }
0x3655   :  { %3779 = vadd.xlane.f32.xlu1 %v3776_v5 }
0x3659   :  { %3777 = vadd.xlane.f32.xlu1 %v3775_v45 }
0x367a   :  { %v3420_v49 = vpop.xlane.xlu0 %3419 }
0x367b   :  { %vm3421_vm1 = vcmp.eq.f32.partialorder %v3418_v60, %v3420_v49  ;;  %v3190_v60 = vsel %vm3188_vm7, %v5436_v24, 8  ;;  %v3426_v39 = vcvt.f32.s32 %v3420_v49 }
0x367c   :  { %v3422_v2 = vsel %vm3421_vm1, %v3417_v41, inf  ;;  %v5710_v6 = vsel %vm2955_vm12, %v3190_v60, 2147483647  ;;  %vm3818_vm1 = vcmp.eq.s32.totalorder %v5436_v24, 4 }
0x367d   :  { %3423 = vmin.xlane.f32.xlu1 %v3422_v2  ;;  %v3208_v34 = vshra.s32 %v5710_v6, 16  ;;  %v3427_v55 = vshll.u32 %v3426_v39, 16  ;;  %v3189_v2 = vsel %vm3187_vm14, %v5436_v24, 8 }
0x367e   :  { %v5698_v42 = vpop.xlane.xlu0 %3306  ;;  %v3191_v30 = vsel %vm2955_vm12, %v3189_v2, 2147483647 }
0x367f   :  { %vm3308_vm4 = vcmp.eq.f32.partialorder %v3305_v4, %v5698_v42  ;;  %v3317_v4 = vand.u32 65535, %v5680_v63  ;;  %v5715_v10 = vcvt.s32.f32 %v3208_v34  ;;  %v3313_v27 = vcvt.f32.s32 %v5698_v42 }
0x3680   :  { %v3309_v52 = vsel %vm3308_vm4, %v3304_v25, inf  ;;  %v3081_v25 = vsel %vm3079_vm15, %v5436_v24, 8  ;;  %vm3878_vm15 = vcmp.le.s32.totalorder %v5645_v23, 2 }
0x3681   :  { %3438 = vmin.xlane.f32.xlu1 %v3437_v14  ;;  %v3319_v40 = vcvt.s32.f32 %v3317_v4  ;;  %v3193_v14 = vshra.s32 %v3191_v30, 16 }
0x3682   :  { %v5706_v62 = vpop.xlane.xlu0 %3321 }
0x3683   :  { %vm3323_vm8 = vcmp.eq.f32.partialorder %v5683_v44, %v5706_v62 }
0x3684   :  { %v3324_v3 = vsel %vm3323_vm8, %v3319_v40, inf  ;;  %vm3847_vm8 = vcmp.le.s32.totalorder %v5645_v23, 3 }
0x36e2   :  { %v3780_v37 = vpop.xlane.xlu1 %3779 }
0x36e3   :  { %v3782_v8 = vcvt.f32.s32 %v3780_v37  ;;  %v3082_v37 = vsel %vm3080_vm0, %v5436_v24, 8  ;;  %vm2964_vm0 = vcmp.eq.f32.partialorder %v5425_v58, %v5442_v1 }
0x36e4   :  { %v5739_v0 = vsel %vm2955_vm12, %v3082_v37, 2147483647 }
0x36e5   :  { %v3783_v26 = vshll.u32 %v3782_v8, 16  ;;  %v3195_v8 = vcvt.s32.f32 %v3193_v14  ;;  %v3100_v28 = vshra.s32 %v5739_v0, 16 }
0x36e6   :  { %v3778_v54 = vpop.xlane.xlu1 %3777 }
0x36e7   :  { %v3781_v18 = vcvt.f32.s32 %v3778_v54  ;;  %v3102_v32 = vcvt.s32.f32 %v3100_v28 }
0x36e9   :  { %v3784_v57 = vadd.s32 %v3783_v26, %v3781_v18  ;;  %v3328_v18 = vcvt.f32.s32 %v5706_v62 }
0x36eb   :  { %v3786_v46 = vsel %vm3785_vm5, %v5651_v43, %v3784_v57  ;;  %v3329_v4 = vshll.u32 %v3328_v18, 16 }
0x36ec   :  { %3789 = vperm.xlu1 %4478, %v3786_v46   ;;  %v3314_v46 = vshll.u32 %v3313_v27, 16 }
0x370a   :  { %v3424_v59 = vpop.xlane.xlu1 %3423 }
0x370b   :  { %v3425_v12 = vcvt.f32.s32 %v3424_v59 }
0x370d   :  { %v3428_v15 = vadd.s32 %v3427_v55, %v3425_v12 }
0x370e   :  { %v3439_v9 = vpop.xlane.xlu1 %3438 }
0x370f   :  { %v3440_v63 = vcvt.f32.s32 %v3439_v9  ;;  %v3796_v16 = vrot.slane %v3428_v15, %v5440_v22 }
0x3710   :  { %3325 = vmin.xlane.f32.xlu1 %v3324_v3 }
0x3711   :  { %v3443_v35 = vadd.s32 %v3442_v29, %v3440_v63 }
0x3713   :  { %v3800_v44 = vrot.slane %v3443_v35, %v5440_v22  ;;  %v3192_v35 = vand.u32 65535, %v3191_v30 }
0x3714   :  { %3211 = vmin.xlane.f32.xlu1 %v5715_v10 }
0x3715   :  { %v3801_v51 = vsel %vm3347_vm3, %v3800_v44, %v3796_v16  ;;  %v3194_v16 = vcvt.s32.f32 %v3192_v35 }
0x376b   :  { %v3790_v50 = vpop.permute.xlu1 %3789 }
0x376c   :  { %v3791_v36 = vsel %vm3787_vm9, %v3790_v50, %v5692_v20  ;;  %vm3792_vm11 = vcmp.eq.s32.totalorder %v5436_v24, %v3790_v50  ;;  %v3207_v50 = vand.u32 65535, %v5710_v6  ;;  %vm2965_vm9 = vcmp.eq.f32.partialorder %v5423_v56, %v5444_v19 }
0x376d   :  { %v3802_v17 = vsel %vm3792_vm11, %v3801_v51, 0 }
0x376e   :  { %v3803_v31 = vsel %vm3740_vm6, %v3802_v17, 0 }
0x376f   :  { %v3805_v11 = vshrl.u32 %v3803_v31, 16  ;;  %v3804_v21 = vand.u32 65535, %v3803_v31  ;;  %v3209_v31 = vcvt.s32.f32 %v3207_v50 }
0x3771   :  { %v3807_v5 = vcvt.s32.f32 %v3805_v11  ;;  %v3806_v45 = vcvt.s32.f32 %v3804_v21 }
0x3773   :  { %3810 = vadd.xlane.f32.xlu0 %v3807_v5 }
0x3777   :  { %3808 = vadd.xlane.f32.xlu0 %v3806_v45 }
0x377b   :  { %3310 = vmin.xlane.f32.xlu0 %v3309_v52  ;;  %v3083_v52 = vsel %vm2955_vm12, %v3081_v25, 2147483647 }
0x377c   :  { %v3085_v54 = vshra.s32 %v3083_v52, 16  ;;  %v3084_v51 = vand.u32 65535, %v3083_v52 }
0x377e   :  { %v3087_v7 = vcvt.s32.f32 %v3085_v54  ;;  %v3086_v11 = vcvt.s32.f32 %v3084_v51 }
0x379d   :  { %v3326_v33 = vpop.xlane.xlu1 %3325 }
0x379e   :  { %v3327_v60 = vcvt.f32.s32 %v3326_v33 }
0x37a0   :  { %v3330_v34 = vadd.s32 %v3329_v4, %v3327_v60 }
0x37a1   :  { %v3212_v15 = vpop.xlane.xlu1 %3211 }
0x37a2   :  { %v3831_v59 = vrot.slane %v3330_v34, %v5440_v22  ;;  %vm3213_vm5 = vcmp.eq.f32.partialorder %v5715_v10, %v3212_v15  ;;  %v3218_v19 = vcvt.f32.s32 %v3212_v15 }
0x37a3   :  { %v3214_v5 = vsel %vm3213_vm5, %v3209_v31, inf  ;;  %vm3909_vm5 = vcmp.le.s32.totalorder %v5645_v23, 1 }
0x3800   :  { %v3811_v47 = vpop.xlane.xlu0 %3810 }
0x3801   :  { %v3813_v48 = vcvt.f32.s32 %v3811_v47 }
0x3803   :  { %v3814_v41 = vshll.u32 %v3813_v48, 16 }
0x3804   :  { %v3809_v49 = vpop.xlane.xlu0 %3808 }
0x3805   :  { %v3812_v61 = vcvt.f32.s32 %v3809_v49 }
0x3807   :  { %v3815_v20 = vadd.s32 %v3814_v41, %v3812_v61  ;;  %v2967_v61 = vsel %vm2965_vm9, %v5436_v24, 8 }
0x3808   :  { %v3311_v26 = vpop.xlane.xlu0 %3310  ;;  %v5764_v2 = vsel %vm2955_vm12, %v2967_v61, 2147483647 }
0x3809   :  { %v3817_v38 = vsel %vm3816_vm13, %v5651_v43, %v3815_v20  ;;  %v3312_v57 = vcvt.f32.s32 %v3311_v26  ;;  %v2985_v25 = vshra.s32 %v5764_v2, 16  ;;  %vm3849_vm13 = vcmp.eq.s32.totalorder %v5436_v24, 3 }
0x380a   :  { %3820 = vperm.xlu0 %4477, %v3817_v38   ;;  %v3099_v38 = vand.u32 65535, %v5739_v0 }
0x380b   :  { %v3315_v40 = vadd.s32 %v3314_v46, %v3312_v57  ;;  %v5767_v52 = vcvt.s32.f32 %v2985_v25 }
0x380c   :  { %v3101_v30 = vcvt.s32.f32 %v3099_v38 }
0x380d   :  { %v3827_v3 = vrot.slane %v3315_v40, %v5440_v22 }
0x380f   :  { %v3832_v13 = vsel %vm3347_vm3, %v3831_v59, %v3827_v3 }
0x3829   :  { %3196 = vmin.xlane.f32.xlu0 %v3195_v8 }
0x382d   :  { %3088 = vmin.xlane.f32.xlu0 %v3087_v7 }
0x3831   :  { %3103 = vmin.xlane.f32.xlu0 %v3102_v32 }
0x3889   :  { %v3821_v9 = vpop.permute.xlu0 %3820 }
0x388a   :  { %v5748_v39 = vsel %vm3818_vm1, %v3821_v9, %v3791_v36  ;;  %vm3823_vm2 = vcmp.eq.s32.totalorder %v5436_v24, %v3821_v9  ;;  %vm3880_vm1 = vcmp.eq.s32.totalorder %v5436_v24, 2 }
0x388b   :  { %v3833_v42 = vsel %vm3823_vm2, %v3832_v13, 0 }
0x388c   :  { %v3834_v62 = vsel %vm3740_vm6, %v3833_v42, 0 }
0x388d   :  { %v3836_v63 = vshrl.u32 %v3834_v62, 16  ;;  %v3835_v12 = vand.u32 65535, %v3834_v62 }
0x388f   :  { %v3838_v29 = vcvt.s32.f32 %v3836_v63  ;;  %v3837_v55 = vcvt.s32.f32 %v3835_v12  ;;  %v2966_v12 = vsel %vm2964_vm0, %v5436_v24, 8 }
0x3891   :  { %3841 = vadd.xlane.f32.xlu1 %v3838_v29 }
0x3895   :  { %3839 = vadd.xlane.f32.xlu1 %v3837_v55  ;;  %v2968_v55 = vsel %vm2955_vm12, %v2966_v12, 2147483647 }
0x3896   :  { %v2970_v35 = vshra.s32 %v2968_v55, 16  ;;  %v2969_v38 = vand.u32 65535, %v2968_v55 }
0x3898   :  { %v2972_v15 = vcvt.s32.f32 %v2970_v35 }
0x38b6   :  { %v3197_v44 = vpop.xlane.xlu0 %3196 }
0x38b7   :  { %vm3198_vm4 = vcmp.eq.f32.partialorder %v3195_v8, %v3197_v44  ;;  %v3203_v8 = vcvt.f32.s32 %v3197_v44 }
0x38b8   :  { %v3199_v36 = vsel %vm3198_vm4, %v3194_v16, inf }
0x38b9   :  { %3200 = vmin.xlane.f32.xlu1 %v3199_v36  ;;  %v3204_v28 = vshll.u32 %v3203_v8, 16 }
0x38ba   :  { %v5754_v17 = vpop.xlane.xlu0 %3088 }
0x38bb   :  { %vm3090_vm7 = vcmp.eq.f32.partialorder %v3087_v7, %v5754_v17  ;;  %v3219_v7 = vshll.u32 %v3218_v19, 16  ;;  %v3095_v16 = vcvt.f32.s32 %v5754_v17 }
0x38bc   :  { %v3091_v21 = vsel %vm3090_vm7, %v3086_v11, inf  ;;  %vm3911_vm7 = vcmp.eq.s32.totalorder %v5436_v24, 1 }
0x38bd   :  { %3215 = vmin.xlane.f32.xlu1 %v3214_v5  ;;  %v3096_v31 = vshll.u32 %v3095_v16, 16 }
0x38be   :  { %v3104_v20 = vpop.xlane.xlu0 %3103 }
0x38bf   :  { %vm3105_vm11 = vcmp.eq.f32.partialorder %v3102_v32, %v3104_v20  ;;  %v3110_v51 = vcvt.f32.s32 %v3104_v20 }
0x38c0   :  { %v3106_v14 = vsel %vm3105_vm11, %v3101_v30, inf }
0x38c1   :  { %v3111_v5 = vshll.u32 %v3110_v51, 16 }
0x391e   :  { %v3842_v45 = vpop.xlane.xlu1 %3841 }
0x391f   :  { %v3844_v47 = vcvt.f32.s32 %v3842_v45 }
0x3921   :  { %v3845_v49 = vshll.u32 %v3844_v47, 16 }
0x3922   :  { %v3840_v48 = vpop.xlane.xlu1 %3839 }
0x3923   :  { %v3843_v6 = vcvt.f32.s32 %v3840_v48 }
0x3925   :  { %v3846_v41 = vadd.s32 %v3845_v49, %v3843_v6 }
0x3927   :  { %v3848_v10 = vsel %vm3847_vm8, %v5651_v43, %v3846_v41 }
0x3928   :  { %3851 = vperm.xlu1 %4478, %v3848_v10  }
0x3946   :  { %v3201_v37 = vpop.xlane.xlu1 %3200 }
0x3947   :  { %v3202_v0 = vcvt.f32.s32 %v3201_v37  ;;  %v2984_v37 = vand.u32 65535, %v5764_v2 }
0x3949   :  { %v3205_v27 = vadd.s32 %v3204_v28, %v3202_v0  ;;  %v2986_v19 = vcvt.s32.f32 %v2984_v37 }
0x394a   :  { %v3216_v56 = vpop.xlane.xlu1 %3215 }
0x394b   :  { %v3217_v54 = vcvt.f32.s32 %v3216_v56  ;;  %v3858_v33 = vrot.slane %v3205_v27, %v5440_v22 }
0x394c   :  { %3107 = vmin.xlane.f32.xlu1 %v3106_v14  ;;  %v2971_v14 = vcvt.s32.f32 %v2969_v38 }
0x394d   :  { %v3220_v26 = vadd.s32 %v3219_v7, %v3217_v54 }
0x394f   :  { %v3862_v32 = vrot.slane %v3220_v26, %v5440_v22 }
0x3950   :  { %2988 = vmin.xlane.f32.xlu1 %v5767_v52 }
0x3951   :  { %v3863_v57 = vsel %vm3347_vm3, %v3862_v32, %v3858_v33 }
0x39a7   :  { %v3852_v18 = vpop.permute.xlu1 %3851 }
0x39a8   :  { %v3853_v46 = vsel %vm3849_vm13, %v3852_v18, %v5748_v39  ;;  %vm3854_vm14 = vcmp.eq.s32.totalorder %v5436_v24, %v3852_v18 }
0x39a9   :  { %v3864_v60 = vsel %vm3854_vm14, %v3863_v57, 0 }
0x39aa   :  { %v3865_v4 = vsel %vm3740_vm6, %v3864_v60, 0 }
0x39ab   :  { %v3867_v40 = vshrl.u32 %v3865_v4, 16  ;;  %v3866_v3 = vand.u32 65535, %v3865_v4 }
0x39ad   :  { %v3869_v34 = vcvt.s32.f32 %v3867_v40  ;;  %v3868_v59 = vcvt.s32.f32 %v3866_v3 }
0x39af   :  { %3872 = vadd.xlane.f32.xlu0 %v3869_v34 }
0x39b3   :  { %3870 = vadd.xlane.f32.xlu0 %v3868_v59 }
0x39b7   :  { %3092 = vmin.xlane.f32.xlu0 %v3091_v21 }
0x39d9   :  { %v3108_v50 = vpop.xlane.xlu1 %3107 }
0x39da   :  { %v3109_v11 = vcvt.f32.s32 %v3108_v50 }
0x39dc   :  { %v3112_v45 = vadd.s32 %v3111_v5, %v3109_v11 }
0x39dd   :  { %v2989_v30 = vpop.xlane.xlu1 %2988 }
0x39de   :  { %v3893_v1 = vrot.slane %v3112_v45, %v5440_v22  ;;  %vm2990_vm4 = vcmp.eq.f32.partialorder %v5767_v52, %v2989_v30  ;;  %v2995_v33 = vcvt.f32.s32 %v2989_v30 }
0x39df   :  { %v2991_v8 = vsel %vm2990_vm4, %v2986_v19, inf }
0x3a3c   :  { %v3873_v9 = vpop.xlane.xlu0 %3872 }
0x3a3d   :  { %v3875_v13 = vcvt.f32.s32 %v3873_v9 }
0x3a3f   :  { %v3876_v62 = vshll.u32 %v3875_v13, 16 }
0x3a40   :  { %v3871_v42 = vpop.xlane.xlu0 %3870 }
0x3a41   :  { %v3874_v63 = vcvt.f32.s32 %v3871_v42 }
0x3a43   :  { %v3877_v39 = vadd.s32 %v3876_v62, %v3874_v63 }
0x3a44   :  { %v3093_v44 = vpop.xlane.xlu0 %3092 }
0x3a45   :  { %v3879_v29 = vsel %vm3878_vm15, %v5651_v43, %v3877_v39  ;;  %v3094_v36 = vcvt.f32.s32 %v3093_v44 }
0x3a46   :  { %3882 = vperm.xlu0 %4477, %v3879_v29  }
0x3a47   :  { %v3097_v21 = vadd.s32 %v3096_v31, %v3094_v36 }
0x3a49   :  { %v3889_v58 = vrot.slane %v3097_v21, %v5440_v22 }
0x3a4b   :  { %v3894_v48 = vsel %vm3347_vm3, %v3893_v1, %v3889_v58 }
0x3a65   :  { %2973 = vmin.xlane.f32.xlu0 %v2972_v15 }
0x3ac5   :  { %v3883_v47 = vpop.permute.xlu0 %3882 }
0x3ac6   :  { %v3884_v49 = vsel %vm3880_vm1, %v3883_v47, %v3853_v46  ;;  %vm3885_vm12 = vcmp.eq.s32.totalorder %v5436_v24, %v3883_v47  ;;  %v2996_v46 = vshll.u32 %v2995_v33, 16 }
0x3ac7   :  { %v3895_v17 = vsel %vm3885_vm12, %v3894_v48, 0 }
0x3ac8   :  { %v3896_v6 = vsel %vm3740_vm6, %v3895_v17, 0 }
0x3ac9   :  { %v3898_v41 = vshrl.u32 %v3896_v6, 16  ;;  %v3897_v61 = vand.u32 65535, %v3896_v6 }
0x3acb   :  { %v3900_v10 = vcvt.s32.f32 %v3898_v41  ;;  %v3899_v20 = vcvt.s32.f32 %v3897_v61 }
0x3acd   :  { %3903 = vadd.xlane.f32.xlu1 %v3900_v10 }
0x3ad1   :  { %3901 = vadd.xlane.f32.xlu1 %v3899_v20 }
0x3af2   :  { %v2974_v25 = vpop.xlane.xlu0 %2973 }
0x3af3   :  { %vm2975_vm2 = vcmp.eq.f32.partialorder %v2972_v15, %v2974_v25  ;;  %v2980_v18 = vcvt.f32.s32 %v2974_v25 }
0x3af4   :  { %v2976_v56 = vsel %vm2975_vm2, %v2971_v14, inf }
0x3af5   :  { %2977 = vmin.xlane.f32.xlu1 %v2976_v56  ;;  %v2981_v4 = vshll.u32 %v2980_v18, 16 }
0x3af9   :  { %2992 = vmin.xlane.f32.xlu1 %v2991_v8 }
0x3b5a   :  { %v3904_v54 = vpop.xlane.xlu1 %3903 }
0x3b5b   :  { %v3906_v7 = vcvt.f32.s32 %v3904_v54 }
0x3b5d   :  { %v3907_v28 = vshll.u32 %v3906_v7, 16 }
0x3b5e   :  { %v3902_v0 = vpop.xlane.xlu1 %3901 }
0x3b5f   :  { %v3905_v26 = vcvt.f32.s32 %v3902_v0 }
0x3b61   :  { %v3908_v27 = vadd.s32 %v3907_v28, %v3905_v26 }
0x3b63   :  { %v3910_v32 = vsel %vm3909_vm5, %v5651_v43, %v3908_v27 }
0x3b64   :  { %3913 = vperm.xlu1 %4478, %v3910_v32  }
0x3b68   :  { %2705 = vrot.lane.b32.xlu1 %v5340_v53, %s4765_s18  ;;  %s3954_s18 = sshll.u32 %s4769_s2, 4  ;;  %s3955_s18 = int_to_ptr.vmem [resolvable:$true] %s3954_s18 }
0x3b69   :  { %s4735_s4 = scalar_lea.vmem %s3955_s18, 32  ;;  %p4740_p1 = scmp.lt.s32.totalorder %s3955_s18, %s3955_s18 }
0x3b6a   :  { %p4736_p0 = scmp.ne.s32.totalorder %s3955_s18, %s4735_s4  ;;  %p4741_p2 = scmp.lt.s32.totalorder %s4735_s4, %s4735_s4 }
0x3b6c   :  { %p4742_p3 = por %p4741_p2, %p4740_p1 }
0x3b6e   :  { %p4743_p4 = pnand %p4742_p3, %p4736_p0 }
0x3b82   :  { %v2978_v2 = vpop.xlane.xlu1 %2977 }
0x3b83   :  { %v2979_v60 = vcvt.f32.s32 %v2978_v2 }
0x3b85   :  { %v2982_v34 = vadd.s32 %v2981_v4, %v2979_v60 }
0x3b86   :  { %v2993_v52 = vpop.xlane.xlu1 %2992 }
0x3b87   :  { %v2994_v57 = vcvt.f32.s32 %v2993_v52  ;;  %v3920_v59 = vrot.slane %v2982_v34, %v5440_v22 }
0x3b89   :  { %v2997_v40 = vadd.s32 %v2996_v46, %v2994_v57 }
0x3b8b   :  { %v3924_v3 = vrot.slane %v2997_v40, %v5440_v22 }
0x3b8d   :  { %v3925_v13 = vsel %vm3347_vm3, %v3924_v3, %v3920_v59  ;;  %vm3940_vm3 = vcmp.le.s32.totalorder %v5645_v23, 0 }
0x3be3   :  { %v3914_v9 = vpop.permute.xlu1 %3913 }
0x3be4   :  { %v3915_v53 = vsel %vm3911_vm7, %v3914_v9, %v3884_v49  ;;  %vm3916_vm8 = vcmp.eq.s32.totalorder %v5436_v24, %v3914_v9 }
0x3be5   :  { %v3926_v42 = vsel %vm3916_vm8, %v3925_v13, 0 }
0x3be6   :  { %v3927_v62 = vsel %vm3740_vm6, %v3926_v42, 0 }
0x3be7   :  { %v2706_v63 = vpop.permute.xlu1 %2705  ;;  %v3929_v39 = vshrl.u32 %v3927_v62, 16  ;;  %v3928_v12 = vand.u32 65535, %v3927_v62 }
0x3be8   :  { %2708 = vst.msk [vmem:[#allocation2] sm:$0x3] %vm740_vm10, %v2706_v63  ;;  %vm3942_vm10 = vcmp.eq.s32.totalorder %v5436_v24, 0 }
0x3be9   :  { %v3931_v29 = vcvt.s32.f32 %v3929_v39  ;;  %v3930_v55 = vcvt.s32.f32 %v3928_v12 }
0x3beb   :  { %3934 = vadd.xlane.f32.xlu0 %v3931_v29 }
0x3bef   :  { %3932 = vadd.xlane.f32.xlu0 %v3930_v55 }
0x3c78   :  { %v3935_v35 = vpop.xlane.xlu0 %3934 }
0x3c79   :  { %v3937_v22 = vcvt.f32.s32 %v3935_v35 }
0x3c7b   :  { %v3938_v44 = vshll.u32 %v3937_v22, 16 }
0x3c7c   :  { %v3933_v15 = vpop.xlane.xlu0 %3932 }
0x3c7d   :  { %v3936_v16 = vcvt.f32.s32 %v3933_v15 }
0x3c7f   :  { %v3939_v50 = vadd.s32 %v3938_v44, %v3936_v16 }
0x3c81   :  { %v3941_v51 = vsel %vm3940_vm3, %v5651_v43, %v3939_v50 }
0x3c82   :  { %3944 = vperm.xlu0 %4477, %v3941_v51  }
0x3d01   :  { %v3945_v36 = vpop.permute.xlu0 %3944 }
0x3d02   :  { %v3946_v31 = vsel %vm3942_vm10, %v3945_v36, %v3915_v53 }
0x3d03   :  { %3947 = vst.msk [vmem:[#allocation5] sm:$0x3] %vm3740_vm6, %v3946_v31 }
0x3d04   :  { %4746 = shalt.err (!%p4743_p4)
}
0x3d05   :  { %s4747_s15 = scalar_lea.hbm %s5833_s14, 32 }
0x3d06   :  { %p4748_p5 = scmp.ne.s32.totalorder %s5833_s14, %s4747_s15  ;;  %p4751_p6 = scmp.lt.u32.totalorder %s4747_s15, %s5833_s14 }
0x3d08   :  { %p4753_p7 = pnand %p4751_p6, %p4748_p5 }
0x3d0a   :  { %4756 = shalt.err (!%p4753_p7)
}
0x3d0b   :  { %3957 = dma.vmem_to_hbm [thread:$0]  %s3955_s18, 32, %s5833_s14, [#allocation6]  }
0x3d0c   :  { %4757 = dma.done.wait [#allocation6], 32  }
0x3d0d   :  { %4758 = vsyncadd [#allocation6], 4294967264 }
0x3d0e   :  { %3961 = vsyncpa [#allocation6], 1 }

</bundles_post_ra>
